<compile_context>
chip_gen: v5e
topology: v5e:2x2
jax: 0.10.0
libtpu: 0.0.40
codegen_flags: <defaults>
</compile_context>

<pallas_src>
import functools

import jax
import jax.numpy as jnp
from jax.experimental import pallas as pl
from jax.experimental.pallas import tpu as pltpu

# ---------------- configuration (mirrors MTCN(__init__) defaults) ------------
IN_C = 4                       # in_channels
OUT_C = 24                     # out_channels (must be multiple of 6 branches)
KS = 3                         # temporal kernel_size
DILATIONS = (1, 2, 3, 4)
ND = len(DILATIONS)
NUM_BRANCHES = ND + 2          # 4 dilated + maxpool + plain 1x1 = 6
BC = OUT_C // NUM_BRANCHES     # branch_channels = 4
BN_EPS = 1e-5
Z_W = (ND + 1) * BC            # 20 : the 5 ReLU'd branch groups

# slice layout of the stacked z-side weights wz : (WZ_N, Z_W, OUT_C)
WZ_CENTER = 0                  # center taps of the 4 dilated branches
WZ_LEFT = 1                    # left taps (value z[r - d*V]), d = 1..4
WZ_RIGHT = 1 + ND              # right taps (value z[r + d*V]), d = 1..4
WZ_MP = 1 + 2 * ND             # post-maxpool BN diagonal scale
WZ_N = 2 + 2 * ND              # 10


# ---------------- Pallas kernel ----------------------------------------------
def mtcn_kernel(x_ref, wpw_ref, bpw_ref, wd_ref, wz_ref, bout_ref,
                out_ref, z_scr, *, V, chunk):
    R = out_ref.shape[1]
    pad = max(DILATIONS) * V
    f32 = jnp.float32

    # Zero the guard rows every step (cheap: 2*pad rows); keeps the kernel
    # correct under megacore grid sharding where the scratch is per-core.
    z_scr[0:pad, :] = jnp.zeros((pad, Z_W), f32)
    z_scr[pad + R:pad + R + pad, :] = jnp.zeros((pad, Z_W), f32)

    # Phase A: fused branch 1x1 convs (+folded BN) + ReLU for the 5 ReLU'd
    # branches; one full-width store per row chunk into the padded scratch.
    for s in range(0, R, chunk):
        xc = x_ref[0, s:s + chunk, :]
        zc = jnp.dot(xc, wpw_ref[...], preferred_element_type=f32) + bpw_ref[...]
        z_scr[pad + s:pad + s + chunk, :] = jnp.maximum(zc, 0.0)

    # Phase B: per row chunk, accumulate all branches + residual in registers
    # and store the full (chunk, OUT_C) output tile once.
    for s in range(0, R, chunk):
        base = pad + s
        xc = x_ref[0, s:s + chunk, :]

        # residual 1x1 conv (+BN) and plain-1x1 branch (+BN), folded into one
        # (Cin, OUT_C) matmul, plus every branch bias / BN shift.
        acc = jnp.dot(xc, wd_ref[...], preferred_element_type=f32) + bout_ref[...]

        # center taps of the 4 dilated temporal convs (block-diagonal weight)
        acc = acc + jnp.dot(z_scr[base:base + chunk, :], wz_ref[WZ_CENTER],
                            preferred_element_type=f32)

        # maxpool branch: max over (t-1, t, t+1); zero padding is exact because
        # the pooled input is post-ReLU (>= 0).  BN after the max is applied as
        # a diagonal scale inside wz[WZ_MP].
        mp = jnp.maximum(
            jnp.maximum(z_scr[base - V:base - V + chunk, :],
                        z_scr[base + V:base + V + chunk, :]),
            z_scr[base:base + chunk, :])
        acc = acc + jnp.dot(mp, wz_ref[WZ_MP], preferred_element_type=f32)

        # left / right dilated taps: aligned row-slice loads of the padded
        # scratch, each consumed directly by a tiny block-sparse matmul.
        for i, d in enumerate(DILATIONS):
            off = d * V
            acc = acc + jnp.dot(z_scr[base - off:base - off + chunk, :],
                                wz_ref[WZ_LEFT + i], preferred_element_type=f32)
            acc = acc + jnp.dot(z_scr[base + off:base + off + chunk, :],
                                wz_ref[WZ_RIGHT + i], preferred_element_type=f32)

        out_ref[0, s:s + chunk, :] = acc.astype(out_ref.dtype)


# ---------------- host-side BN folding + weight fusion -------------------------
def fold_params(p):
    f32 = jnp.float32
    # fold BN into the six 1x1 convs
    w1f = p['w1'] * p['s1']                                   # (6, Cin, BC)
    b1f = p['b1'] * p['s1'] + p['t1']                         # (6, 1, BC)
    # fold BN into the residual 1x1 conv
    wrf = p['wr'] * p['sr']                                   # (Cin, OUT_C)
    brf = p['br'] * p['sr'] + p['tr']                         # (1, OUT_C)
    # fold BN into the dilated temporal convs
    wtf = p['wt'] * p['s2'][:ND, None, :, :]                  # (ND, KS, BC, BC)
    btf = p['bt'] * p['s2'][:ND] + p['t2'][:ND]               # (ND, 1, BC)
    # BN after the maxpool: cannot be folded before the max; applied after as a
    # diagonal scale + shift.
    s2_mp = p['s2'][ND]                                       # (1, BC)
    t2_mp = p['t2'][ND]                                       # (1, BC)

    # fused pointwise weight/bias: the 5 ReLU'd branches (4 dilated + maxpool)
    wpw = jnp.concatenate([w1f[i] for i in range(ND + 1)], axis=1)   # (Cin, 20)
    bpw = jnp.concatenate([b1f[i] for i in range(ND + 1)], axis=1)   # (1, 20)

    # "direct" matmul weight: residual (all 24 cols) + plain-1x1 branch folded
    wd = wrf.at[:, (ND + 1) * BC:(ND + 2) * BC].add(w1f[ND + 1])     # (Cin, 24)
    bout = brf + jnp.concatenate(
        [btf[i] for i in range(ND)] + [t2_mp, b1f[ND + 1]], axis=1)  # (1, 24)

    # stacked z-side weights: [center | left d=1..4 | right d=1..4 | mp scale]
    wz = jnp.zeros((WZ_N, Z_W, OUT_C), f32)
    for i in range(ND):
        c = i * BC
        wz = wz.at[WZ_CENTER, c:c + BC, c:c + BC].set(wtf[i, 1])
        wz = wz.at[WZ_LEFT + i, c:c + BC, c:c + BC].set(wtf[i, 0])
        wz = wz.at[WZ_RIGHT + i, c:c + BC, c:c + BC].set(wtf[i, 2])
    c = ND * BC
    wz = wz.at[WZ_MP, c:c + BC, c:c + BC].set(jnp.diag(s2_mp[0]))
    return wpw, bpw, wd, wz, bout


# ---------------- wrapper ------------------------------------------------------
def mtcn_pallas(x, p):
    """x: (N, T, V, Cin) float32 -> (N, T, V, OUT_C) float32."""
    N, T, V, Cin = x.shape
    R = T * V
    pad = max(DILATIONS) * V
    chunk = 128 if (R >= 128 and R % 128 == 0) else R
    x2 = x.reshape(N, R, Cin)

    weights = fold_params(p)   # (wpw, bpw, wd, wz, bout)

    def full_spec(a):
        zeros = (0,) * a.ndim
        return pl.BlockSpec(a.shape, lambda n, _z=zeros: _z)

    out2 = pl.pallas_call(
        functools.partial(mtcn_kernel, V=V, chunk=chunk),
        out_shape=jax.ShapeDtypeStruct((N, R, OUT_C), jnp.float32),
        grid=(N,),
        in_specs=[pl.BlockSpec((1, R, Cin), lambda n: (n, 0, 0))]
                 + [full_spec(a) for a in weights],
        out_specs=pl.BlockSpec((1, R, OUT_C), lambda n: (n, 0, 0)),
        scratch_shapes=[pltpu.VMEM((R + 2 * pad, Z_W), jnp.float32)],
        compiler_params=pltpu.CompilerParams(dimension_semantics=("parallel",)),
    )(x2, *weights)
    return out2.reshape(N, T, V, OUT_C)


# ---------------- deterministic parameter construction -------------------------
def make_params(key):
    ks = jax.random.split(key, 8)
    f32 = jnp.float32

    def kaiming(k, shape, fan_out):
        return (jnp.sqrt(2.0 / fan_out) * jax.random.normal(k, shape)).astype(f32)

    # 6 branch 1x1 convs (in -> BC), conv bias initialised to 0 (weights_init)
    w1 = kaiming(ks[0], (NUM_BRANCHES, IN_C, BC), fan_out=BC)
    b1 = jnp.zeros((NUM_BRANCHES, 1, BC), f32)
    # BN after each 1x1 conv: gamma ~ N(1, 0.02), beta = 0; fold running stats
    g1 = (1.0 + 0.02 * jax.random.normal(ks[1], (NUM_BRANCHES, 1, BC))).astype(f32)
    s1 = g1 / jnp.sqrt(1.0 + BN_EPS)
    t1 = jnp.zeros((NUM_BRANCHES, 1, BC), f32)
    # temporal conv weights for the 4 dilated branches: (branch, tap, BC, BC)
    wt = kaiming(ks[2], (ND, KS, BC, BC), fan_out=BC * KS)
    bt = jnp.zeros((ND, 1, BC), f32)
    # BN after temporal conv (4 branches) + BN after maxpool (1 branch)
    g2 = (1.0 + 0.02 * jax.random.normal(ks[3], (ND + 1, 1, BC))).astype(f32)
    s2 = g2 / jnp.sqrt(1.0 + BN_EPS)
    t2 = jnp.zeros((ND + 1, 1, BC), f32)
    # residual TemporalConv(in, out, k=1): 1x1 conv + BN
    wr = kaiming(ks[4], (IN_C, OUT_C), fan_out=OUT_C)
    br = jnp.zeros((1, OUT_C), f32)
    gr = (1.0 + 0.02 * jax.random.normal(ks[5], (1, OUT_C))).astype(f32)
    sr = gr / jnp.sqrt(1.0 + BN_EPS)
    tr = jnp.zeros((1, OUT_C), f32)
    return dict(w1=w1, b1=b1, s1=s1, t1=t1, wt=wt, bt=bt, s2=s2, t2=t2,
                wr=wr, br=br, sr=sr, tr=tr)


# ---------------- pure-JAX reference (same folded-BN semantics) ----------------
def mtcn_reference(x, p):
    N, T, V, Cin = x.shape

    def pw(w, b, s, t):
        y = jnp.einsum('ntvc,cd->ntvd', x, w) + b
        return y * s + t

    res = jnp.einsum('ntvc,cd->ntvd', x, p['wr']) + p['br']
    res = res * p['sr'] + p['tr']

    outs = []
    for i, d in enumerate(DILATIONS):
        y = jax.nn.relu(pw(p['w1'][i], p['b1'][i], p['s1'][i], p['t1'][i]))
        pad = ((KS - 1) * d) // 2
        yp = jnp.pad(y, ((0, 0), (pad, pad), (0, 0), (0, 0)))
        o = jnp.zeros((N, T, V, BC), jnp.float32) + p['bt'][i]
        for kk in range(KS):
            o = o + jnp.einsum('ntvc,cd->ntvd', yp[:, kk * d:kk * d + T], p['wt'][i, kk])
        outs.append(o * p['s2'][i] + p['t2'][i])

    i = ND
    y = jax.nn.relu(pw(p['w1'][i], p['b1'][i], p['s1'][i], p['t1'][i]))
    yp = jnp.pad(y, ((0, 0), (1, 1), (0, 0), (0, 0)), constant_values=-jnp.inf)
    m = jnp.maximum(jnp.maximum(yp[:, 0:T], yp[:, 1:T + 1]), yp[:, 2:T + 2])
    outs.append(m * p['s2'][i] + p['t2'][i])

    i = ND + 1
    outs.append(pw(p['w1'][i], p['b1'][i], p['s1'][i], p['t1'][i]))

    return jnp.concatenate(outs, axis=-1) + res


# ---------------- main ---------------------------------------------------------
if __name__ == "__main__":
    key = jax.random.PRNGKey(0)
    kx, kp = jax.random.split(key)

    N, T, V = 2, 16, 16                       # PyTorch x: (N, C, T, V) = (2, 4, 16, 16)
    x_nchw = jax.random.normal(kx, (N, IN_C, T, V), dtype=jnp.float32)
    x = jnp.transpose(x_nchw, (0, 2, 3, 1))   # -> (N, T, V, C) channels-last

    params = make_params(kp)

    out = mtcn_pallas(x, params)
    out = jax.block_until_ready(out)

    ref = jax.block_until_ready(mtcn_reference(x, params))
    assert out.shape == (N, T, V, OUT_C)
    assert bool(jnp.all(jnp.isfinite(out)))
    assert bool(jnp.allclose(out, ref, atol=1e-4, rtol=1e-4)), "mismatch vs reference"

    print("KERNEL_OK")
</pallas_src>

<mosaic_0001>
module attributes {stable_mosaic.version = 11 : i64} {
  func.func @mtcn_kernel(%arg0: i32, %arg1: memref<1x256x4xf32, #tpu.memory_space<vmem>>, %arg2: memref<4x20xf32, #tpu.memory_space<vmem>>, %arg3: memref<1x20xf32, #tpu.memory_space<vmem>>, %arg4: memref<4x24xf32, #tpu.memory_space<vmem>>, %arg5: memref<10x20x24xf32, #tpu.memory_space<vmem>>, %arg6: memref<1x24xf32, #tpu.memory_space<vmem>>, %arg7: memref<1x256x24xf32, #tpu.memory_space<vmem>>, %arg8: memref<384x20xf32, #tpu.memory_space<vmem>>) attributes {dimension_semantics = [#tpu.dimension_semantics<parallel>], iteration_bounds = array<i64: 2>, scalar_prefetch = 0 : i64, scratch_operands = 1 : i64, tpu.core_type = #tpu.core_type<tc>, window_params = [{transform_indices = @transform_0, window_bounds = array<i64: 1, 256, 4>}, {pipeline_mode = #tpu.pipeline_mode<synchronous>, transform_indices = @transform_1, window_bounds = array<i64: 4, 20>}, {pipeline_mode = #tpu.pipeline_mode<synchronous>, transform_indices = @transform_2, window_bounds = array<i64: 1, 20>}, {pipeline_mode = #tpu.pipeline_mode<synchronous>, transform_indices = @transform_3, window_bounds = array<i64: 4, 24>}, {pipeline_mode = #tpu.pipeline_mode<synchronous>, transform_indices = @transform_4, window_bounds = array<i64: 10, 20, 24>}, {pipeline_mode = #tpu.pipeline_mode<synchronous>, transform_indices = @transform_5, window_bounds = array<i64: 1, 24>}, {transform_indices = @transform_6, window_bounds = array<i64: 1, 256, 24>}]} {
    %cst = arith.constant 0.000000e+00 : f32
    %0 = vector.broadcast %cst : f32 to vector<64x20xf32>
    %c0 = arith.constant 0 : index
    %c0_0 = arith.constant 0 : index
    %1 = vector.load %arg8[%c0, %c0_0] : memref<384x20xf32, #tpu.memory_space<vmem>>, vector<64x20xf32>
    tpu.vector_store %arg8[%c0, %c0_0], %0 {strides = array<i32>} : memref<384x20xf32, #tpu.memory_space<vmem>>, vector<64x20xf32>,
    %cst_1 = arith.constant 0.000000e+00 : f32
    %2 = vector.broadcast %cst_1 : f32 to vector<64x20xf32>
    %c320 = arith.constant 320 : index
    %c0_2 = arith.constant 0 : index
    %3 = vector.load %arg8[%c320, %c0_2] : memref<384x20xf32, #tpu.memory_space<vmem>>, vector<64x20xf32>
    tpu.vector_store %arg8[%c320, %c0_2], %2 {strides = array<i32>} : memref<384x20xf32, #tpu.memory_space<vmem>>, vector<64x20xf32>,
    %c0_3 = arith.constant 0 : index
    %c0_4 = arith.constant 0 : index
    %c0_5 = arith.constant 0 : index
    %4 = vector.load %arg1[%c0_3, %c0_4, %c0_5] : memref<1x256x4xf32, #tpu.memory_space<vmem>>, vector<1x128x4xf32>
    %5 = vector.shape_cast %4 : vector<1x128x4xf32> to vector<128x4xf32>
    %c0_6 = arith.constant 0 : index
    %c0_7 = arith.constant 0 : index
    %6 = vector.load %arg2[%c0_6, %c0_7] : memref<4x20xf32, #tpu.memory_space<vmem>>, vector<4x20xf32>
    %cst_8 = arith.constant dense<0.000000e+00> : vector<128x20xf32>
    %7 = tpu.matmul %5, %6, %cst_8 {dimension_numbers = #tpu.dot_dimension_numbers<[1], [0], [0], [1], [0, 0, 1, 1], [], []>} : vector<128x4xf32>, vector<4x20xf32>, vector<128x20xf32> -> vector<128x20xf32>
    %c0_9 = arith.constant 0 : index
    %c0_10 = arith.constant 0 : index
    %8 = vector.load %arg3[%c0_9, %c0_10] : memref<1x20xf32, #tpu.memory_space<vmem>>, vector<1x20xf32>
    %9 = vector.broadcast %8 : vector<1x20xf32> to vector<128x20xf32>
    %10 = arith.addf %7, %9 : vector<128x20xf32>
    %cst_11 = arith.constant 0.000000e+00 : f32
    %11 = vector.broadcast %cst_11 : f32 to vector<128x20xf32>
    %12 = arith.maximumf %10, %11 : vector<128x20xf32>
    %c64 = arith.constant 64 : index
    %c0_12 = arith.constant 0 : index
    %13 = vector.load %arg8[%c64, %c0_12] : memref<384x20xf32, #tpu.memory_space<vmem>>, vector<128x20xf32>
    tpu.vector_store %arg8[%c64, %c0_12], %12 {strides = array<i32>} : memref<384x20xf32, #tpu.memory_space<vmem>>, vector<128x20xf32>,
    %c0_13 = arith.constant 0 : index
    %c128 = arith.constant 128 : index
    %c0_14 = arith.constant 0 : index
    %14 = vector.load %arg1[%c0_13, %c128, %c0_14] : memref<1x256x4xf32, #tpu.memory_space<vmem>>, vector<1x128x4xf32>
    %15 = vector.shape_cast %14 : vector<1x128x4xf32> to vector<128x4xf32>
    %c0_15 = arith.constant 0 : index
    %c0_16 = arith.constant 0 : index
    %16 = vector.load %arg2[%c0_15, %c0_16] : memref<4x20xf32, #tpu.memory_space<vmem>>, vector<4x20xf32>
    %cst_17 = arith.constant dense<0.000000e+00> : vector<128x20xf32>
    %17 = tpu.matmul %15, %16, %cst_17 {dimension_numbers = #tpu.dot_dimension_numbers<[1], [0], [0], [1], [0, 0, 1, 1], [], []>} : vector<128x4xf32>, vector<4x20xf32>, vector<128x20xf32> -> vector<128x20xf32>
    %c0_18 = arith.constant 0 : index
    %c0_19 = arith.constant 0 : index
    %18 = vector.load %arg3[%c0_18, %c0_19] : memref<1x20xf32, #tpu.memory_space<vmem>>, vector<1x20xf32>
    %19 = vector.broadcast %18 : vector<1x20xf32> to vector<128x20xf32>
    %20 = arith.addf %17, %19 : vector<128x20xf32>
    %cst_20 = arith.constant 0.000000e+00 : f32
    %21 = vector.broadcast %cst_20 : f32 to vector<128x20xf32>
    %22 = arith.maximumf %20, %21 : vector<128x20xf32>
    %c192 = arith.constant 192 : index
    %c0_21 = arith.constant 0 : index
    %23 = vector.load %arg8[%c192, %c0_21] : memref<384x20xf32, #tpu.memory_space<vmem>>, vector<128x20xf32>
    tpu.vector_store %arg8[%c192, %c0_21], %22 {strides = array<i32>} : memref<384x20xf32, #tpu.memory_space<vmem>>, vector<128x20xf32>,
    %c0_22 = arith.constant 0 : index
    %c0_23 = arith.constant 0 : index
    %c0_24 = arith.constant 0 : index
    %24 = vector.load %arg1[%c0_22, %c0_23, %c0_24] : memref<1x256x4xf32, #tpu.memory_space<vmem>>, vector<1x128x4xf32>
    %25 = vector.shape_cast %24 : vector<1x128x4xf32> to vector<128x4xf32>
    %c0_25 = arith.constant 0 : index
    %c0_26 = arith.constant 0 : index
    %26 = vector.load %arg4[%c0_25, %c0_26] : memref<4x24xf32, #tpu.memory_space<vmem>>, vector<4x24xf32>
    %cst_27 = arith.constant dense<0.000000e+00> : vector<128x24xf32>
    %27 = tpu.matmul %25, %26, %cst_27 {dimension_numbers = #tpu.dot_dimension_numbers<[1], [0], [0], [1], [0, 0, 1, 1], [], []>} : vector<128x4xf32>, vector<4x24xf32>, vector<128x24xf32> -> vector<128x24xf32>
    %c0_28 = arith.constant 0 : index
    %c0_29 = arith.constant 0 : index
    %28 = vector.load %arg6[%c0_28, %c0_29] : memref<1x24xf32, #tpu.memory_space<vmem>>, vector<1x24xf32>
    %29 = vector.broadcast %28 : vector<1x24xf32> to vector<128x24xf32>
    %30 = arith.addf %27, %29 : vector<128x24xf32>
    %c64_30 = arith.constant 64 : index
    %c0_31 = arith.constant 0 : index
    %31 = vector.load %arg8[%c64_30, %c0_31] : memref<384x20xf32, #tpu.memory_space<vmem>>, vector<128x20xf32>
    %c0_32 = arith.constant 0 : index
    %c0_33 = arith.constant 0 : index
    %c0_34 = arith.constant 0 : index
    %32 = vector.load %arg5[%c0_32, %c0_33, %c0_34] : memref<10x20x24xf32, #tpu.memory_space<vmem>>, vector<1x20x24xf32>
    %33 = vector.shape_cast %32 : vector<1x20x24xf32> to vector<20x24xf32>
    %cst_35 = arith.constant dense<0.000000e+00> : vector<128x24xf32>
    %34 = tpu.matmul %31, %33, %cst_35 {dimension_numbers = #tpu.dot_dimension_numbers<[1], [0], [0], [1], [0, 0, 1, 1], [], []>} : vector<128x20xf32>, vector<20x24xf32>, vector<128x24xf32> -> vector<128x24xf32>
    %35 = arith.addf %30, %34 : vector<128x24xf32>
    %c48 = arith.constant 48 : index
    %c0_36 = arith.constant 0 : index
    %36 = vector.load %arg8[%c48, %c0_36] : memref<384x20xf32, #tpu.memory_space<vmem>>, vector<128x20xf32>
    %c80 = arith.constant 80 : index
    %c0_37 = arith.constant 0 : index
    %37 = vector.load %arg8[%c80, %c0_37] : memref<384x20xf32, #tpu.memory_space<vmem>>, vector<128x20xf32>
    %38 = arith.maximumf %36, %37 : vector<128x20xf32>
    %c64_38 = arith.constant 64 : index
    %c0_39 = arith.constant 0 : index
    %39 = vector.load %arg8[%c64_38, %c0_39] : memref<384x20xf32, #tpu.memory_space<vmem>>, vector<128x20xf32>
    %40 = arith.maximumf %38, %39 : vector<128x20xf32>
    %c9 = arith.constant 9 : index
    %c0_40 = arith.constant 0 : index
    %c0_41 = arith.constant 0 : index
    %41 = vector.load %arg5[%c9, %c0_40, %c0_41] : memref<10x20x24xf32, #tpu.memory_space<vmem>>, vector<1x20x24xf32>
    %42 = vector.shape_cast %41 : vector<1x20x24xf32> to vector<20x24xf32>
    %cst_42 = arith.constant dense<0.000000e+00> : vector<128x24xf32>
    %43 = tpu.matmul %40, %42, %cst_42 {dimension_numbers = #tpu.dot_dimension_numbers<[1], [0], [0], [1], [0, 0, 1, 1], [], []>} : vector<128x20xf32>, vector<20x24xf32>, vector<128x24xf32> -> vector<128x24xf32>
    %44 = arith.addf %35, %43 : vector<128x24xf32>
    %c48_43 = arith.constant 48 : index
    %c0_44 = arith.constant 0 : index
    %45 = vector.load %arg8[%c48_43, %c0_44] : memref<384x20xf32, #tpu.memory_space<vmem>>, vector<128x20xf32>
    %c1 = arith.constant 1 : index
    %c0_45 = arith.constant 0 : index
    %c0_46 = arith.constant 0 : index
    %46 = vector.load %arg5[%c1, %c0_45, %c0_46] : memref<10x20x24xf32, #tpu.memory_space<vmem>>, vector<1x20x24xf32>
    %47 = vector.shape_cast %46 : vector<1x20x24xf32> to vector<20x24xf32>
    %cst_47 = arith.constant dense<0.000000e+00> : vector<128x24xf32>
    %48 = tpu.matmul %45, %47, %cst_47 {dimension_numbers = #tpu.dot_dimension_numbers<[1], [0], [0], [1], [0, 0, 1, 1], [], []>} : vector<128x20xf32>, vector<20x24xf32>, vector<128x24xf32> -> vector<128x24xf32>
    %49 = arith.addf %44, %48 : vector<128x24xf32>
    %c80_48 = arith.constant 80 : index
    %c0_49 = arith.constant 0 : index
    %50 = vector.load %arg8[%c80_48, %c0_49] : memref<384x20xf32, #tpu.memory_space<vmem>>, vector<128x20xf32>
    %c5 = arith.constant 5 : index
    %c0_50 = arith.constant 0 : index
    %c0_51 = arith.constant 0 : index
    %51 = vector.load %arg5[%c5, %c0_50, %c0_51] : memref<10x20x24xf32, #tpu.memory_space<vmem>>, vector<1x20x24xf32>
    %52 = vector.shape_cast %51 : vector<1x20x24xf32> to vector<20x24xf32>
    %cst_52 = arith.constant dense<0.000000e+00> : vector<128x24xf32>
    %53 = tpu.matmul %50, %52, %cst_52 {dimension_numbers = #tpu.dot_dimension_numbers<[1], [0], [0], [1], [0, 0, 1, 1], [], []>} : vector<128x20xf32>, vector<20x24xf32>, vector<128x24xf32> -> vector<128x24xf32>
    %54 = arith.addf %49, %53 : vector<128x24xf32>
    %c32 = arith.constant 32 : index
    %c0_53 = arith.constant 0 : index
    %55 = vector.load %arg8[%c32, %c0_53] : memref<384x20xf32, #tpu.memory_space<vmem>>, vector<128x20xf32>
    %c2 = arith.constant 2 : index
    %c0_54 = arith.constant 0 : index
    %c0_55 = arith.constant 0 : index
    %56 = vector.load %arg5[%c2, %c0_54, %c0_55] : memref<10x20x24xf32, #tpu.memory_space<vmem>>, vector<1x20x24xf32>
    %57 = vector.shape_cast %56 : vector<1x20x24xf32> to vector<20x24xf32>
    %cst_56 = arith.constant dense<0.000000e+00> : vector<128x24xf32>
    %58 = tpu.matmul %55, %57, %cst_56 {dimension_numbers = #tpu.dot_dimension_numbers<[1], [0], [0], [1], [0, 0, 1, 1], [], []>} : vector<128x20xf32>, vector<20x24xf32>, vector<128x24xf32> -> vector<128x24xf32>
    %59 = arith.addf %54, %58 : vector<128x24xf32>
    %c96 = arith.constant 96 : index
    %c0_57 = arith.constant 0 : index
    %60 = vector.load %arg8[%c96, %c0_57] : memref<384x20xf32, #tpu.memory_space<vmem>>, vector<128x20xf32>
    %c6 = arith.constant 6 : index
    %c0_58 = arith.constant 0 : index
    %c0_59 = arith.constant 0 : index
    %61 = vector.load %arg5[%c6, %c0_58, %c0_59] : memref<10x20x24xf32, #tpu.memory_space<vmem>>, vector<1x20x24xf32>
    %62 = vector.shape_cast %61 : vector<1x20x24xf32> to vector<20x24xf32>
    %cst_60 = arith.constant dense<0.000000e+00> : vector<128x24xf32>
    %63 = tpu.matmul %60, %62, %cst_60 {dimension_numbers = #tpu.dot_dimension_numbers<[1], [0], [0], [1], [0, 0, 1, 1], [], []>} : vector<128x20xf32>, vector<20x24xf32>, vector<128x24xf32> -> vector<128x24xf32>
    %64 = arith.addf %59, %63 : vector<128x24xf32>
    %c16 = arith.constant 16 : index
    %c0_61 = arith.constant 0 : index
    %65 = vector.load %arg8[%c16, %c0_61] : memref<384x20xf32, #tpu.memory_space<vmem>>, vector<128x20xf32>
    %c3 = arith.constant 3 : index
    %c0_62 = arith.constant 0 : index
    %c0_63 = arith.constant 0 : index
    %66 = vector.load %arg5[%c3, %c0_62, %c0_63] : memref<10x20x24xf32, #tpu.memory_space<vmem>>, vector<1x20x24xf32>
    %67 = vector.shape_cast %66 : vector<1x20x24xf32> to vector<20x24xf32>
    %cst_64 = arith.constant dense<0.000000e+00> : vector<128x24xf32>
    %68 = tpu.matmul %65, %67, %cst_64 {dimension_numbers = #tpu.dot_dimension_numbers<[1], [0], [0], [1], [0, 0, 1, 1], [], []>} : vector<128x20xf32>, vector<20x24xf32>, vector<128x24xf32> -> vector<128x24xf32>
    %69 = arith.addf %64, %68 : vector<128x24xf32>
    %c112 = arith.constant 112 : index
    %c0_65 = arith.constant 0 : index
    %70 = vector.load %arg8[%c112, %c0_65] : memref<384x20xf32, #tpu.memory_space<vmem>>, vector<128x20xf32>
    %c7 = arith.constant 7 : index
    %c0_66 = arith.constant 0 : index
    %c0_67 = arith.constant 0 : index
    %71 = vector.load %arg5[%c7, %c0_66, %c0_67] : memref<10x20x24xf32, #tpu.memory_space<vmem>>, vector<1x20x24xf32>
    %72 = vector.shape_cast %71 : vector<1x20x24xf32> to vector<20x24xf32>
    %cst_68 = arith.constant dense<0.000000e+00> : vector<128x24xf32>
    %73 = tpu.matmul %70, %72, %cst_68 {dimension_numbers = #tpu.dot_dimension_numbers<[1], [0], [0], [1], [0, 0, 1, 1], [], []>} : vector<128x20xf32>, vector<20x24xf32>, vector<128x24xf32> -> vector<128x24xf32>
    %74 = arith.addf %69, %73 : vector<128x24xf32>
    %c0_69 = arith.constant 0 : index
    %c0_70 = arith.constant 0 : index
    %75 = vector.load %arg8[%c0_69, %c0_70] : memref<384x20xf32, #tpu.memory_space<vmem>>, vector<128x20xf32>
    %c4 = arith.constant 4 : index
    %c0_71 = arith.constant 0 : index
    %c0_72 = arith.constant 0 : index
    %76 = vector.load %arg5[%c4, %c0_71, %c0_72] : memref<10x20x24xf32, #tpu.memory_space<vmem>>, vector<1x20x24xf32>
    %77 = vector.shape_cast %76 : vector<1x20x24xf32> to vector<20x24xf32>
    %cst_73 = arith.constant dense<0.000000e+00> : vector<128x24xf32>
    %78 = tpu.matmul %75, %77, %cst_73 {dimension_numbers = #tpu.dot_dimension_numbers<[1], [0], [0], [1], [0, 0, 1, 1], [], []>} : vector<128x20xf32>, vector<20x24xf32>, vector<128x24xf32> -> vector<128x24xf32>
    %79 = arith.addf %74, %78 : vector<128x24xf32>
    %c128_74 = arith.constant 128 : index
    %c0_75 = arith.constant 0 : index
    %80 = vector.load %arg8[%c128_74, %c0_75] : memref<384x20xf32, #tpu.memory_space<vmem>>, vector<128x20xf32>
    %c8 = arith.constant 8 : index
    %c0_76 = arith.constant 0 : index
    %c0_77 = arith.constant 0 : index
    %81 = vector.load %arg5[%c8, %c0_76, %c0_77] : memref<10x20x24xf32, #tpu.memory_space<vmem>>, vector<1x20x24xf32>
    %82 = vector.shape_cast %81 : vector<1x20x24xf32> to vector<20x24xf32>
    %cst_78 = arith.constant dense<0.000000e+00> : vector<128x24xf32>
    %83 = tpu.matmul %80, %82, %cst_78 {dimension_numbers = #tpu.dot_dimension_numbers<[1], [0], [0], [1], [0, 0, 1, 1], [], []>} : vector<128x20xf32>, vector<20x24xf32>, vector<128x24xf32> -> vector<128x24xf32>
    %84 = arith.addf %79, %83 : vector<128x24xf32>
    %c0_79 = arith.constant 0 : index
    %c0_80 = arith.constant 0 : index
    %c0_81 = arith.constant 0 : index
    %85 = vector.load %arg7[%c0_79, %c0_80, %c0_81] : memref<1x256x24xf32, #tpu.memory_space<vmem>>, vector<1x128x24xf32>
    %86 = vector.shape_cast %85 : vector<1x128x24xf32> to vector<128x24xf32>
    %87 = vector.shape_cast %84 : vector<128x24xf32> to vector<1x128x24xf32>
    tpu.vector_store %arg7[%c0_79, %c0_80, %c0_81], %87 {strides = array<i32>} : memref<1x256x24xf32, #tpu.memory_space<vmem>>, vector<1x128x24xf32>,
    %c0_82 = arith.constant 0 : index
    %c128_83 = arith.constant 128 : index
    %c0_84 = arith.constant 0 : index
    %88 = vector.load %arg1[%c0_82, %c128_83, %c0_84] : memref<1x256x4xf32, #tpu.memory_space<vmem>>, vector<1x128x4xf32>
    %89 = vector.shape_cast %88 : vector<1x128x4xf32> to vector<128x4xf32>
    %c0_85 = arith.constant 0 : index
    %c0_86 = arith.constant 0 : index
    %90 = vector.load %arg4[%c0_85, %c0_86] : memref<4x24xf32, #tpu.memory_space<vmem>>, vector<4x24xf32>
    %cst_87 = arith.constant dense<0.000000e+00> : vector<128x24xf32>
    %91 = tpu.matmul %89, %90, %cst_87 {dimension_numbers = #tpu.dot_dimension_numbers<[1], [0], [0], [1], [0, 0, 1, 1], [], []>} : vector<128x4xf32>, vector<4x24xf32>, vector<128x24xf32> -> vector<128x24xf32>
    %c0_88 = arith.constant 0 : index
    %c0_89 = arith.constant 0 : index
    %92 = vector.load %arg6[%c0_88, %c0_89] : memref<1x24xf32, #tpu.memory_space<vmem>>, vector<1x24xf32>
    %93 = vector.broadcast %92 : vector<1x24xf32> to vector<128x24xf32>
    %94 = arith.addf %91, %93 : vector<128x24xf32>
    %c192_90 = arith.constant 192 : index
    %c0_91 = arith.constant 0 : index
    %95 = vector.load %arg8[%c192_90, %c0_91] : memref<384x20xf32, #tpu.memory_space<vmem>>, vector<128x20xf32>
    %c0_92 = arith.constant 0 : index
    %c0_93 = arith.constant 0 : index
    %c0_94 = arith.constant 0 : index
    %96 = vector.load %arg5[%c0_92, %c0_93, %c0_94] : memref<10x20x24xf32, #tpu.memory_space<vmem>>, vector<1x20x24xf32>
    %97 = vector.shape_cast %96 : vector<1x20x24xf32> to vector<20x24xf32>
    %cst_95 = arith.constant dense<0.000000e+00> : vector<128x24xf32>
    %98 = tpu.matmul %95, %97, %cst_95 {dimension_numbers = #tpu.dot_dimension_numbers<[1], [0], [0], [1], [0, 0, 1, 1], [], []>} : vector<128x20xf32>, vector<20x24xf32>, vector<128x24xf32> -> vector<128x24xf32>
    %99 = arith.addf %94, %98 : vector<128x24xf32>
    %c176 = arith.constant 176 : index
    %c0_96 = arith.constant 0 : index
    %100 = vector.load %arg8[%c176, %c0_96] : memref<384x20xf32, #tpu.memory_space<vmem>>, vector<128x20xf32>
    %c208 = arith.constant 208 : index
    %c0_97 = arith.constant 0 : index
    %101 = vector.load %arg8[%c208, %c0_97] : memref<384x20xf32, #tpu.memory_space<vmem>>, vector<128x20xf32>
    %102 = arith.maximumf %100, %101 : vector<128x20xf32>
    %c192_98 = arith.constant 192 : index
    %c0_99 = arith.constant 0 : index
    %103 = vector.load %arg8[%c192_98, %c0_99] : memref<384x20xf32, #tpu.memory_space<vmem>>, vector<128x20xf32>
    %104 = arith.maximumf %102, %103 : vector<128x20xf32>
    %c9_100 = arith.constant 9 : index
    %c0_101 = arith.constant 0 : index
    %c0_102 = arith.constant 0 : index
    %105 = vector.load %arg5[%c9_100, %c0_101, %c0_102] : memref<10x20x24xf32, #tpu.memory_space<vmem>>, vector<1x20x24xf32>
    %106 = vector.shape_cast %105 : vector<1x20x24xf32> to vector<20x24xf32>
    %cst_103 = arith.constant dense<0.000000e+00> : vector<128x24xf32>
    %107 = tpu.matmul %104, %106, %cst_103 {dimension_numbers = #tpu.dot_dimension_numbers<[1], [0], [0], [1], [0, 0, 1, 1], [], []>} : vector<128x20xf32>, vector<20x24xf32>, vector<128x24xf32> -> vector<128x24xf32>
    %108 = arith.addf %99, %107 : vector<128x24xf32>
    %c176_104 = arith.constant 176 : index
    %c0_105 = arith.constant 0 : index
    %109 = vector.load %arg8[%c176_104, %c0_105] : memref<384x20xf32, #tpu.memory_space<vmem>>, vector<128x20xf32>
    %c1_106 = arith.constant 1 : index
    %c0_107 = arith.constant 0 : index
    %c0_108 = arith.constant 0 : index
    %110 = vector.load %arg5[%c1_106, %c0_107, %c0_108] : memref<10x20x24xf32, #tpu.memory_space<vmem>>, vector<1x20x24xf32>
    %111 = vector.shape_cast %110 : vector<1x20x24xf32> to vector<20x24xf32>
    %cst_109 = arith.constant dense<0.000000e+00> : vector<128x24xf32>
    %112 = tpu.matmul %109, %111, %cst_109 {dimension_numbers = #tpu.dot_dimension_numbers<[1], [0], [0], [1], [0, 0, 1, 1], [], []>} : vector<128x20xf32>, vector<20x24xf32>, vector<128x24xf32> -> vector<128x24xf32>
    %113 = arith.addf %108, %112 : vector<128x24xf32>
    %c208_110 = arith.constant 208 : index
    %c0_111 = arith.constant 0 : index
    %114 = vector.load %arg8[%c208_110, %c0_111] : memref<384x20xf32, #tpu.memory_space<vmem>>, vector<128x20xf32>
    %c5_112 = arith.constant 5 : index
    %c0_113 = arith.constant 0 : index
    %c0_114 = arith.constant 0 : index
    %115 = vector.load %arg5[%c5_112, %c0_113, %c0_114] : memref<10x20x24xf32, #tpu.memory_space<vmem>>, vector<1x20x24xf32>
    %116 = vector.shape_cast %115 : vector<1x20x24xf32> to vector<20x24xf32>
    %cst_115 = arith.constant dense<0.000000e+00> : vector<128x24xf32>
    %117 = tpu.matmul %114, %116, %cst_115 {dimension_numbers = #tpu.dot_dimension_numbers<[1], [0], [0], [1], [0, 0, 1, 1], [], []>} : vector<128x20xf32>, vector<20x24xf32>, vector<128x24xf32> -> vector<128x24xf32>
    %118 = arith.addf %113, %117 : vector<128x24xf32>
    %c160 = arith.constant 160 : index
    %c0_116 = arith.constant 0 : index
    %119 = vector.load %arg8[%c160, %c0_116] : memref<384x20xf32, #tpu.memory_space<vmem>>, vector<128x20xf32>
    %c2_117 = arith.constant 2 : index
    %c0_118 = arith.constant 0 : index
    %c0_119 = arith.constant 0 : index
    %120 = vector.load %arg5[%c2_117, %c0_118, %c0_119] : memref<10x20x24xf32, #tpu.memory_space<vmem>>, vector<1x20x24xf32>
    %121 = vector.shape_cast %120 : vector<1x20x24xf32> to vector<20x24xf32>
    %cst_120 = arith.constant dense<0.000000e+00> : vector<128x24xf32>
    %122 = tpu.matmul %119, %121, %cst_120 {dimension_numbers = #tpu.dot_dimension_numbers<[1], [0], [0], [1], [0, 0, 1, 1], [], []>} : vector<128x20xf32>, vector<20x24xf32>, vector<128x24xf32> -> vector<128x24xf32>
    %123 = arith.addf %118, %122 : vector<128x24xf32>
    %c224 = arith.constant 224 : index
    %c0_121 = arith.constant 0 : index
    %124 = vector.load %arg8[%c224, %c0_121] : memref<384x20xf32, #tpu.memory_space<vmem>>, vector<128x20xf32>
    %c6_122 = arith.constant 6 : index
    %c0_123 = arith.constant 0 : index
    %c0_124 = arith.constant 0 : index
    %125 = vector.load %arg5[%c6_122, %c0_123, %c0_124] : memref<10x20x24xf32, #tpu.memory_space<vmem>>, vector<1x20x24xf32>
    %126 = vector.shape_cast %125 : vector<1x20x24xf32> to vector<20x24xf32>
    %cst_125 = arith.constant dense<0.000000e+00> : vector<128x24xf32>
    %127 = tpu.matmul %124, %126, %cst_125 {dimension_numbers = #tpu.dot_dimension_numbers<[1], [0], [0], [1], [0, 0, 1, 1], [], []>} : vector<128x20xf32>, vector<20x24xf32>, vector<128x24xf32> -> vector<128x24xf32>
    %128 = arith.addf %123, %127 : vector<128x24xf32>
    %c144 = arith.constant 144 : index
    %c0_126 = arith.constant 0 : index
    %129 = vector.load %arg8[%c144, %c0_126] : memref<384x20xf32, #tpu.memory_space<vmem>>, vector<128x20xf32>
    %c3_127 = arith.constant 3 : index
    %c0_128 = arith.constant 0 : index
    %c0_129 = arith.constant 0 : index
    %130 = vector.load %arg5[%c3_127, %c0_128, %c0_129] : memref<10x20x24xf32, #tpu.memory_space<vmem>>, vector<1x20x24xf32>
    %131 = vector.shape_cast %130 : vector<1x20x24xf32> to vector<20x24xf32>
    %cst_130 = arith.constant dense<0.000000e+00> : vector<128x24xf32>
    %132 = tpu.matmul %129, %131, %cst_130 {dimension_numbers = #tpu.dot_dimension_numbers<[1], [0], [0], [1], [0, 0, 1, 1], [], []>} : vector<128x20xf32>, vector<20x24xf32>, vector<128x24xf32> -> vector<128x24xf32>
    %133 = arith.addf %128, %132 : vector<128x24xf32>
    %c240 = arith.constant 240 : index
    %c0_131 = arith.constant 0 : index
    %134 = vector.load %arg8[%c240, %c0_131] : memref<384x20xf32, #tpu.memory_space<vmem>>, vector<128x20xf32>
    %c7_132 = arith.constant 7 : index
    %c0_133 = arith.constant 0 : index
    %c0_134 = arith.constant 0 : index
    %135 = vector.load %arg5[%c7_132, %c0_133, %c0_134] : memref<10x20x24xf32, #tpu.memory_space<vmem>>, vector<1x20x24xf32>
    %136 = vector.shape_cast %135 : vector<1x20x24xf32> to vector<20x24xf32>
    %cst_135 = arith.constant dense<0.000000e+00> : vector<128x24xf32>
    %137 = tpu.matmul %134, %136, %cst_135 {dimension_numbers = #tpu.dot_dimension_numbers<[1], [0], [0], [1], [0, 0, 1, 1], [], []>} : vector<128x20xf32>, vector<20x24xf32>, vector<128x24xf32> -> vector<128x24xf32>
    %138 = arith.addf %133, %137 : vector<128x24xf32>
    %c128_136 = arith.constant 128 : index
    %c0_137 = arith.constant 0 : index
    %139 = vector.load %arg8[%c128_136, %c0_137] : memref<384x20xf32, #tpu.memory_space<vmem>>, vector<128x20xf32>
    %c4_138 = arith.constant 4 : index
    %c0_139 = arith.constant 0 : index
    %c0_140 = arith.constant 0 : index
    %140 = vector.load %arg5[%c4_138, %c0_139, %c0_140] : memref<10x20x24xf32, #tpu.memory_space<vmem>>, vector<1x20x24xf32>
    %141 = vector.shape_cast %140 : vector<1x20x24xf32> to vector<20x24xf32>
    %cst_141 = arith.constant dense<0.000000e+00> : vector<128x24xf32>
    %142 = tpu.matmul %139, %141, %cst_141 {dimension_numbers = #tpu.dot_dimension_numbers<[1], [0], [0], [1], [0, 0, 1, 1], [], []>} : vector<128x20xf32>, vector<20x24xf32>, vector<128x24xf32> -> vector<128x24xf32>
    %143 = arith.addf %138, %142 : vector<128x24xf32>
    %c256 = arith.constant 256 : index
    %c0_142 = arith.constant 0 : index
    %144 = vector.load %arg8[%c256, %c0_142] : memref<384x20xf32, #tpu.memory_space<vmem>>, vector<128x20xf32>
    %c8_143 = arith.constant 8 : index
    %c0_144 = arith.constant 0 : index
    %c0_145 = arith.constant 0 : index
    %145 = vector.load %arg5[%c8_143, %c0_144, %c0_145] : memref<10x20x24xf32, #tpu.memory_space<vmem>>, vector<1x20x24xf32>
    %146 = vector.shape_cast %145 : vector<1x20x24xf32> to vector<20x24xf32>
    %cst_146 = arith.constant dense<0.000000e+00> : vector<128x24xf32>
    %147 = tpu.matmul %144, %146, %cst_146 {dimension_numbers = #tpu.dot_dimension_numbers<[1], [0], [0], [1], [0, 0, 1, 1], [], []>} : vector<128x20xf32>, vector<20x24xf32>, vector<128x24xf32> -> vector<128x24xf32>
    %148 = arith.addf %143, %147 : vector<128x24xf32>
    %c0_147 = arith.constant 0 : index
    %c128_148 = arith.constant 128 : index
    %c0_149 = arith.constant 0 : index
    %149 = vector.load %arg7[%c0_147, %c128_148, %c0_149] : memref<1x256x24xf32, #tpu.memory_space<vmem>>, vector<1x128x24xf32>
    %150 = vector.shape_cast %149 : vector<1x128x24xf32> to vector<128x24xf32>
    %151 = vector.shape_cast %148 : vector<128x24xf32> to vector<1x128x24xf32>
    tpu.vector_store %arg7[%c0_147, %c128_148, %c0_149], %151 {strides = array<i32>} : memref<1x256x24xf32, #tpu.memory_space<vmem>>, vector<1x128x24xf32>,
    return
  }
  func.func @transform_0(%arg0: i32) -> (i32, i32, i32) {
    %c0_i32 = arith.constant 0 : i32
    %c0_i32_0 = arith.constant 0 : i32
    %c0_i32_1 = arith.constant 0 : i32
    return %arg0, %c0_i32, %c0_i32_0 : i32, i32, i32
  }
  func.func @transform_1(%arg0: i32) -> (i32, i32) {
    %c0_i32 = arith.constant 0 : i32
    %c0_i32_0 = arith.constant 0 : i32
    %c0_i32_1 = arith.constant 0 : i32
    return %c0_i32, %c0_i32_0 : i32, i32
  }
  func.func @transform_2(%arg0: i32) -> (i32, i32) {
    %c0_i32 = arith.constant 0 : i32
    %c0_i32_0 = arith.constant 0 : i32
    %c0_i32_1 = arith.constant 0 : i32
    return %c0_i32, %c0_i32_0 : i32, i32
  }
  func.func @transform_3(%arg0: i32) -> (i32, i32) {
    %c0_i32 = arith.constant 0 : i32
    %c0_i32_0 = arith.constant 0 : i32
    %c0_i32_1 = arith.constant 0 : i32
    return %c0_i32, %c0_i32_0 : i32, i32
  }
  func.func @transform_4(%arg0: i32) -> (i32, i32, i32) {
    %c0_i32 = arith.constant 0 : i32
    %c0_i32_0 = arith.constant 0 : i32
    %c0_i32_1 = arith.constant 0 : i32
    %c0_i32_2 = arith.constant 0 : i32
    return %c0_i32, %c0_i32_0, %c0_i32_1 : i32, i32, i32
  }
  func.func @transform_5(%arg0: i32) -> (i32, i32) {
    %c0_i32 = arith.constant 0 : i32
    %c0_i32_0 = arith.constant 0 : i32
    %c0_i32_1 = arith.constant 0 : i32
    return %c0_i32, %c0_i32_0 : i32, i32
  }
  func.func @transform_6(%arg0: i32) -> (i32, i32, i32) {
    %c0_i32 = arith.constant 0 : i32
    %c0_i32_0 = arith.constant 0 : i32
    %c0_i32_1 = arith.constant 0 : i32
    return %arg0, %c0_i32, %c0_i32_0 : i32, i32, i32
  }
}

</mosaic_0001>

<bundles_post_ra>
// kernel: tpu_custom_call.1
= control target key start
LH: loop header
LB: loop body
LE: loop exit
PB: predicated region body
PF: predicated region fallthrough
CT: control target
= control target key end

     0   :  { %s4468_s21 = smov 0   ;;  %s6213_s0 = inlined_call_operand.vmem [shape: f32[2,256,4], index: 0, kind: input, shape index: {}]   ;;  %s6214_s1 = inlined_call_operand.vmem [shape: f32[4,20], index: 1, kind: input, shape index: {}]   ;;  %s6215_s2 = inlined_call_operand.vmem [shape: f32[1,20], index: 2, kind: input, shape index: {}]   ;;  %s6216_s3 = inlined_call_operand.vmem [shape: f32[4,24], index: 3, kind: input, shape index: {}]   ;;  %s6217_s4 = inlined_call_operand.vmem [shape: f32[10,20,24], index: 4, kind: input, shape index: {}]   ;;  %s6218_s5 = inlined_call_operand.vmem [shape: f32[1,24], index: 5, kind: input, shape index: {}]   ;;  %s6219_s6 = inlined_call_operand.vmem [shape: f32[2,256,24], index: 6, kind: output, shape index: {}]  }
   0x1 LB: > { %s3936_s22 = sadd.s32 4294967295, %s4430_s21   ;;  %p3940_p0 = scmp.ge.s32.totalorder %s4430_s21, 1  ;;  %s4430_s21 = sphi %s4468_s21, %s16_s21  }
   0x2   : > { %p212_p1 = scmp.lt.s32.totalorder %s4430_s21, 3 }
   0x4   : > { %p213_p2 = pnand %p3940_p0, %p212_p1 }
   0x6   : > { %216 = sbr.rel (%p213_p2) target bundleno = 1050 (0x41a), region = 44 }
   0xb   : > { %v285_v0 = vld [vmem:[%s6214_s1] sm:$0xf]  ;;  %vm339_vm0 = vcmask 1043456   ;;  %p242_p3 = scmp.lt.s32.totalorder %s3936_s22, 1  ;;  %vm290_vm1 = vcmask 31744   ;;  %vm252_vm2 = vcmask 162816  }
   0xc   : > { %v456_v1 = vld [vmem:[%s6214_s1] sm:$0xf]  ;;  %3945 = vmatpush.msk.msra.mxu0 %vm339_vm0, %v285_v0  ;;  %v4035_v27 = vld [vmem:[%s6217_s4 + $0x28] sm:$0xf]  ;;  %v4432_v28 = vmov 0.0   ;;  %v4033_v32 = vld [vmem:[%s6217_s4 + $0x18] sm:$0xff] }
   0xd   : > { %3962 = vmatpush.msk.msra.mxu1 %vm339_vm0, %v456_v1  ;;  %v625_v2 = vld [vmem:[%s6216_s3] sm:$0xf]  ;;  %s6231_s22 = smov (!%p242_p3, %s3936_s22), 1  ;;  %259 = vst.msk [vmem:[#allocation2 + $0x30] sm:$0xff] %vm252_vm2, %v4432_v28  ;;  %v764_v33 = vld [vmem:[%s6217_s4 + $0x10] sm:$0xf] }
   0xe   : > { %3979 = vmatpush.msk.msra.mxu2 %vm339_vm0, %v625_v2  ;;  %s4409_s29 = sshll.u32 %s6231_s22, 8  ;;  %253 = vst.msk [vmem:[#allocation2] sm:$0xff] %vm252_vm2, %v4432_v28  ;;  %v4034_v29 = vld [vmem:[%s6217_s4 + $0x20] sm:$0xff]  ;;  %3996 = vmatpush.msk.msra.mxu3 %vm339_vm0, %v764_v33  ;;  %v763_v36 = vld [vmem:[%s6217_s4 + $0x8] sm:$0xff]  ;;  %v4053_v46 = vld [vmem:[%s6217_s4 + $0x78] sm:$0xff]  ;;  %vm2233_vm3 = vcmask 195584  }
   0xf   : > { %s4496_s8 = scalar_lea.vmem %s6213_s0, %s4409_s29  ;;  %4036 = vmatpush.msk.msrb.mxu1 %vm339_vm0, %v4035_v27  ;;  %254 = vst.msk [vmem:[#allocation2 + $0x8] sm:$0xff] %vm252_vm2, %v4432_v28  ;;  %v762_v37 = vld [vmem:[%s6217_s4] sm:$0xff]  ;;  %v4055_v38 = vld [vmem:[%s6217_s4 + $0x88] sm:$0xf]  ;;  %v4013_v50 = vld [vmem:[%s6217_s4 + $0xd8] sm:$0xff]  ;;  %s5579_s12 = scalar_lea.vmem %s6219_s6, %s4409_s29 }
  0x10   : > { %v269_v3 = vld [vmem:[%s4496_s8] sm:$0xff]  ;;  %v270_v5 = vld [vmem:[%s4496_s8 + $0x8] sm:$0xff]  ;;  %v271_v7 = vld [vmem:[%s4496_s8 + $0x10] sm:$0xff]  ;;  %255 = vst.msk [vmem:[#allocation2 + $0x10] sm:$0xff] %vm252_vm2, %v4432_v28  ;;  %830 = vmatpush.msra.mxu3 %v763_v36  ;;  %4056 = vmatpush.msk.msrb.mxu2 %vm339_vm0, %v4055_v38 }
  0x11   : > { %v440_v4 = vld [vmem:[%s4496_s8 + $0x80] sm:$0xff]  ;;  %3946 = vmatmul.msk.f32.vlgmr.msra.gmra.mxu0 %vm290_vm1, %v269_v3  ;;  %3980 = vmatmul.msk.f32.vlgmr.msra.gmra.mxu2 %vm290_vm1, %v269_v3  ;;  %v441_v6 = vld [vmem:[%s4496_s8 + $0x88] sm:$0xff]  ;;  %v442_v8 = vld [vmem:[%s4496_s8 + $0x90] sm:$0xff]  ;;  %256 = vst.msk [vmem:[#allocation2 + $0x18] sm:$0xff] %vm252_vm2, %v4432_v28 }
  0x12   : > { %3963 = vmatmul.msk.f32.vlgmr.msra.gmra.mxu1 %vm290_vm1, %v440_v4  ;;  %v272_v9 = vld [vmem:[%s4496_s8 + $0x18] sm:$0xff]  ;;  %v273_v11 = vld [vmem:[%s4496_s8 + $0x20] sm:$0xff]  ;;  %v274_v13 = vld [vmem:[%s4496_s8 + $0x28] sm:$0xff]  ;;  %257 = vst.msk [vmem:[#allocation2 + $0x20] sm:$0xff] %vm252_vm2, %v4432_v28  ;;  %831 = vmatpush.msra.mxu3 %v762_v37 }
  0x13   : > { %v443_v10 = vld [vmem:[%s4496_s8 + $0x98] sm:$0xff]  ;;  %v444_v12 = vld [vmem:[%s4496_s8 + $0xa0] sm:$0xff]  ;;  %v445_v14 = vld [vmem:[%s4496_s8 + $0xa8] sm:$0xff]  ;;  %1154 = vmatpush.msrb.mxu1 %v4034_v29  ;;  %258 = vst.msk [vmem:[#allocation2 + $0x28] sm:$0xff] %vm252_vm2, %v4432_v28 }
  0x14   : > { %v275_v15 = vld [vmem:[%s4496_s8 + $0x30] sm:$0xff]  ;;  %v276_v17 = vld [vmem:[%s4496_s8 + $0x38] sm:$0xff]  ;;  %v277_v19 = vld [vmem:[%s4496_s8 + $0x40] sm:$0xff]  ;;  %260 = vst.msk [vmem:[#allocation2 + $0x38] sm:$0xff] %vm252_vm2, %v4432_v28 }
  0x15   : > { %v446_v16 = vld [vmem:[%s4496_s8 + $0xb0] sm:$0xff]  ;;  %v447_v18 = vld [vmem:[%s4496_s8 + $0xb8] sm:$0xff]  ;;  %v448_v20 = vld [vmem:[%s4496_s8 + $0xc0] sm:$0xff]  ;;  %1155 = vmatpush.msrb.mxu1 %v4033_v32  ;;  %261 = vst.msk [vmem:[#allocation2 + $0x140] sm:$0xff] %vm252_vm2, %v4432_v28 }
  0x16   : > { %v278_v21 = vld [vmem:[%s4496_s8 + $0x48] sm:$0xff]  ;;  %v279_v23 = vld [vmem:[%s4496_s8 + $0x50] sm:$0xff]  ;;  %v280_v25 = vld [vmem:[%s4496_s8 + $0x58] sm:$0xff]  ;;  %262 = vst.msk [vmem:[#allocation2 + $0x148] sm:$0xff] %vm252_vm2, %v4432_v28 }
  0x17   : > { %v449_v22 = vld [vmem:[%s4496_s8 + $0xc8] sm:$0xff]  ;;  %v450_v24 = vld [vmem:[%s4496_s8 + $0xd0] sm:$0xff]  ;;  %v451_v26 = vld [vmem:[%s4496_s8 + $0xd8] sm:$0xff]  ;;  %263 = vst.msk [vmem:[#allocation2 + $0x150] sm:$0xff] %vm252_vm2, %v4432_v28 }
  0x18   : > { %v281_v30 = vld [vmem:[%s4496_s8 + $0x60] sm:$0xff]  ;;  %264 = vst.msk [vmem:[#allocation2 + $0x158] sm:$0xff] %vm252_vm2, %v4432_v28  ;;  %v282_v34 = vld [vmem:[%s4496_s8 + $0x68] sm:$0xff]  ;;  %v283_v41 = vld [vmem:[%s4496_s8 + $0x70] sm:$0xff] }
  0x19   : > { %3947 = vmatmul.msk.f32.gmra.mxu0 %vm290_vm1, %v270_v5  ;;  %3981 = vmatmul.msk.f32.gmra.mxu2 %vm290_vm1, %v270_v5  ;;  %v452_v31 = vld [vmem:[%s4496_s8 + $0xe0] sm:$0xff]  ;;  %265 = vst.msk [vmem:[#allocation2 + $0x160] sm:$0xff] %vm252_vm2, %v4432_v28  ;;  %v453_v35 = vld [vmem:[%s4496_s8 + $0xe8] sm:$0xff]  ;;  %v454_v42 = vld [vmem:[%s4496_s8 + $0xf0] sm:$0xff] }
  0x1a   : > { %3964 = vmatmul.msk.f32.gmra.mxu1 %vm290_vm1, %v441_v6  ;;  %266 = vst.msk [vmem:[#allocation2 + $0x168] sm:$0xff] %vm252_vm2, %v4432_v28  ;;  %v4015_v39 = vld [vmem:[%s6217_s4 + $0xe8] sm:$0xf]  ;;  %v4075_v40 = vld [vmem:[%s6217_s4 + $0x40] sm:$0xf]  ;;  %v284_v43 = vld [vmem:[%s4496_s8 + $0x78] sm:$0xff] }
  0x1b   : > { %267 = vst.msk [vmem:[#allocation2 + $0x170] sm:$0xff] %vm252_vm2, %v4432_v28  ;;  %4016 = vmatpush.msk.msrb.mxu0 %vm339_vm0, %v4015_v39  ;;  %4076 = vmatpush.msk.msrb.mxu3 %vm339_vm0, %v4075_v40  ;;  %v455_v44 = vld [vmem:[%s4496_s8 + $0xf8] sm:$0xff]  ;;  %v4054_v45 = vld [vmem:[%s6217_s4 + $0x80] sm:$0xff]  ;;  %v4648_v53 = vld [vmem:[#allocation2 + $0x30] sm:$0xff] }
  0x1c   : > { %268 = vst.msk [vmem:[#allocation2 + $0x178] sm:$0xff] %vm252_vm2, %v4432_v28  ;;  %1254 = vmatpush.msrb.mxu2 %v4054_v45  ;;  %v4635_v47 = vld [vmem:[%s6215_s2] ss:$0 sm:$0xff]  ;;  %v4658_v61 = vld [vmem:[#allocation2 + $0x38] sm:$0xff] }
  0x1d   : > { %v4640_v48 = vld [vmem:[%s6215_s2] ss:$0 sm:$0xff] }
  0x1e   : > { %1255 = vmatpush.msrb.mxu2 %v4053_v46  ;;  %v4014_v49 = vld [vmem:[%s6217_s4 + $0xe0] sm:$0xff] }
  0x1f   : > { %1018 = vmatpush.msrb.mxu0 %v4014_v49 }
  0x21   : > { %3948 = vmatmul.msk.f32.gmra.mxu0 %vm290_vm1, %v271_v7  ;;  %3982 = vmatmul.msk.f32.gmra.mxu2 %vm290_vm1, %v271_v7 }
  0x22   : > { %3965 = vmatmul.msk.f32.gmra.mxu1 %vm290_vm1, %v442_v8  ;;  %1019 = vmatpush.msrb.mxu0 %v4013_v50 }
  0x29   : > { %3949 = vmatmul.msk.f32.gmra.mxu0 %vm290_vm1, %v272_v9  ;;  %3983 = vmatmul.msk.f32.gmra.mxu2 %vm290_vm1, %v272_v9 }
  0x2a   : > { %3966 = vmatmul.msk.f32.gmra.mxu1 %vm290_vm1, %v443_v10 }
  0x31   : > { %3950 = vmatmul.msk.f32.gmra.mxu0 %vm290_vm1, %v273_v11  ;;  %3984 = vmatmul.msk.f32.gmra.mxu2 %vm290_vm1, %v273_v11 }
  0x32   : > { %3967 = vmatmul.msk.f32.gmra.mxu1 %vm290_vm1, %v444_v12 }
  0x39   : > { %3951 = vmatmul.msk.f32.gmra.mxu0 %vm290_vm1, %v274_v13  ;;  %3985 = vmatmul.msk.f32.gmra.mxu2 %vm290_vm1, %v274_v13 }
  0x3a   : > { %3968 = vmatmul.msk.f32.gmra.mxu1 %vm290_vm1, %v445_v14 }
  0x41   : > { %3952 = vmatmul.msk.f32.gmra.mxu0 %vm290_vm1, %v275_v15  ;;  %3986 = vmatmul.msk.f32.gmra.mxu2 %vm290_vm1, %v275_v15 }
  0x42   : > { %3969 = vmatmul.msk.f32.gmra.mxu1 %vm290_vm1, %v446_v16 }
  0x49   : > { %3953 = vmatmul.msk.f32.gmra.mxu0 %vm290_vm1, %v276_v17  ;;  %3987 = vmatmul.msk.f32.gmra.mxu2 %vm290_vm1, %v276_v17 }
  0x4a   : > { %3970 = vmatmul.msk.f32.gmra.mxu1 %vm290_vm1, %v447_v18 }
  0x51   : > { %3954 = vmatmul.msk.f32.gmra.mxu0 %vm290_vm1, %v277_v19  ;;  %3988 = vmatmul.msk.f32.gmra.mxu2 %vm290_vm1, %v277_v19 }
  0x52   : > { %3971 = vmatmul.msk.f32.gmra.mxu1 %vm290_vm1, %v448_v20  ;;  %v4074_v20 = vld [vmem:[%s6217_s4 + $0x38] sm:$0xff] }
  0x53   : > { %1406 = vmatpush.msrb.mxu3 %v4074_v20 }
  0x59   : > { %3955 = vmatmul.msk.f32.gmra.mxu0 %vm290_vm1, %v278_v21  ;;  %3989 = vmatmul.msk.f32.gmra.mxu2 %vm290_vm1, %v278_v21 }
  0x5a   : > { %3972 = vmatmul.msk.f32.gmra.mxu1 %vm290_vm1, %v449_v22 }
  0x61   : > { %3956 = vmatmul.msk.f32.gmra.mxu0 %vm290_vm1, %v279_v23  ;;  %3990 = vmatmul.msk.f32.gmra.mxu2 %vm290_vm1, %v279_v23 }
  0x62   : > { %3973 = vmatmul.msk.f32.gmra.mxu1 %vm290_vm1, %v450_v24 }
  0x69   : > { %3957 = vmatmul.msk.f32.gmra.mxu0 %vm290_vm1, %v280_v25  ;;  %3991 = vmatmul.msk.f32.gmra.mxu2 %vm290_vm1, %v280_v25 }
  0x6a   : > { %3974 = vmatmul.msk.f32.gmra.mxu1 %vm290_vm1, %v451_v26 }
  0x71   : > { %3958 = vmatmul.msk.f32.gmra.mxu0 %vm290_vm1, %v281_v30  ;;  %3992 = vmatmul.msk.f32.gmra.mxu2 %vm290_vm1, %v281_v30 }
  0x72   : > { %3975 = vmatmul.msk.f32.gmra.mxu1 %vm290_vm1, %v452_v31 }
  0x79   : > { %3959 = vmatmul.msk.f32.gmra.mxu0 %vm290_vm1, %v282_v34  ;;  %3993 = vmatmul.msk.f32.gmra.mxu2 %vm290_vm1, %v282_v34 }
  0x7a   : > { %3976 = vmatmul.msk.f32.gmra.mxu1 %vm290_vm1, %v453_v35 }
  0x81   : > { %3960 = vmatmul.msk.f32.gmra.mxu0 %vm290_vm1, %v283_v41  ;;  %3994 = vmatmul.msk.f32.gmra.mxu2 %vm290_vm1, %v283_v41 }
  0x82   : > { %3977 = vmatmul.msk.f32.gmra.mxu1 %vm290_vm1, %v454_v42 }
  0x89   : > { %3961 = vmatmul.msk.f32.gmra.mxu0 %vm290_vm1, %v284_v43  ;;  %3995 = vmatmul.msk.f32.gmra.mxu2 %vm290_vm1, %v284_v43 }
  0x8a   : > { %3978 = vmatmul.msk.f32.gmra.mxu1 %vm290_vm1, %v455_v44 }
  0x8e   : > { %v360_v51 = vpop.f32.mrf.mxu0 }
  0x8f   : > { %v529_v52 = vpop.f32.mrf.mxu1  ;;  %v361_v54 = vadd.f32 %v4635_v47, %v360_v51 }
  0x90   : > { %v530_v55 = vadd.f32 %v4640_v48, %v529_v52 }
  0x91   : > { %v408_v56 = vmax.f32 %v361_v54, 0.0 }
  0x92   : > { %v577_v57 = vmax.f32 %v530_v55, 0.0  ;;  %4037 = vmatmul.msk.f32.vlgmr.msrb.gmra.mxu1 %vm252_vm2, %v4648_v53 }
  0x93   : > { %424 = vst.msk [vmem:[#allocation2 + $0x40] sm:$0xff] %vm252_vm2, %v408_v56 }
  0x94   : > { %593 = vst.msk [vmem:[#allocation2 + $0xc0] sm:$0xff] %vm252_vm2, %v577_v57  ;;  %v4656_v58 = vpop.f32.mrf.mxu2 }
  0x96   : > { %v363_v59 = vpop.f32.mrf.mxu0 }
  0x97   : > { %v532_v60 = vpop.f32.mrf.mxu1  ;;  %v364_v62 = vadd.f32 %v4635_v47, %v363_v59 }
  0x98   : > { %v533_v63 = vadd.f32 %v4640_v48, %v532_v60 }
  0x99   : > { %v409_v0 = vmax.f32 %v364_v62, 0.0 }
  0x9a   : > { %v578_v1 = vmax.f32 %v533_v63, 0.0  ;;  %4038 = vmatmul.msk.f32.gmra.mxu1 %vm252_vm2, %v4658_v61  ;;  %v4664_v2 = vld [vmem:[#allocation2 + $0x40] sm:$0xff] }
  0x9b   : > { %425 = vst.msk [vmem:[#allocation2 + $0x48] sm:$0xff] %vm252_vm2, %v409_v0  ;;  %3997 = vmatmul.msk.f32.vlgmr.msra.gmra.mxu3 %vm252_vm2, %v4664_v2 }
  0x9c   : > { %594 = vst.msk [vmem:[#allocation2 + $0xc8] sm:$0xff] %vm252_vm2, %v578_v1  ;;  %v4670_v3 = vpop.f32.mrf.mxu2 }
  0x9e   : > { %v366_v4 = vpop.f32.mrf.mxu0 }
  0x9f   : > { %v535_v5 = vpop.f32.mrf.mxu1  ;;  %v367_v6 = vadd.f32 %v4635_v47, %v366_v4 }
  0xa0   : > { %v536_v7 = vadd.f32 %v4640_v48, %v535_v5 }
  0xa1   : > { %v410_v8 = vmax.f32 %v367_v6, 0.0 }
  0xa2   : > { %v579_v9 = vmax.f32 %v536_v7, 0.0  ;;  %4039 = vmatmul.msk.f32.gmra.mxu1 %vm252_vm2, %v4664_v2  ;;  %v4676_v10 = vld [vmem:[#allocation2 + $0x48] sm:$0xff] }
  0xa3   : > { %426 = vst.msk [vmem:[#allocation2 + $0x50] sm:$0xff] %vm252_vm2, %v410_v8  ;;  %3998 = vmatmul.msk.f32.gmra.mxu3 %vm252_vm2, %v4676_v10 }
  0xa4   : > { %595 = vst.msk [vmem:[#allocation2 + $0xd0] sm:$0xff] %vm252_vm2, %v579_v9  ;;  %v4682_v11 = vpop.f32.mrf.mxu2 }
  0xa6   : > { %v369_v12 = vpop.f32.mrf.mxu0 }
  0xa7   : > { %v538_v13 = vpop.f32.mrf.mxu1  ;;  %v370_v14 = vadd.f32 %v4635_v47, %v369_v12 }
  0xa8   : > { %v539_v15 = vadd.f32 %v4640_v48, %v538_v13 }
  0xa9   : > { %v411_v16 = vmax.f32 %v370_v14, 0.0 }
  0xaa   : > { %v580_v17 = vmax.f32 %v539_v15, 0.0  ;;  %4040 = vmatmul.msk.f32.gmra.mxu1 %vm252_vm2, %v4676_v10  ;;  %v4688_v18 = vld [vmem:[#allocation2 + $0x50] sm:$0xff] }
  0xab   : > { %427 = vst.msk [vmem:[#allocation2 + $0x58] sm:$0xff] %vm252_vm2, %v411_v16  ;;  %3999 = vmatmul.msk.f32.gmra.mxu3 %vm252_vm2, %v4688_v18  ;;  %v917_v19 = vmax.f32 %v4648_v53, %v4688_v18  ;;  %4057 = vmatmul.msk.f32.vlgmr.msrb.gmra.mxu2 %vm252_vm2, %v4688_v18  ;;  %v4073_v15 = vld [vmem:[%s6217_s4 + $0x30] sm:$0xff] }
  0xac   : > { %596 = vst.msk [vmem:[#allocation2 + $0xd8] sm:$0xff] %vm252_vm2, %v580_v17  ;;  %v4702_v22 = vpop.f32.mrf.mxu2  ;;  %1407 = vmatpush.msrb.mxu3 %v4073_v15 }
  0xad   : > { %v933_v21 = vmax.f32 %v917_v19, %v4664_v2 }
  0xae   : > { %v372_v23 = vpop.f32.mrf.mxu0 }
  0xaf   : > { %v541_v24 = vpop.f32.mrf.mxu1  ;;  %v373_v25 = vadd.f32 %v4635_v47, %v372_v23  ;;  %4017 = vmatmul.msk.f32.vlgmr.msrb.gmra.mxu0 %vm252_vm2, %v933_v21 }
  0xb0   : > { %v542_v26 = vadd.f32 %v4640_v48, %v541_v24 }
  0xb1   : > { %v412_v27 = vmax.f32 %v373_v25, 0.0 }
  0xb2   : > { %v581_v28 = vmax.f32 %v542_v26, 0.0  ;;  %4041 = vmatmul.msk.f32.gmra.mxu1 %vm252_vm2, %v4688_v18  ;;  %v4709_v29 = vld [vmem:[#allocation2 + $0x58] sm:$0xff] }
  0xb3   : > { %428 = vst.msk [vmem:[#allocation2 + $0x60] sm:$0xff] %vm252_vm2, %v412_v27  ;;  %4000 = vmatmul.msk.f32.gmra.mxu3 %vm252_vm2, %v4709_v29  ;;  %4058 = vmatmul.msk.f32.gmra.mxu2 %vm252_vm2, %v4709_v29  ;;  %v918_v30 = vmax.f32 %v4658_v61, %v4709_v29 }
  0xb4   : > { %597 = vst.msk [vmem:[#allocation2 + $0xe0] sm:$0xff] %vm252_vm2, %v581_v28  ;;  %v4723_v36 = vpop.f32.mrf.mxu2 }
  0xb5   : > { %v934_v31 = vmax.f32 %v918_v30, %v4676_v10 }
  0xb6   : > { %v375_v32 = vpop.f32.mrf.mxu0 }
  0xb7   : > { %v544_v33 = vpop.f32.mrf.mxu1  ;;  %v376_v34 = vadd.f32 %v4635_v47, %v375_v32  ;;  %4018 = vmatmul.msk.f32.gmra.mxu0 %vm252_vm2, %v934_v31 }
  0xb8   : > { %v545_v35 = vadd.f32 %v4640_v48, %v544_v33 }
  0xb9   : > { %v413_v37 = vmax.f32 %v376_v34, 0.0 }
  0xba   : > { %v582_v38 = vmax.f32 %v545_v35, 0.0  ;;  %4042 = vmatmul.msk.f32.gmra.mxu1 %vm252_vm2, %v4709_v29  ;;  %v4727_v39 = vld [vmem:[#allocation2 + $0x60] sm:$0xff] }
  0xbb   : > { %429 = vst.msk [vmem:[#allocation2 + $0x68] sm:$0xff] %vm252_vm2, %v413_v37  ;;  %4001 = vmatmul.msk.f32.gmra.mxu3 %vm252_vm2, %v4727_v39  ;;  %4059 = vmatmul.msk.f32.gmra.mxu2 %vm252_vm2, %v4727_v39  ;;  %v919_v40 = vmax.f32 %v4664_v2, %v4727_v39 }
  0xbc   : > { %598 = vst.msk [vmem:[#allocation2 + $0xe8] sm:$0xff] %vm252_vm2, %v582_v38  ;;  %v4743_v50 = vpop.f32.mrf.mxu2 }
  0xbd   : > { %v935_v41 = vmax.f32 %v919_v40, %v4688_v18 }
  0xbe   : > { %v378_v42 = vpop.f32.mrf.mxu0 }
  0xbf   : > { %v547_v43 = vpop.f32.mrf.mxu1  ;;  %v379_v44 = vadd.f32 %v4635_v47, %v378_v42  ;;  %4019 = vmatmul.msk.f32.gmra.mxu0 %vm252_vm2, %v935_v41 }
  0xc0   : > { %v548_v45 = vadd.f32 %v4640_v48, %v547_v43 }
  0xc1   : > { %v414_v46 = vmax.f32 %v379_v44, 0.0 }
  0xc2   : > { %v583_v49 = vmax.f32 %v548_v45, 0.0  ;;  %4043 = vmatmul.msk.f32.gmra.mxu1 %vm252_vm2, %v4727_v39  ;;  %v4745_v51 = vld [vmem:[#allocation2 + $0x68] sm:$0xff] }
  0xc3   : > { %430 = vst.msk [vmem:[#allocation2 + $0x70] sm:$0xff] %vm252_vm2, %v414_v46  ;;  %4002 = vmatmul.msk.f32.gmra.mxu3 %vm252_vm2, %v4745_v51  ;;  %4060 = vmatmul.msk.f32.gmra.mxu2 %vm252_vm2, %v4745_v51  ;;  %v920_v52 = vmax.f32 %v4676_v10, %v4745_v51 }
  0xc4   : > { %599 = vst.msk [vmem:[#allocation2 + $0xf0] sm:$0xff] %vm252_vm2, %v583_v49  ;;  %v4770_v1 = vpop.f32.mrf.mxu2 }
  0xc5   : > { %v936_v54 = vmax.f32 %v920_v52, %v4709_v29 }
  0xc6   : > { %v381_v55 = vpop.f32.mrf.mxu0 }
  0xc7   : > { %v550_v56 = vpop.f32.mrf.mxu1  ;;  %v382_v57 = vadd.f32 %v4635_v47, %v381_v55  ;;  %4020 = vmatmul.msk.f32.gmra.mxu0 %vm252_vm2, %v936_v54 }
  0xc8   : > { %v551_v59 = vadd.f32 %v4640_v48, %v550_v56  ;;  %v4115_v56 = vld [vmem:[%s6217_s4 + $0x58] sm:$0xf] }
  0xc9   : > { %v415_v60 = vmax.f32 %v382_v57, 0.0  ;;  %4116 = vmatpush.msk.msra.mxu1 %vm339_vm0, %v4115_v56 }
  0xca   : > { %v584_v62 = vmax.f32 %v551_v59, 0.0  ;;  %4044 = vmatmul.msk.f32.gmra.mxu1 %vm252_vm2, %v4745_v51  ;;  %v4761_v63 = vld [vmem:[#allocation2 + $0x70] sm:$0xff] }
  0xcb   : > { %431 = vst.msk [vmem:[#allocation2 + $0x78] sm:$0xff] %vm252_vm2, %v415_v60  ;;  %4003 = vmatmul.msk.f32.gmra.mxu3 %vm252_vm2, %v4761_v63  ;;  %4061 = vmatmul.msk.f32.gmra.mxu2 %vm252_vm2, %v4761_v63  ;;  %v921_v0 = vmax.f32 %v4688_v18, %v4761_v63  ;;  %v4114_v59 = vld [vmem:[%s6217_s4 + $0x50] sm:$0xff] }
  0xcc   : > { %600 = vst.msk [vmem:[#allocation2 + $0xf8] sm:$0xff] %vm252_vm2, %v584_v62  ;;  %v4793_v17 = vpop.f32.mrf.mxu2  ;;  %1710 = vmatpush.msra.mxu1 %v4114_v59  ;;  %v4134_v59 = vld [vmem:[%s6217_s4 + $0xb0] sm:$0xff] }
  0xcd   : > { %v937_v4 = vmax.f32 %v921_v0, %v4727_v39 }
  0xce   : > { %v384_v5 = vpop.f32.mrf.mxu0 }
  0xcf   : > { %v553_v6 = vpop.f32.mrf.mxu1  ;;  %v385_v7 = vadd.f32 %v4635_v47, %v384_v5  ;;  %4021 = vmatmul.msk.f32.gmra.mxu0 %vm252_vm2, %v937_v4  ;;  %v4113_v5 = vld [vmem:[%s6217_s4 + $0x48] sm:$0xff] }
  0xd0   : > { %v554_v8 = vadd.f32 %v4640_v48, %v553_v6  ;;  %1711 = vmatpush.msra.mxu1 %v4113_v5 }
  0xd1   : > { %v416_v9 = vmax.f32 %v385_v7, 0.0 }
  0xd2   : > { %v585_v12 = vmax.f32 %v554_v8, 0.0  ;;  %4045 = vmatmul.msk.f32.gmra.mxu1 %vm252_vm2, %v4761_v63  ;;  %v4779_v13 = vld [vmem:[#allocation2 + $0x78] sm:$0xff] }
  0xd3   : > { %432 = vst.msk [vmem:[#allocation2 + $0x80] sm:$0xff] %vm252_vm2, %v416_v9  ;;  %4004 = vmatmul.msk.f32.gmra.mxu3 %vm252_vm2, %v4779_v13  ;;  %4062 = vmatmul.msk.f32.gmra.mxu2 %vm252_vm2, %v4779_v13  ;;  %v922_v14 = vmax.f32 %v4709_v29, %v4779_v13 }
  0xd4   : > { %601 = vst.msk [vmem:[#allocation2 + $0x100] sm:$0xff] %vm252_vm2, %v585_v12  ;;  %v4814_v34 = vpop.f32.mrf.mxu2 }
  0xd5   : > { %v938_v16 = vmax.f32 %v922_v14, %v4745_v51 }
  0xd6   : > { %v387_v19 = vpop.f32.mrf.mxu0 }
  0xd7   : > { %v556_v20 = vpop.f32.mrf.mxu1  ;;  %v388_v21 = vadd.f32 %v4635_v47, %v387_v19  ;;  %4022 = vmatmul.msk.f32.gmra.mxu0 %vm252_vm2, %v938_v16 }
  0xd8   : > { %v557_v23 = vadd.f32 %v4640_v48, %v556_v20 }
  0xd9   : > { %v417_v24 = vmax.f32 %v388_v21, 0.0 }
  0xda   : > { %v586_v25 = vmax.f32 %v557_v23, 0.0  ;;  %4046 = vmatmul.msk.f32.gmra.mxu1 %vm252_vm2, %v4779_v13  ;;  %v4800_v26 = vld [vmem:[#allocation2 + $0x80] sm:$0xff] }
  0xdb   : > { %433 = vst.msk [vmem:[#allocation2 + $0x88] sm:$0xff] %vm252_vm2, %v417_v24  ;;  %4005 = vmatmul.msk.f32.gmra.mxu3 %vm252_vm2, %v4800_v26  ;;  %4063 = vmatmul.msk.f32.gmra.mxu2 %vm252_vm2, %v4800_v26  ;;  %v923_v27 = vmax.f32 %v4727_v39, %v4800_v26  ;;  %v4135_v24 = vld [vmem:[%s6217_s4 + $0xb8] sm:$0xf] }
  0xdc   : > { %602 = vst.msk [vmem:[#allocation2 + $0x108] sm:$0xff] %vm252_vm2, %v586_v25  ;;  %v4834_v52 = vpop.f32.mrf.mxu2  ;;  %4136 = vmatpush.msk.msra.mxu2 %vm339_vm0, %v4135_v24  ;;  %v4972_v24 = vld [vmem:[#allocation2 + $0x20] sm:$0xff] }
  0xdd   : > { %v939_v28 = vmax.f32 %v923_v27, %v4761_v63 }
  0xde   : > { %v390_v30 = vpop.f32.mrf.mxu0  ;;  %1862 = vmatpush.msra.mxu2 %v4134_v59 }
  0xdf   : > { %v559_v31 = vpop.f32.mrf.mxu1  ;;  %v391_v32 = vadd.f32 %v4635_v47, %v390_v30  ;;  %4023 = vmatmul.msk.f32.gmra.mxu0 %vm252_vm2, %v939_v28  ;;  %v4095_v28 = vld [vmem:[%s6217_s4 + $0xa0] sm:$0xf]  ;;  %v4155_v30 = vld [vmem:[%s6217_s4 + $0x70] sm:$0xf] }
  0xe0   : > { %v560_v33 = vadd.f32 %v4640_v48, %v559_v31  ;;  %4096 = vmatpush.msk.msra.mxu0 %vm339_vm0, %v4095_v28  ;;  %4156 = vmatpush.msk.msra.mxu3 %vm339_vm0, %v4155_v30 }
  0xe1   : > { %v418_v35 = vmax.f32 %v391_v32, 0.0 }
  0xe2   : > { %v587_v37 = vmax.f32 %v560_v33, 0.0  ;;  %4047 = vmatmul.msk.f32.gmra.mxu1 %vm252_vm2, %v4800_v26  ;;  %v4818_v38 = vld [vmem:[#allocation2 + $0x88] sm:$0xff] }
  0xe3   : > { %434 = vst.msk [vmem:[#allocation2 + $0x90] sm:$0xff] %vm252_vm2, %v418_v35  ;;  %4006 = vmatmul.msk.f32.gmra.mxu3 %vm252_vm2, %v4818_v38  ;;  %4064 = vmatmul.msk.f32.gmra.mxu2 %vm252_vm2, %v4818_v38  ;;  %v924_v40 = vmax.f32 %v4745_v51, %v4818_v38 }
  0xe4   : > { %603 = vst.msk [vmem:[#allocation2 + $0x110] sm:$0xff] %vm252_vm2, %v587_v37  ;;  %v4871_v12 = vpop.f32.mrf.mxu2 }
  0xe5   : > { %v940_v41 = vmax.f32 %v924_v40, %v4779_v13 }
  0xe6   : > { %v393_v42 = vpop.f32.mrf.mxu0 }
  0xe7   : > { %v562_v43 = vpop.f32.mrf.mxu1  ;;  %v394_v44 = vadd.f32 %v4635_v47, %v393_v42  ;;  %4024 = vmatmul.msk.f32.gmra.mxu0 %vm252_vm2, %v940_v41 }
  0xe8   : > { %v563_v45 = vadd.f32 %v4640_v48, %v562_v43 }
  0xe9   : > { %v419_v46 = vmax.f32 %v394_v44, 0.0 }
  0xea   : > { %v588_v49 = vmax.f32 %v563_v45, 0.0  ;;  %4048 = vmatmul.msk.f32.gmra.mxu1 %vm252_vm2, %v4818_v38  ;;  %v4836_v54 = vld [vmem:[#allocation2 + $0x90] sm:$0xff] }
  0xeb   : > { %435 = vst.msk [vmem:[#allocation2 + $0x98] sm:$0xff] %vm252_vm2, %v419_v46  ;;  %4007 = vmatmul.msk.f32.gmra.mxu3 %vm252_vm2, %v4836_v54  ;;  %v925_v55 = vmax.f32 %v4761_v63, %v4836_v54  ;;  %4065 = vmatmul.msk.f32.gmra.mxu2 %vm252_vm2, %v4836_v54 }
  0xec   : > { %604 = vst.msk [vmem:[#allocation2 + $0x118] sm:$0xff] %vm252_vm2, %v588_v49  ;;  %v4903_v32 = vpop.f32.mrf.mxu2 }
  0xed   : > { %v941_v57 = vmax.f32 %v925_v55, %v4800_v26 }
  0xee   : > { %v396_v60 = vpop.f32.mrf.mxu0 }
  0xef   : > { %v565_v62 = vpop.f32.mrf.mxu1  ;;  %v397_v0 = vadd.f32 %v4635_v47, %v396_v60  ;;  %4025 = vmatmul.msk.f32.gmra.mxu0 %vm252_vm2, %v941_v57 }
  0xf0   : > { %v566_v4 = vadd.f32 %v4640_v48, %v565_v62 }
  0xf1   : > { %v420_v6 = vmax.f32 %v397_v0, 0.0 }
  0xf2   : > { %v589_v7 = vmax.f32 %v566_v4, 0.0  ;;  %4049 = vmatmul.msk.f32.gmra.mxu1 %vm252_vm2, %v4836_v54  ;;  %v4862_v8 = vld [vmem:[#allocation2 + $0x98] sm:$0xff] }
  0xf3   : > { %436 = vst.msk [vmem:[#allocation2 + $0xa0] sm:$0xff] %vm252_vm2, %v420_v6  ;;  %4008 = vmatmul.msk.f32.gmra.mxu3 %vm252_vm2, %v4862_v8  ;;  %v926_v9 = vmax.f32 %v4779_v13, %v4862_v8  ;;  %4066 = vmatmul.msk.f32.gmra.mxu2 %vm252_vm2, %v4862_v8  ;;  %v4094_v4 = vld [vmem:[%s6217_s4 + $0x98] sm:$0xff] }
  0xf4   : > { %605 = vst.msk [vmem:[#allocation2 + $0x120] sm:$0xff] %vm252_vm2, %v589_v7  ;;  %v4924_v57 = vpop.f32.mrf.mxu2  ;;  %1558 = vmatpush.msra.mxu0 %v4094_v4  ;;  %v4948_v7 = vld [vmem:[#allocation2 + $0x10] sm:$0xff] }
  0xf5   : > { %v942_v14 = vmax.f32 %v926_v9, %v4818_v38  ;;  %v4093_v9 = vld [vmem:[%s6217_s4 + $0x90] sm:$0xff] }
  0xf6   : > { %v399_v15 = vpop.f32.mrf.mxu0  ;;  %1559 = vmatpush.msra.mxu0 %v4093_v9 }
  0xf7   : > { %v568_v16 = vpop.f32.mrf.mxu1  ;;  %v400_v19 = vadd.f32 %v4635_v47, %v399_v15  ;;  %4026 = vmatmul.msk.f32.gmra.mxu0 %vm252_vm2, %v942_v14 }
  0xf8   : > { %v569_v20 = vadd.f32 %v4640_v48, %v568_v16 }
  0xf9   : > { %v421_v21 = vmax.f32 %v400_v19, 0.0 }
  0xfa   : > { %v590_v23 = vmax.f32 %v569_v20, 0.0  ;;  %4050 = vmatmul.msk.f32.gmra.mxu1 %vm252_vm2, %v4862_v8  ;;  %v4883_v25 = vld [vmem:[#allocation2 + $0xa0] sm:$0xff] }
  0xfb   : > { %437 = vst.msk [vmem:[#allocation2 + $0xa8] sm:$0xff] %vm252_vm2, %v421_v21  ;;  %4009 = vmatmul.msk.f32.gmra.mxu3 %vm252_vm2, %v4883_v25  ;;  %v927_v27 = vmax.f32 %v4800_v26, %v4883_v25  ;;  %4067 = vmatmul.msk.f32.gmra.mxu2 %vm252_vm2, %v4883_v25  ;;  %v4967_v21 = vld [vmem:[#allocation2 + $0x18] sm:$0xff] }
  0xfc   : > { %606 = vst.msk [vmem:[#allocation2 + $0x128] sm:$0xff] %vm252_vm2, %v590_v23  ;;  %v4956_v14 = vpop.f32.mrf.mxu2  ;;  %v4970_v23 = vld [vmem:[#allocation2 + $0xc0] sm:$0xff] }
  0xfd   : > { %v943_v31 = vmax.f32 %v927_v27, %v4836_v54  ;;  %v931_v27 = vmax.f32 %v4883_v25, %v4970_v23 }
  0xfe   : > { %v402_v33 = vpop.f32.mrf.mxu0 }
  0xff   : > { %v571_v35 = vpop.f32.mrf.mxu1  ;;  %v403_v37 = vadd.f32 %v4635_v47, %v402_v33  ;;  %4027 = vmatmul.msk.f32.gmra.mxu0 %vm252_vm2, %v943_v31 }
 0x100   : > { %v572_v40 = vadd.f32 %v4640_v48, %v571_v35  ;;  %v4986_v35 = vld [vmem:[#allocation2 + $0xc8] sm:$0xff] }
 0x101   : > { %v422_v41 = vmax.f32 %v403_v37, 0.0  ;;  %v4988_v37 = vld [vmem:[#allocation2 + $0x28] sm:$0xff] }
 0x102   : > { %v591_v42 = vmax.f32 %v572_v40, 0.0  ;;  %4051 = vmatmul.msk.f32.gmra.mxu1 %vm252_vm2, %v4883_v25  ;;  %v4910_v43 = vld [vmem:[#allocation2 + $0xa8] sm:$0xff]  ;;  %v4995_v40 = vld [vmem:[%s6218_s5] ss:$0 sm:$0xff] }
 0x103   : > { %438 = vst.msk [vmem:[#allocation2 + $0xb0] sm:$0xff] %vm252_vm2, %v422_v41  ;;  %4010 = vmatmul.msk.f32.gmra.mxu3 %vm252_vm2, %v4910_v43  ;;  %v928_v44 = vmax.f32 %v4818_v38, %v4910_v43  ;;  %4068 = vmatmul.msk.f32.gmra.mxu2 %vm252_vm2, %v4910_v43  ;;  %v932_v41 = vmax.f32 %v4910_v43, %v4986_v35 }
 0x104   : > { %607 = vst.msk [vmem:[#allocation2 + $0x130] sm:$0xff] %vm252_vm2, %v591_v42  ;;  %v4982_v28 = vpop.f32.mrf.mxu2 }
 0x105   : > { %v944_v45 = vmax.f32 %v928_v44, %v4862_v8 }
 0x106   : > { %v405_v46 = vpop.f32.mrf.mxu0 }
 0x107   : > { %v574_v49 = vpop.f32.mrf.mxu1  ;;  %v406_v55 = vadd.f32 %v4635_v47, %v405_v46  ;;  %4028 = vmatmul.msk.f32.gmra.mxu0 %vm252_vm2, %v944_v45  ;;  %v4133_v47 = vld [vmem:[%s6217_s4 + $0xa8] sm:$0xff] }
 0x108   : > { %v575_v56 = vadd.f32 %v4640_v48, %v574_v49  ;;  %1863 = vmatpush.msra.mxu2 %v4133_v47  ;;  %v699_v49 = vadd.f32 %v4995_v40, %v4656_v58  ;;  %v702_v47 = vadd.f32 %v4995_v40, %v4670_v3 }
 0x109   : > { %v423_v60 = vmax.f32 %v406_v55, 0.0  ;;  %v4154_v55 = vld [vmem:[%s6217_s4 + $0x68] sm:$0xff] }
 0x10a   : > { %v592_v62 = vmax.f32 %v575_v56, 0.0  ;;  %4052 = vmatmul.msk.f32.gmra.mxu1 %vm252_vm2, %v4910_v43  ;;  %v4934_v0 = vld [vmem:[#allocation2 + $0xb0] sm:$0xff]  ;;  %2014 = vmatpush.msra.mxu3 %v4154_v55 }
 0x10b   : > { %439 = vst.msk [vmem:[#allocation2 + $0xb8] sm:$0xff] %vm252_vm2, %v423_v60  ;;  %4011 = vmatmul.msk.f32.gmra.mxu3 %vm252_vm2, %v4934_v0  ;;  %v929_v48 = vmax.f32 %v4836_v54, %v4934_v0  ;;  %4069 = vmatmul.msk.f32.gmra.mxu2 %vm252_vm2, %v4934_v0  ;;  %v947_v30 = vmax.f32 %v931_v27, %v4934_v0 }
 0x10c   : > { %608 = vst.msk [vmem:[#allocation2 + $0x138] sm:$0xff] %vm252_vm2, %v592_v62  ;;  %v5004_v44 = vpop.f32.mrf.mxu2  ;;  %v705_v27 = vadd.f32 %v4995_v40, %v4682_v11 }
 0x10d   : > { %v945_v5 = vmax.f32 %v929_v48, %v4883_v25 }
 0x10f   : > { %v1157_v6 = vpop.f32.mrf.mxu1  ;;  %4029 = vmatmul.msk.f32.gmra.mxu0 %vm252_vm2, %v945_v5 }
 0x112   : > { %4117 = vmatmul.msk.f32.vlgmr.msra.gmra.mxu1 %vm252_vm2, %v4948_v7  ;;  %v4958_v15 = vld [vmem:[#allocation2 + $0xb8] sm:$0xff] }
 0x113   : > { %4012 = vmatmul.msk.f32.gmra.mxu3 %vm252_vm2, %v4958_v15  ;;  %v930_v16 = vmax.f32 %v4862_v8, %v4958_v15  ;;  %4070 = vmatmul.msk.f32.gmra.mxu2 %vm252_vm2, %v4958_v15  ;;  %v948_v42 = vmax.f32 %v932_v41, %v4958_v15 }
 0x115   : > { %v946_v19 = vmax.f32 %v930_v16, %v4910_v43 }
 0x117   : > { %v1160_v20 = vpop.f32.mrf.mxu1  ;;  %4030 = vmatmul.msk.f32.gmra.mxu0 %vm252_vm2, %v946_v19 }
 0x11a   : > { %4118 = vmatmul.msk.f32.gmra.mxu1 %vm252_vm2, %v4967_v21 }
 0x11b   : > { %4071 = vmatmul.msk.f32.gmra.mxu2 %vm252_vm2, %v4970_v23  ;;  %4077 = vmatmul.msk.f32.vlgmr.msrb.gmra.mxu3 %vm252_vm2, %v4972_v24 }
 0x11e   : > { %v833_v31 = vpop.f32.mrf.mxu3 }
 0x11f   : > { %v1163_v33 = vpop.f32.mrf.mxu1  ;;  %4031 = vmatmul.msk.f32.gmra.mxu0 %vm252_vm2, %v947_v30  ;;  %v881_v56 = vadd.f32 %v833_v31, %v699_v49  ;;  %v708_v49 = vadd.f32 %v4995_v40, %v4702_v22 }
 0x122   : > { %4119 = vmatmul.msk.f32.gmra.mxu1 %vm252_vm2, %v4972_v24 }
 0x123   : > { %4072 = vmatmul.msk.f32.gmra.mxu2 %vm252_vm2, %v4986_v35  ;;  %4078 = vmatmul.msk.f32.gmra.mxu3 %vm252_vm2, %v4988_v37 }
 0x126   : > { %v836_v45 = vpop.f32.mrf.mxu3 }
 0x127   : > { %v1166_v46 = vpop.f32.mrf.mxu1  ;;  %4032 = vmatmul.msk.f32.gmra.mxu0 %vm252_vm2, %v948_v42  ;;  %v882_v9 = vadd.f32 %v836_v45, %v702_v47  ;;  %v711_v47 = vadd.f32 %v4995_v40, %v4723_v36 }
 0x12a   : > { %4120 = vmatmul.msk.f32.gmra.mxu1 %vm252_vm2, %v4988_v37 }
 0x12b   : > { %4079 = vmatmul.msk.f32.gmra.mxu3 %vm252_vm2, %v4648_v53  ;;  %4137 = vmatmul.msk.f32.vlgmr.msra.gmra.mxu2 %vm252_vm2, %v4761_v63 }
 0x12c   : > { %v1021_v59 = vpop.f32.mrf.mxu0 }
 0x12d   : > { %v1069_v60 = vadd.f32 %v1021_v59, %v881_v56 }
 0x12e   : > { %v839_v58 = vpop.f32.mrf.mxu3  ;;  %v1257_v4 = vpop.f32.mrf.mxu2 }
 0x12f   : > { %v1169_v62 = vpop.f32.mrf.mxu1  ;;  %v1205_v48 = vadd.f32 %v1157_v6, %v1069_v60  ;;  %4097 = vmatmul.msk.f32.vlgmr.msra.gmra.mxu0 %vm252_vm2, %v4727_v39  ;;  %v883_v41 = vadd.f32 %v839_v58, %v705_v27 }
 0x131   : > { %v5022_v5 = vadd.f32 %v1257_v4, %v1205_v48 }
 0x132   : > { %4121 = vmatmul.msk.f32.gmra.mxu1 %vm252_vm2, %v4648_v53 }
 0x133   : > { %4080 = vmatmul.msk.f32.gmra.mxu3 %vm252_vm2, %v4658_v61  ;;  %4138 = vmatmul.msk.f32.gmra.mxu2 %vm252_vm2, %v4779_v13 }
 0x134   : > { %v1024_v16 = vpop.f32.mrf.mxu0 }
 0x135   : > { %v1070_v19 = vadd.f32 %v1024_v16, %v882_v9 }
 0x136   : > { %v842_v3 = vpop.f32.mrf.mxu3  ;;  %v1260_v31 = vpop.f32.mrf.mxu2 }
 0x137   : > { %v1172_v6 = vpop.f32.mrf.mxu1  ;;  %v1206_v30 = vadd.f32 %v1160_v20, %v1070_v19  ;;  %4098 = vmatmul.msk.f32.gmra.mxu0 %vm252_vm2, %v4745_v51  ;;  %v884_v59 = vadd.f32 %v842_v3, %v708_v49  ;;  %v714_v3 = vadd.f32 %v4995_v40, %v4743_v50 }
 0x139   : > { %v5034_v53 = vadd.f32 %v1260_v31, %v1206_v30  ;;  %v4153_v31 = vld [vmem:[%s6217_s4 + $0x60] sm:$0xff] }
 0x13a   : > { %4122 = vmatmul.msk.f32.gmra.mxu1 %vm252_vm2, %v4658_v61  ;;  %2015 = vmatpush.msra.mxu3 %v4153_v31  ;;  %v726_v31 = vadd.f32 %v4995_v40, %v4834_v52 }
 0x13b   : > { %4081 = vmatmul.msk.f32.gmra.mxu3 %vm252_vm2, %v4664_v2  ;;  %4139 = vmatmul.msk.f32.gmra.mxu2 %vm252_vm2, %v4800_v26 }
 0x13c   : > { %v1027_v42 = vpop.f32.mrf.mxu0 }
 0x13d   : > { %v1071_v45 = vadd.f32 %v1027_v42, %v883_v41 }
 0x13e   : > { %v845_v11 = vpop.f32.mrf.mxu3  ;;  %v1263_v56 = vpop.f32.mrf.mxu2 }
 0x13f   : > { %v1175_v20 = vpop.f32.mrf.mxu1  ;;  %v1207_v55 = vadd.f32 %v1163_v33, %v1071_v45  ;;  %4099 = vmatmul.msk.f32.gmra.mxu0 %vm252_vm2, %v4761_v63  ;;  %v885_v9 = vadd.f32 %v845_v11, %v711_v47  ;;  %v717_v11 = vadd.f32 %v4995_v40, %v4770_v1 }
 0x141   : > { %v5046_v61 = vadd.f32 %v1263_v56, %v1207_v55 }
 0x142   : > { %4123 = vmatmul.msk.f32.gmra.mxu1 %vm252_vm2, %v4664_v2 }
 0x143   : > { %4082 = vmatmul.msk.f32.gmra.mxu3 %vm252_vm2, %v4676_v10  ;;  %4140 = vmatmul.msk.f32.gmra.mxu2 %vm252_vm2, %v4818_v38 }
 0x144   : > { %v1030_v60 = vpop.f32.mrf.mxu0 }
 0x145   : > { %v1072_v58 = vadd.f32 %v1030_v60, %v884_v59 }
 0x146   : > { %v848_v22 = vpop.f32.mrf.mxu3  ;;  %v1266_v4 = vpop.f32.mrf.mxu2 }
 0x147   : > { %v1178_v33 = vpop.f32.mrf.mxu1  ;;  %v1208_v48 = vadd.f32 %v1166_v46, %v1072_v58  ;;  %4100 = vmatmul.msk.f32.gmra.mxu0 %vm252_vm2, %v4779_v13  ;;  %v886_v41 = vadd.f32 %v848_v22, %v714_v3  ;;  %v720_v58 = vadd.f32 %v4995_v40, %v4793_v17 }
 0x149   : > { %v5058_v2 = vadd.f32 %v1266_v4, %v1208_v48 }
 0x14a   : > { %4124 = vmatmul.msk.f32.gmra.mxu1 %vm252_vm2, %v4676_v10 }
 0x14b   : > { %4083 = vmatmul.msk.f32.gmra.mxu3 %vm252_vm2, %v4688_v18  ;;  %4141 = vmatmul.msk.f32.gmra.mxu2 %vm252_vm2, %v4836_v54 }
 0x14c   : > { %v1033_v16 = vpop.f32.mrf.mxu0 }
 0x14d   : > { %v1073_v19 = vadd.f32 %v1033_v16, %v885_v9  ;;  %v723_v16 = vadd.f32 %v4995_v40, %v4814_v34 }
 0x14e   : > { %v851_v36 = vpop.f32.mrf.mxu3  ;;  %v1269_v30 = vpop.f32.mrf.mxu2 }
 0x14f   : > { %v1181_v46 = vpop.f32.mrf.mxu1  ;;  %v1209_v27 = vadd.f32 %v1169_v62, %v1073_v19  ;;  %4101 = vmatmul.msk.f32.gmra.mxu0 %vm252_vm2, %v4800_v26  ;;  %v887_v56 = vadd.f32 %v851_v36, %v717_v11 }
 0x151   : > { %v5070_v10 = vadd.f32 %v1269_v30, %v1209_v27 }
 0x152   : > { %4125 = vmatmul.msk.f32.gmra.mxu1 %vm252_vm2, %v4688_v18 }
 0x153   : > { %4084 = vmatmul.msk.f32.gmra.mxu3 %vm252_vm2, %v4709_v29  ;;  %4142 = vmatmul.msk.f32.gmra.mxu2 %vm252_vm2, %v4862_v8 }
 0x154   : > { %v1036_v50 = vpop.f32.mrf.mxu0 }
 0x155   : > { %v1074_v62 = vadd.f32 %v1036_v50, %v886_v41 }
 0x156   : > { %v854_v42 = vpop.f32.mrf.mxu3  ;;  %v1272_v49 = vpop.f32.mrf.mxu2 }
 0x157   : > { %v1184_v45 = vpop.f32.mrf.mxu1  ;;  %v1210_v18 = vadd.f32 %v1172_v6, %v1074_v62  ;;  %4102 = vmatmul.msk.f32.gmra.mxu0 %vm252_vm2, %v4818_v38  ;;  %v888_v48 = vadd.f32 %v854_v42, %v720_v58 }
 0x159   : > { %v5085_v55 = vadd.f32 %v1272_v49, %v1210_v18  ;;  %v729_v49 = vadd.f32 %v4995_v40, %v4871_v12  ;;  %v4175_v12 = vld [vmem:[%s6217_s4 + $0xd0] sm:$0xf] }
 0x15a   : > { %4126 = vmatmul.msk.f32.gmra.mxu1 %vm252_vm2, %v4709_v29  ;;  %4176 = vmatpush.msk.msrb.mxu0 %vm339_vm0, %v4175_v12  ;;  %v5214_v12 = vld [vmem:[#allocation2 + $0xd8] sm:$0xff] }
 0x15b   : > { %4085 = vmatmul.msk.f32.gmra.mxu3 %vm252_vm2, %v4727_v39  ;;  %4143 = vmatmul.msk.f32.gmra.mxu2 %vm252_vm2, %v4883_v25 }
 0x15c   : > { %v1039_v59 = vpop.f32.mrf.mxu0 }
 0x15d   : > { %v1075_v60 = vadd.f32 %v1039_v59, %v887_v56 }
 0x15e   : > { %v857_v1 = vpop.f32.mrf.mxu3  ;;  %v1275_v47 = vpop.f32.mrf.mxu2 }
 0x15f   : > { %v1187_v6 = vpop.f32.mrf.mxu1  ;;  %v1211_v22 = vadd.f32 %v1175_v20, %v1075_v60  ;;  %4103 = vmatmul.msk.f32.gmra.mxu0 %vm252_vm2, %v4836_v54  ;;  %v889_v3 = vadd.f32 %v857_v1, %v723_v16  ;;  %v2405_v60 = vld [vmem:[%s6217_s4 + $0x10] sm:$0xf] }
 0x160   : > { %4210 = vmatpush.msk.msrb.mxu2 %vm339_vm0, %v2405_v60 }
 0x161   : > { %v5097_v29 = vadd.f32 %v1275_v47, %v1211_v22 }
 0x162   : > { %4127 = vmatmul.msk.f32.gmra.mxu1 %vm252_vm2, %v4727_v39 }
 0x163   : > { %4086 = vmatmul.msk.f32.gmra.mxu3 %vm252_vm2, %v4745_v51  ;;  %4144 = vmatmul.msk.f32.gmra.mxu2 %vm252_vm2, %v4910_v43 }
 0x164   : > { %v1042_v4 = vpop.f32.mrf.mxu0 }
 0x165   : > { %v1076_v9 = vadd.f32 %v1042_v4, %v888_v48  ;;  %v732_v48 = vadd.f32 %v4995_v40, %v4903_v32 }
 0x166   : > { %v860_v17 = vpop.f32.mrf.mxu3  ;;  %v1278_v36 = vpop.f32.mrf.mxu2 }
 0x167   : > { %v1190_v20 = vpop.f32.mrf.mxu1  ;;  %v1212_v19 = vadd.f32 %v1178_v33, %v1076_v9  ;;  %4104 = vmatmul.msk.f32.gmra.mxu0 %vm252_vm2, %v4862_v8  ;;  %v890_v42 = vadd.f32 %v860_v17, %v726_v31 }
 0x169   : > { %v5109_v39 = vadd.f32 %v1278_v36, %v1212_v19 }
 0x16a   : > { %4128 = vmatmul.msk.f32.gmra.mxu1 %vm252_vm2, %v4745_v51  ;;  %v2266_v51 = vld [vmem:[%s6216_s3] sm:$0xf] }
 0x16b   : > { %4087 = vmatmul.msk.f32.gmra.mxu3 %vm252_vm2, %v4761_v63  ;;  %4145 = vmatmul.msk.f32.gmra.mxu2 %vm252_vm2, %v4934_v0 }
 0x16c   : > { %v1045_v27 = vpop.f32.mrf.mxu0  ;;  %4193 = vmatpush.msk.msrb.mxu1 %vm339_vm0, %v2266_v51  ;;  %v4174_v51 = vld [vmem:[%s6217_s4 + $0xc8] sm:$0xff] }
 0x16d   : > { %v1077_v30 = vadd.f32 %v1045_v27, %v889_v3  ;;  %v735_v3 = vadd.f32 %v4995_v40, %v4924_v57  ;;  %v2403_v57 = vld [vmem:[%s6217_s4] sm:$0xff]  ;;  %2166 = vmatpush.msrb.mxu0 %v4174_v51  ;;  %v1930_v51 = vld [vmem:[#allocation2 + $0x8] sm:$0xff] }
 0x16e   : > { %v863_v34 = vpop.f32.mrf.mxu3  ;;  %v1281_v50 = vpop.f32.mrf.mxu2 }
 0x16f   : > { %v5117_v33 = vpop.f32.mrf.mxu1  ;;  %v1213_v41 = vadd.f32 %v1181_v46, %v1077_v30  ;;  %4105 = vmatmul.msk.f32.gmra.mxu0 %vm252_vm2, %v4883_v25  ;;  %v891_v1 = vadd.f32 %v863_v34, %v729_v49  ;;  %v2404_v34 = vld [vmem:[%s6217_s4 + $0x8] sm:$0xff]  ;;  %v4173_v49 = vld [vmem:[%s6217_s4 + $0xc0] sm:$0xff] }
 0x170   : > { %2471 = vmatpush.msrb.mxu2 %v2404_v34  ;;  %2167 = vmatpush.msrb.mxu0 %v4173_v49  ;;  %v744_v34 = vadd.f32 %v4995_v40, %v5004_v44  ;;  %v2253_v49 = vld [vmem:[%s4496_s8 + $0x98] sm:$0xff] }
 0x171   : > { %v5126_v62 = vadd.f32 %v1281_v50, %v1213_v41 }
 0x172   : > { %4129 = vmatmul.msk.f32.gmra.mxu1 %vm252_vm2, %v4761_v63  ;;  %2472 = vmatpush.msrb.mxu2 %v2403_v57 }
 0x173   : > { %4088 = vmatmul.msk.f32.gmra.mxu3 %vm252_vm2, %v4779_v13  ;;  %4146 = vmatmul.msk.f32.gmra.mxu2 %vm252_vm2, %v4958_v15 }
 0x174   : > { %v1048_v52 = vpop.f32.mrf.mxu0 }
 0x175   : > { %v1078_v46 = vadd.f32 %v1048_v52, %v890_v42 }
 0x176   : > { %v866_v11 = vpop.f32.mrf.mxu3  ;;  %v1284_v59 = vpop.f32.mrf.mxu2 }
 0x177   : > { %v5135_v18 = vpop.f32.mrf.mxu1  ;;  %v1214_v56 = vadd.f32 %v1184_v45, %v1078_v46  ;;  %4106 = vmatmul.msk.f32.gmra.mxu0 %vm252_vm2, %v4910_v43  ;;  %v892_v16 = vadd.f32 %v866_v11, %v732_v48  ;;  %v2250_v11 = vld [vmem:[%s4496_s8 + $0x80] sm:$0xff]  ;;  %v741_v48 = vadd.f32 %v4995_v40, %v4982_v28 }
 0x179   : > { %v5141_v63 = vadd.f32 %v1284_v59, %v1214_v56  ;;  %v738_v56 = vadd.f32 %v4995_v40, %v4956_v14 }
 0x17a   : > { %4130 = vmatmul.msk.f32.gmra.mxu1 %vm252_vm2, %v4779_v13  ;;  %v4229_v13 = vld [vmem:[%s6217_s4 + $0xe8] sm:$0xf] }
 0x17b   : > { %4089 = vmatmul.msk.f32.gmra.mxu3 %vm252_vm2, %v4800_v26  ;;  %4147 = vmatmul.msk.f32.gmra.mxu2 %vm252_vm2, %v4970_v23 }
 0x17c   : > { %v1051_v45 = vpop.f32.mrf.mxu0  ;;  %4230 = vmatpush.msk.msrb.mxu3 %vm339_vm0, %v4229_v13 }
 0x17d   : > { %v1079_v58 = vadd.f32 %v1051_v45, %v891_v1 }
 0x17e   : > { %v869_v22 = vpop.f32.mrf.mxu3  ;;  %v1287_v9 = vpop.f32.mrf.mxu2 }
 0x17f   : > { %v5161_v47 = vpop.f32.mrf.mxu1  ;;  %v1215_v4 = vadd.f32 %v1187_v6, %v1079_v58  ;;  %4107 = vmatmul.msk.f32.gmra.mxu0 %vm252_vm2, %v4934_v0  ;;  %v893_v41 = vadd.f32 %v869_v22, %v735_v3  ;;  %v2251_v22 = vld [vmem:[%s4496_s8 + $0x88] sm:$0xff] }
 0x181   : > { %v5167_v17 = vadd.f32 %v1287_v9, %v1215_v4 }
 0x182   : > { %4131 = vmatmul.msk.f32.gmra.mxu1 %vm252_vm2, %v4800_v26 }
 0x183   : > { %4090 = vmatmul.msk.f32.gmra.mxu3 %vm252_vm2, %v4818_v38  ;;  %4148 = vmatmul.msk.f32.gmra.mxu2 %vm252_vm2, %v4986_v35 }
 0x184   : > { %v1054_v19 = vpop.f32.mrf.mxu0 }
 0x185   : > { %v1080_v36 = vadd.f32 %v1054_v19, %v892_v16  ;;  %v1929_v16 = vld [vmem:[#allocation2] sm:$0xff] }
 0x186   : > { %v872_v32 = vpop.f32.mrf.mxu3  ;;  %v1290_v30 = vpop.f32.mrf.mxu2 }
 0x187   : > { %v5175_v6 = vpop.f32.mrf.mxu1  ;;  %v1216_v27 = vadd.f32 %v1190_v20, %v1080_v36  ;;  %4108 = vmatmul.msk.f32.gmra.mxu0 %vm252_vm2, %v4958_v15  ;;  %v5191_v20 = vld [vmem:[#allocation2 + $0xd0] sm:$0xff]  ;;  %v894_v13 = vadd.f32 %v872_v32, %v738_v56  ;;  %v5231_v36 = vld [vmem:[#allocation2 + $0xe0] sm:$0xff] }
 0x189   : > { %v5184_v31 = vadd.f32 %v1290_v30, %v1216_v27  ;;  %v2252_v30 = vld [vmem:[%s4496_s8 + $0x90] sm:$0xff] }
 0x18a   : > { %4132 = vmatmul.msk.f32.gmra.mxu1 %vm252_vm2, %v4818_v38 }
 0x18b   : > { %4091 = vmatmul.msk.f32.gmra.mxu3 %vm252_vm2, %v4836_v54  ;;  %4149 = vmatmul.msk.f32.gmra.mxu2 %vm252_vm2, %v5191_v20 }
 0x18c   : > { %v1057_v50 = vpop.f32.mrf.mxu0 }
 0x18d   : > { %v1081_v42 = vadd.f32 %v1057_v50, %v893_v41 }
 0x18e   : > { %v875_v52 = vpop.f32.mrf.mxu3  ;;  %v1293_v60 = vpop.f32.mrf.mxu2 }
 0x18f   : > { %v5200_v46 = vpop.f32.mrf.mxu1  ;;  %v1217_v59 = vadd.f32 %v5117_v33, %v1081_v42  ;;  %4109 = vmatmul.msk.f32.gmra.mxu0 %vm252_vm2, %v4970_v23  ;;  %v895_v32 = vadd.f32 %v875_v52, %v741_v48  ;;  %v5246_v52 = vld [vmem:[#allocation2 + $0xe8] sm:$0xff] }
 0x191   : > { %v5211_v1 = vadd.f32 %v1293_v60, %v1217_v59 }
 0x192   : > { %4194 = vmatmul.msk.f32.vlgmr.msrb.gmra.mxu1 %vm290_vm1, %v2250_v11 }
 0x193   : > { %4092 = vmatmul.msk.f32.gmra.mxu3 %vm252_vm2, %v4862_v8  ;;  %4150 = vmatmul.msk.f32.gmra.mxu2 %vm252_vm2, %v5214_v12 }
 0x194   : > { %v1060_v14 = vpop.f32.mrf.mxu0 }
 0x195   : > { %v1082_v33 = vadd.f32 %v1060_v14, %v894_v13  ;;  %v4228_v14 = vld [vmem:[%s6217_s4 + $0xe0] sm:$0xff] }
 0x196   : > { %v878_v45 = vpop.f32.mrf.mxu3  ;;  %v1296_v9 = vpop.f32.mrf.mxu2  ;;  %2658 = vmatpush.msrb.mxu3 %v4228_v14 }
 0x197   : > { %v5220_v58 = vpop.f32.mrf.mxu1  ;;  %v1218_v4 = vadd.f32 %v5135_v18, %v1082_v33  ;;  %4110 = vmatmul.msk.f32.gmra.mxu0 %vm252_vm2, %v4986_v35  ;;  %v896_v11 = vadd.f32 %v878_v45, %v744_v34 }
 0x199   : > { %v5228_v19 = vadd.f32 %v1296_v9, %v1218_v4 }
 0x19a   : > { %4195 = vmatmul.msk.f32.gmra.mxu1 %vm290_vm1, %v2251_v22  ;;  %v2254_v22 = vld [vmem:[%s4496_s8 + $0xa0] sm:$0xff] }
 0x19b   : > { %4151 = vmatmul.msk.f32.gmra.mxu2 %vm252_vm2, %v5231_v36  ;;  %4157 = vmatmul.msk.f32.vlgmr.msra.gmra.mxu3 %vm252_vm2, %v1929_v16 }
 0x19c   : > { %v1063_v28 = vpop.f32.mrf.mxu0 }
 0x19d   : > { %v1083_v3 = vadd.f32 %v1063_v28, %v895_v32 }
 0x19e   : > { %v1409_v18 = vpop.f32.mrf.mxu3  ;;  %v1299_v41 = vpop.f32.mrf.mxu2 }
 0x19f   : > { %v1719_v27 = vpop.f32.mrf.mxu1  ;;  %v1219_v57 = vadd.f32 %v5161_v47, %v1083_v3  ;;  %v1457_v50 = vadd.f32 %v1409_v18, %v5022_v5  ;;  %4111 = vmatmul.msk.f32.gmra.mxu0 %vm252_vm2, %v5191_v20 }
 0x1a1   : > { %v5243_v42 = vadd.f32 %v1299_v41, %v1219_v57 }
 0x1a2   : > { %4196 = vmatmul.msk.f32.gmra.mxu1 %vm290_vm1, %v2252_v30 }
 0x1a3   : > { %4152 = vmatmul.msk.f32.gmra.mxu2 %vm252_vm2, %v5246_v52  ;;  %4158 = vmatmul.msk.f32.gmra.mxu3 %vm252_vm2, %v1930_v51 }
 0x1a4   : > { %v1066_v40 = vpop.f32.mrf.mxu0 }
 0x1a5   : > { %v1084_v44 = vadd.f32 %v1066_v40, %v896_v11 }
 0x1a6   : > { %v1412_v47 = vpop.f32.mrf.mxu3  ;;  %v1302_v59 = vpop.f32.mrf.mxu2 }
 0x1a7   : > { %v1722_v5 = vpop.f32.mrf.mxu1  ;;  %v1220_v56 = vadd.f32 %v5175_v6, %v1084_v44  ;;  %v1458_v60 = vadd.f32 %v1412_v47, %v5034_v53  ;;  %4112 = vmatmul.msk.f32.gmra.mxu0 %vm252_vm2, %v5214_v12 }
 0x1a9   : > { %v5256_v13 = vadd.f32 %v1302_v59, %v1220_v56  ;;  %v1936_v59 = vld [vmem:[#allocation2 + $0x38] sm:$0xff] }
 0x1aa   : > { %4197 = vmatmul.msk.f32.gmra.mxu1 %vm290_vm1, %v2253_v49 }
 0x1ab   : > { %4159 = vmatmul.msk.f32.gmra.mxu3 %vm252_vm2, %v4948_v7  ;;  %4211 = vmatmul.msk.f32.vlgmr.msrb.gmra.mxu2 %vm252_vm2, %v4970_v23 }
 0x1ac   : > { %v1561_v6 = vpop.f32.mrf.mxu0 }
 0x1ad   : > { %v1609_v53 = vadd.f32 %v1561_v6, %v1457_v50 }
 0x1ae   : > { %v1415_v33 = vpop.f32.mrf.mxu3  ;;  %v5271_v9 = vpop.f32.mrf.mxu2 }
 0x1af   : > { %v1725_v45 = vpop.f32.mrf.mxu1  ;;  %v1459_v48 = vadd.f32 %v1415_v33, %v5046_v61  ;;  %v5269_v4 = vadd.f32 %v5200_v46, %v1609_v53  ;;  %4177 = vmatmul.msk.f32.vlgmr.msrb.gmra.mxu0 %vm252_vm2, %v4800_v26  ;;  %v2255_v46 = vld [vmem:[%s4496_s8 + $0xa8] sm:$0xff] }
 0x1b2   : > { %4198 = vmatmul.msk.f32.gmra.mxu1 %vm290_vm1, %v2254_v22 }
 0x1b3   : > { %4160 = vmatmul.msk.f32.gmra.mxu3 %vm252_vm2, %v4967_v21  ;;  %4212 = vmatmul.msk.f32.gmra.mxu2 %vm252_vm2, %v4986_v35 }
 0x1b4   : > { %v1564_v7 = vpop.f32.mrf.mxu0 }
 0x1b5   : > { %v1610_v16 = vadd.f32 %v1564_v7, %v1458_v60  ;;  %v4227_v60 = vld [vmem:[%s6217_s4 + $0xd8] sm:$0xff]  ;;  %v5347_v7 = vld [vmem:[#allocation2 + $0xf0] sm:$0xff] }
 0x1b6   : > { %v1418_v61 = vpop.f32.mrf.mxu3  ;;  %v5285_v26 = vpop.f32.mrf.mxu2  ;;  %2659 = vmatpush.msrb.mxu3 %v4227_v60  ;;  %v4267_v60 = vld [vmem:[%s6217_s4 + $0x78] sm:$0xff] }
 0x1b7   : > { %v1728_v32 = vpop.f32.mrf.mxu1  ;;  %v1460_v28 = vadd.f32 %v1418_v61, %v5058_v2  ;;  %v5283_v3 = vadd.f32 %v5220_v58, %v1610_v16  ;;  %4178 = vmatmul.msk.f32.gmra.mxu0 %vm252_vm2, %v4818_v38  ;;  %v2256_v58 = vld [vmem:[%s4496_s8 + $0xb0] sm:$0xff] }
 0x1ba   : > { %4199 = vmatmul.msk.f32.gmra.mxu1 %vm290_vm1, %v2255_v46  ;;  %v2260_v46 = vld [vmem:[%s4496_s8 + $0xd0] sm:$0xff] }
 0x1bb   : > { %4161 = vmatmul.msk.f32.gmra.mxu3 %vm252_vm2, %v4972_v24  ;;  %4213 = vmatmul.msk.f32.gmra.mxu2 %vm252_vm2, %v5191_v20 }
 0x1bc   : > { %v1567_v21 = vpop.f32.mrf.mxu0 }
 0x1bd   : > { %v1611_v18 = vadd.f32 %v1567_v21, %v1459_v48  ;;  %v1937_v48 = vld [vmem:[#allocation2 + $0x40] sm:$0xff] }
 0x1be   : > { %v1421_v2 = vpop.f32.mrf.mxu3  ;;  %v5298_v41 = vpop.f32.mrf.mxu2 }
 0x1bf   : > { %v1731_v30 = vpop.f32.mrf.mxu1  ;;  %v1461_v34 = vadd.f32 %v1421_v2, %v5070_v10  ;;  %v5296_v57 = vadd.f32 %v1719_v27, %v1611_v18  ;;  %4179 = vmatmul.msk.f32.gmra.mxu0 %vm252_vm2, %v4836_v54  ;;  %v2257_v27 = vld [vmem:[%s4496_s8 + $0xb8] sm:$0xff]  ;;  %v1935_v54 = vld [vmem:[#allocation2 + $0x30] sm:$0xff]  ;;  %v1938_v18 = vld [vmem:[#allocation2 + $0x48] sm:$0xff] }
 0x1c0   : > { %v5363_v2 = vld [vmem:[#allocation2 + $0xf8] sm:$0xff] }
 0x1c2   : > { %4200 = vmatmul.msk.f32.gmra.mxu1 %vm290_vm1, %v2256_v58 }
 0x1c3   : > { %4162 = vmatmul.msk.f32.gmra.mxu3 %vm252_vm2, %v4988_v37  ;;  %4214 = vmatmul.msk.f32.gmra.mxu2 %vm252_vm2, %v5214_v12 }
 0x1c4   : > { %v1570_v38 = vpop.f32.mrf.mxu0 }
 0x1c5   : > { %v1612_v24 = vadd.f32 %v1570_v38, %v1460_v28  ;;  %v2261_v38 = vld [vmem:[%s4496_s8 + $0xd8] sm:$0xff] }
 0x1c6   : > { %v1424_v50 = vpop.f32.mrf.mxu3  ;;  %v5311_v40 = vpop.f32.mrf.mxu2 }
 0x1c7   : > { %v1734_v10 = vpop.f32.mrf.mxu1  ;;  %v1462_v51 = vadd.f32 %v1424_v50, %v5085_v55  ;;  %v5309_v11 = vadd.f32 %v1722_v5, %v1612_v24  ;;  %4180 = vmatmul.msk.f32.gmra.mxu0 %vm252_vm2, %v4862_v8  ;;  %v2258_v55 = vld [vmem:[%s4496_s8 + $0xc0] sm:$0xff] }
 0x1ca   : > { %4201 = vmatmul.msk.f32.gmra.mxu1 %vm290_vm1, %v2257_v27  ;;  %v1939_v27 = vld [vmem:[#allocation2 + $0x50] sm:$0xff] }
 0x1cb   : > { %4163 = vmatmul.msk.f32.gmra.mxu3 %vm252_vm2, %v1935_v54  ;;  %4215 = vmatmul.msk.f32.gmra.mxu2 %vm252_vm2, %v5231_v36 }
 0x1cc   : > { %v1573_v37 = vpop.f32.mrf.mxu0 }
 0x1cd   : > { %v1613_v44 = vadd.f32 %v1573_v37, %v1461_v34 }
 0x1ce   : > { %v1427_v47 = vpop.f32.mrf.mxu3  ;;  %v5325_v8 = vpop.f32.mrf.mxu2 }
 0x1cf   : > { %v5319_v49 = vpop.f32.mrf.mxu1  ;;  %v1463_v5 = vadd.f32 %v1427_v47, %v5097_v29  ;;  %v5323_v56 = vadd.f32 %v1725_v45, %v1613_v44  ;;  %4181 = vmatmul.msk.f32.gmra.mxu0 %vm252_vm2, %v4883_v25  ;;  %v2259_v25 = vld [vmem:[%s4496_s8 + $0xc8] sm:$0xff]  ;;  %v2262_v44 = vld [vmem:[%s4496_s8 + $0xe0] sm:$0xff] }
 0x1d0   : > { %v4268_v47 = vld [vmem:[%s6217_s4 + $0x80] sm:$0xff] }
 0x1d2   : > { %4202 = vmatmul.msk.f32.gmra.mxu1 %vm290_vm1, %v2258_v55 }
 0x1d3   : > { %4164 = vmatmul.msk.f32.gmra.mxu3 %vm252_vm2, %v1936_v59  ;;  %4216 = vmatmul.msk.f32.gmra.mxu2 %vm252_vm2, %v5246_v52 }
 0x1d4   : > { %v1576_v29 = vpop.f32.mrf.mxu0 }
 0x1d5   : > { %v1614_v14 = vadd.f32 %v1576_v29, %v1462_v51  ;;  %v5379_v51 = vld [vmem:[#allocation2 + $0x100] sm:$0xff]  ;;  %v1940_v29 = vld [vmem:[#allocation2 + $0x58] sm:$0xff] }
 0x1d6   : > { %v1430_v6 = vpop.f32.mrf.mxu3  ;;  %v5342_v22 = vpop.f32.mrf.mxu2 }
 0x1d7   : > { %v5336_v53 = vpop.f32.mrf.mxu1  ;;  %v1464_v33 = vadd.f32 %v1430_v6, %v5109_v39  ;;  %v5340_v45 = vadd.f32 %v1728_v32, %v1614_v14  ;;  %4182 = vmatmul.msk.f32.gmra.mxu0 %vm252_vm2, %v4910_v43  ;;  %v5406_v14 = vld [vmem:[#allocation2 + $0x108] sm:$0xff] }
 0x1da   : > { %4203 = vmatmul.msk.f32.gmra.mxu1 %vm290_vm1, %v2259_v25 }
 0x1db   : > { %4165 = vmatmul.msk.f32.gmra.mxu3 %vm252_vm2, %v1937_v48  ;;  %4217 = vmatmul.msk.f32.gmra.mxu2 %vm252_vm2, %v5347_v7 }
 0x1dc   : > { %v1579_v16 = vpop.f32.mrf.mxu0 }
 0x1dd   : > { %v1615_v61 = vadd.f32 %v1579_v16, %v1463_v5 }
 0x1de   : > { %v1433_v39 = vpop.f32.mrf.mxu3  ;;  %v5358_v21 = vpop.f32.mrf.mxu2 }
 0x1df   : > { %v5352_v32 = vpop.f32.mrf.mxu1  ;;  %v1465_v28 = vadd.f32 %v1433_v39, %v5126_v62  ;;  %v5356_v43 = vadd.f32 %v1731_v30, %v1615_v61  ;;  %4183 = vmatmul.msk.f32.gmra.mxu0 %vm252_vm2, %v4934_v0  ;;  %v4289_v39 = vld [vmem:[%s6217_s4 + $0x40] sm:$0xf] }
 0x1e0   : > { %4290 = vmatpush.msk.msra.mxu2 %vm339_vm0, %v4289_v39 }
 0x1e2   : > { %4204 = vmatmul.msk.f32.gmra.mxu1 %vm290_vm1, %v2260_v46  ;;  %v1941_v46 = vld [vmem:[#allocation2 + $0x60] sm:$0xff] }
 0x1e3   : > { %4166 = vmatmul.msk.f32.gmra.mxu3 %vm252_vm2, %v1938_v18  ;;  %4218 = vmatmul.msk.f32.gmra.mxu2 %vm252_vm2, %v5363_v2 }
 0x1e4   : > { %v1582_v58 = vpop.f32.mrf.mxu0 }
 0x1e5   : > { %v1616_v34 = vadd.f32 %v1582_v58, %v1464_v33  ;;  %v2263_v33 = vld [vmem:[%s4496_s8 + $0xe8] sm:$0xff] }
 0x1e6   : > { %v1436_v62 = vpop.f32.mrf.mxu3  ;;  %v5374_v50 = vpop.f32.mrf.mxu2 }
 0x1e7   : > { %v5368_v30 = vpop.f32.mrf.mxu1  ;;  %v1466_v24 = vadd.f32 %v1436_v62, %v5141_v63  ;;  %v5372_v0 = vadd.f32 %v1734_v10, %v1616_v34  ;;  %4184 = vmatmul.msk.f32.gmra.mxu0 %vm252_vm2, %v4958_v15  ;;  %v4269_v63 = vld [vmem:[%s6217_s4 + $0x88] sm:$0xf] }
 0x1e8   : > { %4270 = vmatpush.msk.msra.mxu1 %vm339_vm0, %v4269_v63  ;;  %v1942_v63 = vld [vmem:[#allocation2 + $0x68] sm:$0xff] }
 0x1ea   : > { %4205 = vmatmul.msk.f32.gmra.mxu1 %vm290_vm1, %v2261_v38  ;;  %v2264_v38 = vld [vmem:[%s4496_s8 + $0xf0] sm:$0xff] }
 0x1eb   : > { %4167 = vmatmul.msk.f32.gmra.mxu3 %vm252_vm2, %v1939_v27  ;;  %4219 = vmatmul.msk.f32.gmra.mxu2 %vm252_vm2, %v5379_v51 }
 0x1ec   : > { %v1585_v54 = vpop.f32.mrf.mxu0  ;;  %2892 = vmatpush.msra.mxu1 %v4268_v47  ;;  %v2265_v47 = vld [vmem:[%s4496_s8 + $0xf8] sm:$0xff] }
 0x1ed   : > { %v1617_v10 = vadd.f32 %v1585_v54, %v1465_v28  ;;  %v5426_v28 = vld [vmem:[#allocation2 + $0x110] sm:$0xff] }
 0x1ee   : > { %v1439_v37 = vpop.f32.mrf.mxu3  ;;  %v5398_v59 = vpop.f32.mrf.mxu2  ;;  %2893 = vmatpush.msra.mxu1 %v4267_v60 }
 0x1ef   : > { %v5388_v15 = vpop.f32.mrf.mxu1  ;;  %v1467_v55 = vadd.f32 %v1439_v37, %v5167_v17  ;;  %v5396_v5 = vadd.f32 %v5319_v49, %v1617_v10  ;;  %4185 = vmatmul.msk.f32.gmra.mxu0 %vm252_vm2, %v4970_v23  ;;  %v5452_v10 = vld [vmem:[#allocation2 + $0x118] sm:$0xff] }
 0x1f2   : > { %4206 = vmatmul.msk.f32.gmra.mxu1 %vm290_vm1, %v2262_v44 }
 0x1f3   : > { %4168 = vmatmul.msk.f32.gmra.mxu3 %vm252_vm2, %v1940_v29  ;;  %4220 = vmatmul.msk.f32.gmra.mxu2 %vm252_vm2, %v5406_v14 }
 0x1f4   : > { %v1588_v17 = vpop.f32.mrf.mxu0 }
 0x1f5   : > { %v1618_v49 = vadd.f32 %v1588_v17, %v1466_v24  ;;  %v4288_v17 = vld [vmem:[%s6217_s4 + $0x38] sm:$0xff] }
 0x1f6   : > { %v1442_v6 = vpop.f32.mrf.mxu3  ;;  %v5418_v61 = vpop.f32.mrf.mxu2  ;;  %3043 = vmatpush.msra.mxu2 %v4288_v17 }
 0x1f7   : > { %v5411_v25 = vpop.f32.mrf.mxu1  ;;  %v1468_v48 = vadd.f32 %v1442_v6, %v5184_v31  ;;  %v5416_v16 = vadd.f32 %v5336_v53, %v1618_v49  ;;  %4186 = vmatmul.msk.f32.gmra.mxu0 %vm252_vm2, %v4986_v35  ;;  %v4249_v31 = vld [vmem:[%s6217_s4 + $0x28] sm:$0xf]  ;;  %v4309_v53 = vld [vmem:[%s6217_s4 + $0xa0] sm:$0xf]  ;;  %v4287_v49 = vld [vmem:[%s6217_s4 + $0x30] sm:$0xff] }
 0x1f8   : > { %4250 = vmatpush.msk.msra.mxu0 %vm339_vm0, %v4249_v31  ;;  %4310 = vmatpush.msk.msra.mxu3 %vm339_vm0, %v4309_v53  ;;  %v5475_v6 = vld [vmem:[#allocation2 + $0x120] sm:$0xff]  ;;  %v4247_v31 = vld [vmem:[%s6217_s4 + $0x18] sm:$0xff] }
 0x1f9   : > { %3044 = vmatpush.msra.mxu2 %v4287_v49 }
 0x1fa   : > { %4207 = vmatmul.msk.f32.gmra.mxu1 %vm290_vm1, %v2263_v33  ;;  %v4248_v33 = vld [vmem:[%s6217_s4 + $0x20] sm:$0xff] }
 0x1fb   : > { %4169 = vmatmul.msk.f32.gmra.mxu3 %vm252_vm2, %v1941_v46  ;;  %4221 = vmatmul.msk.f32.gmra.mxu2 %vm252_vm2, %v5426_v28 }
 0x1fc   : > { %v1591_v18 = vpop.f32.mrf.mxu0  ;;  %2793 = vmatpush.msra.mxu0 %v4248_v33 }
 0x1fd   : > { %v1619_v58 = vadd.f32 %v1591_v18, %v1467_v55 }
 0x1fe   : > { %v1445_v34 = vpop.f32.mrf.mxu3  ;;  %v5447_v54 = vpop.f32.mrf.mxu2  ;;  %2794 = vmatpush.msra.mxu0 %v4247_v31 }
 0x1ff   : > { %v5440_v62 = vpop.f32.mrf.mxu1  ;;  %v1469_v24 = vadd.f32 %v1445_v34, %v5211_v1  ;;  %v5445_v27 = vadd.f32 %v5352_v32, %v1619_v58  ;;  %4187 = vmatmul.msk.f32.gmra.mxu0 %vm252_vm2, %v5191_v20  ;;  %v5498_v34 = vld [vmem:[#allocation2 + $0xb0] sm:$0xff] }
 0x202   : > { %4208 = vmatmul.msk.f32.gmra.mxu1 %vm290_vm1, %v2264_v38  ;;  %v1944_v38 = vld [vmem:[#allocation2 + $0x78] sm:$0xff] }
 0x203   : > { %4170 = vmatmul.msk.f32.gmra.mxu3 %vm252_vm2, %v1942_v63  ;;  %4222 = vmatmul.msk.f32.gmra.mxu2 %vm252_vm2, %v5452_v10 }
 0x204   : > { %v1594_v37 = vpop.f32.mrf.mxu0 }
 0x205   : > { %v1620_v1 = vadd.f32 %v1594_v37, %v1468_v48 }
 0x206   : > { %v1448_v44 = vpop.f32.mrf.mxu3  ;;  %v5464_v29 = vpop.f32.mrf.mxu2 }
 0x207   : > { %v5457_v32 = vpop.f32.mrf.mxu1  ;;  %v1470_v55 = vadd.f32 %v1448_v44, %v5228_v19  ;;  %v5462_v60 = vadd.f32 %v5368_v30, %v1620_v1  ;;  %4188 = vmatmul.msk.f32.gmra.mxu0 %vm252_vm2, %v5214_v12  ;;  %v1943_v19 = vld [vmem:[#allocation2 + $0x70] sm:$0xff] }
 0x20a   : > { %4209 = vmatmul.msk.f32.gmra.mxu1 %vm290_vm1, %v2265_v47 }
 0x20b   : > { %4171 = vmatmul.msk.f32.gmra.mxu3 %vm252_vm2, %v1943_v19  ;;  %4223 = vmatmul.msk.f32.gmra.mxu2 %vm252_vm2, %v5475_v6  ;;  %v5520_v19 = vld [vmem:[#allocation2 + $0xb8] sm:$0xff] }
 0x20c   : > { %v1597_v30 = vpop.f32.mrf.mxu0 }
 0x20d   : > { %v1621_v48 = vadd.f32 %v1597_v30, %v1469_v24  ;;  %v5500_v24 = vld [vmem:[#allocation2 + $0x128] sm:$0xff] }
 0x20e   : > { %v1451_v39 = vpop.f32.mrf.mxu3  ;;  %v5492_v58 = vpop.f32.mrf.mxu2 }
 0x20f   : > { %v5483_v46 = vpop.f32.mrf.mxu1  ;;  %v1471_v53 = vadd.f32 %v1451_v39, %v5243_v42  ;;  %v5490_v18 = vadd.f32 %v5388_v15, %v1621_v48  ;;  %4189 = vmatmul.msk.f32.gmra.mxu0 %vm252_vm2, %v5231_v36  ;;  %v2558_v15 = vmax.f32 %v5498_v34, %v5191_v20 }
 0x211   : > { %v2574_v49 = vmax.f32 %v2558_v15, %v4970_v23 }
 0x212   : > { %4271 = vmatmul.msk.f32.vlgmr.msra.gmra.mxu1 %vm252_vm2, %v5191_v20 }
 0x213   : > { %4172 = vmatmul.msk.f32.gmra.mxu3 %vm252_vm2, %v1944_v38  ;;  %4224 = vmatmul.msk.f32.gmra.mxu2 %vm252_vm2, %v5500_v24  ;;  %v5541_v38 = vld [vmem:[#allocation2 + $0xc0] sm:$0xff] }
 0x214   : > { %v1600_v42 = vpop.f32.mrf.mxu0 }
 0x215   : > { %v1622_v63 = vadd.f32 %v1600_v42, %v1470_v55  ;;  %v5522_v55 = vld [vmem:[#allocation2 + $0x130] sm:$0xff]  ;;  %v5543_v42 = vld [vmem:[#allocation2 + $0x138] sm:$0xff] }
 0x216   : > { %v1454_v37 = vpop.f32.mrf.mxu3  ;;  %v5513_v17 = vpop.f32.mrf.mxu2 }
 0x217   : > { %v5507_v1 = vpop.f32.mrf.mxu1  ;;  %v1472_v44 = vadd.f32 %v1454_v37, %v5256_v13  ;;  %v5511_v47 = vadd.f32 %v5411_v25, %v1622_v63  ;;  %4190 = vmatmul.msk.f32.gmra.mxu0 %vm252_vm2, %v5246_v52  ;;  %v2559_v25 = vmax.f32 %v5520_v19, %v5214_v12 }
 0x219   : > { %v2575_v31 = vmax.f32 %v2559_v25, %v4986_v35  ;;  %v1913_v25 = vadd.f32 %v5271_v9, %v5269_v4 }
 0x21a   : > { %4272 = vmatmul.msk.f32.gmra.mxu1 %vm252_vm2, %v5214_v12 }
 0x21b   : > { %4225 = vmatmul.msk.f32.gmra.mxu2 %vm252_vm2, %v5522_v55  ;;  %4231 = vmatmul.msk.f32.vlgmr.msrb.gmra.mxu3 %vm252_vm2, %v2574_v49 }
 0x21c   : > { %v1603_v13 = vpop.f32.mrf.mxu0 }
 0x21d   : > { %v1623_v30 = vadd.f32 %v1603_v13, %v1471_v53  ;;  %v2560_v53 = vmax.f32 %v5541_v38, %v5231_v36  ;;  %v4308_v13 = vld [vmem:[%s6217_s4 + $0x98] sm:$0xff] }
 0x21e   : > { %v2017_v33 = vpop.f32.mrf.mxu3  ;;  %v5534_v39 = vpop.f32.mrf.mxu2  ;;  %3194 = vmatpush.msra.mxu3 %v4308_v13  ;;  %v1914_v13 = vadd.f32 %v5285_v26, %v5283_v3 }
 0x21f   : > { %v5529_v48 = vpop.f32.mrf.mxu1  ;;  %v5532_v23 = vadd.f32 %v5440_v62, %v1623_v30  ;;  %4191 = vmatmul.msk.f32.gmra.mxu0 %vm252_vm2, %v5347_v7  ;;  %v5569_v30 = vld [vmem:[#allocation2 + $0xa0] sm:$0xff] }
 0x220   : > { %6224 = vst [vmem:[#allocation3_spill] sm:$0xff] %v5569_v30 }
 0x222   : > { %4273 = vmatmul.msk.f32.gmra.mxu1 %vm252_vm2, %v5231_v36 }
 0x223   : > { %4226 = vmatmul.msk.f32.gmra.mxu2 %vm252_vm2, %v5543_v42  ;;  %4232 = vmatmul.msk.f32.gmra.mxu3 %vm252_vm2, %v2575_v31  ;;  %v2065_v31 = vadd.f32 %v2017_v33, %v1913_v25 }
 0x224   : > { %v1606_v62 = vpop.f32.mrf.mxu0 }
 0x225   : > { %v1624_v15 = vadd.f32 %v1606_v62, %v1472_v44  ;;  %v2576_v44 = vmax.f32 %v2560_v53, %v5191_v20 }
 0x226   : > { %v2020_v63 = vpop.f32.mrf.mxu3  ;;  %v5555_v49 = vpop.f32.mrf.mxu2 }
 0x227   : > { %v5550_v37 = vpop.f32.mrf.mxu1  ;;  %v5553_v35 = vadd.f32 %v5457_v32, %v1624_v15  ;;  %4192 = vmatmul.msk.f32.gmra.mxu0 %vm252_vm2, %v5363_v2  ;;  %v5567_v32 = vld [vmem:[#allocation2 + $0xc8] sm:$0xff] }
 0x228   : > { %v2561_v9 = vmax.f32 %v5567_v32, %v5246_v52 }
 0x22a   : > { %4274 = vmatmul.msk.f32.gmra.mxu1 %vm252_vm2, %v5246_v52  ;;  %v2577_v25 = vmax.f32 %v2561_v9, %v5214_v12 }
 0x22b   : > { %4233 = vmatmul.msk.f32.gmra.mxu3 %vm252_vm2, %v2576_v44  ;;  %4291 = vmatmul.msk.f32.vlgmr.msra.gmra.mxu2 %vm252_vm2, %v5569_v30  ;;  %v5596_v44 = vld [vmem:[#allocation2 + $0xa8] sm:$0xff] }
 0x22c   : > { %v2169_v4 = vpop.f32.mrf.mxu0  ;;  %6226 = vst [vmem:[#allocation5_spill] sm:$0xff] %v5596_v44 }
 0x22d   : > { %v2217_v62 = vadd.f32 %v2169_v4, %v2065_v31  ;;  %v2066_v31 = vadd.f32 %v2020_v63, %v1914_v13  ;;  %v1915_v63 = vadd.f32 %v5298_v41, %v5296_v57  ;;  %v1916_v41 = vadd.f32 %v5311_v40, %v5309_v11 }
 0x22e   : > { %v2023_v53 = vpop.f32.mrf.mxu3  ;;  %v5587_v15 = vpop.f32.mrf.mxu2  ;;  %v1917_v40 = vadd.f32 %v5325_v8, %v5323_v56  ;;  %v1918_v8 = vadd.f32 %v5342_v22, %v5340_v45  ;;  %v2566_v45 = vmax.f32 %v5347_v7, %v5426_v28 }
 0x22f   : > { %v5583_v33 = vpop.f32.mrf.mxu1  ;;  %2234 = vst.msk [vmem:[%s5579_s12] sm:$0xff] %vm2233_vm3, %v2217_v62  ;;  %4251 = vmatmul.msk.f32.vlgmr.msra.gmra.mxu0 %vm252_vm2, %v5498_v34  ;;  %v2562_v62 = vmax.f32 %v5191_v20, %v5347_v7  ;;  %v2067_v13 = vadd.f32 %v2023_v53, %v1915_v63 }
 0x230   : > { %6225 = vst [vmem:[#allocation4_spill] sm:$0xff] %v5583_v33 }
 0x231   : > { %v2578_v9 = vmax.f32 %v2562_v62, %v5231_v36 }
 0x232   : > { %4275 = vmatmul.msk.f32.gmra.mxu1 %vm252_vm2, %v5347_v7 }
 0x233   : > { %4234 = vmatmul.msk.f32.gmra.mxu3 %vm252_vm2, %v2577_v25  ;;  %4292 = vmatmul.msk.f32.gmra.mxu2 %vm252_vm2, %v5596_v44  ;;  %v2563_v25 = vmax.f32 %v5214_v12, %v5363_v2 }
 0x234   : > { %v2172_v4 = vpop.f32.mrf.mxu0 }
 0x235   : > { %v2218_v30 = vadd.f32 %v2172_v4, %v2066_v31  ;;  %v2579_v53 = vmax.f32 %v2563_v25, %v5246_v52 }
 0x236   : > { %v2026_v33 = vpop.f32.mrf.mxu3  ;;  %v5607_v26 = vpop.f32.mrf.mxu2 }
 0x237   : > { %v5603_v3 = vpop.f32.mrf.mxu1  ;;  %2235 = vst.msk [vmem:[%s5579_s12 + $0x8] sm:$0xff] %vm2233_vm3, %v2218_v30  ;;  %4252 = vmatmul.msk.f32.gmra.mxu0 %vm252_vm2, %v5520_v19  ;;  %v2068_v62 = vadd.f32 %v2026_v33, %v1916_v41 }
 0x23a   : > { %4276 = vmatmul.msk.f32.gmra.mxu1 %vm252_vm2, %v5363_v2 }
 0x23b   : > { %4235 = vmatmul.msk.f32.gmra.mxu3 %vm252_vm2, %v2578_v9  ;;  %4293 = vmatmul.msk.f32.gmra.mxu2 %vm252_vm2, %v5498_v34  ;;  %v2564_v9 = vmax.f32 %v5231_v36, %v5379_v51 }
 0x23c   : > { %v2175_v30 = vpop.f32.mrf.mxu0 }
 0x23d   : > { %v2219_v31 = vadd.f32 %v2175_v30, %v2067_v13  ;;  %v2580_v33 = vmax.f32 %v2564_v9, %v5347_v7  ;;  %v4307_v9 = vld [vmem:[%s6217_s4 + $0x90] sm:$0xff] }
 0x23e   : > { %v2029_v4 = vpop.f32.mrf.mxu3  ;;  %v5625_v57 = vpop.f32.mrf.mxu2  ;;  %3195 = vmatpush.msra.mxu3 %v4307_v9  ;;  %v2567_v9 = vmax.f32 %v5363_v2, %v5452_v10 }
 0x23f   : > { %v5621_v44 = vpop.f32.mrf.mxu1  ;;  %2236 = vst.msk [vmem:[%s5579_s12 + $0x10] sm:$0xff] %vm2233_vm3, %v2219_v31  ;;  %4253 = vmatmul.msk.f32.gmra.mxu0 %vm252_vm2, %v5541_v38  ;;  %v2069_v25 = vadd.f32 %v2029_v4, %v1917_v40 }
 0x242   : > { %4277 = vmatmul.msk.f32.gmra.mxu1 %vm252_vm2, %v5379_v51 }
 0x243   : > { %4236 = vmatmul.msk.f32.gmra.mxu3 %vm252_vm2, %v2579_v53  ;;  %4294 = vmatmul.msk.f32.gmra.mxu2 %vm252_vm2, %v5520_v19  ;;  %v2565_v53 = vmax.f32 %v5246_v52, %v5406_v14 }
 0x244   : > { %v2178_v63 = vpop.f32.mrf.mxu0 }
 0x245   : > { %v2220_v13 = vadd.f32 %v2178_v63, %v2068_v62  ;;  %v2581_v4 = vmax.f32 %v2565_v53, %v5363_v2 }
 0x246   : > { %v2032_v30 = vpop.f32.mrf.mxu3  ;;  %v5643_v11 = vpop.f32.mrf.mxu2 }
 0x247   : > { %v5639_v31 = vpop.f32.mrf.mxu1  ;;  %2237 = vst.msk [vmem:[%s5579_s12 + $0x18] sm:$0xff] %vm2233_vm3, %v2220_v13  ;;  %4254 = vmatmul.msk.f32.gmra.mxu0 %vm252_vm2, %v5567_v32  ;;  %v2070_v40 = vadd.f32 %v2032_v30, %v1918_v8  ;;  %v1919_v30 = vadd.f32 %v5358_v21, %v5356_v43  ;;  %v1920_v21 = vadd.f32 %v5374_v50, %v5372_v0 }
 0x248   : > { %v1921_v50 = vadd.f32 %v5398_v59, %v5396_v5 }
 0x24a   : > { %4278 = vmatmul.msk.f32.gmra.mxu1 %vm252_vm2, %v5406_v14 }
 0x24b   : > { %4237 = vmatmul.msk.f32.gmra.mxu3 %vm252_vm2, %v2580_v33  ;;  %4295 = vmatmul.msk.f32.gmra.mxu2 %vm252_vm2, %v5541_v38 }
 0x24c   : > { %v2181_v41 = vpop.f32.mrf.mxu0 }
 0x24d   : > { %v2221_v62 = vadd.f32 %v2181_v41, %v2069_v25 }
 0x24e   : > { %v2035_v63 = vpop.f32.mrf.mxu3  ;;  %v5661_v56 = vpop.f32.mrf.mxu2 }
 0x24f   : > { %v5657_v13 = vpop.f32.mrf.mxu1  ;;  %2238 = vst.msk [vmem:[%s5579_s12 + $0x20] sm:$0xff] %vm2233_vm3, %v2221_v62  ;;  %4255 = vmatmul.msk.f32.gmra.mxu0 %vm252_vm2, %v5191_v20  ;;  %v2582_v62 = vmax.f32 %v2566_v45, %v5379_v51  ;;  %v2071_v8 = vadd.f32 %v2035_v63, %v1919_v30  ;;  %v2568_v30 = vmax.f32 %v5379_v51, %v5475_v6 }
 0x252   : > { %4279 = vmatmul.msk.f32.gmra.mxu1 %vm252_vm2, %v5426_v28 }
 0x253   : > { %4238 = vmatmul.msk.f32.gmra.mxu3 %vm252_vm2, %v2581_v4  ;;  %4296 = vmatmul.msk.f32.gmra.mxu2 %vm252_vm2, %v5567_v32 }
 0x254   : > { %v2184_v33 = vpop.f32.mrf.mxu0 }
 0x255   : > { %v2222_v22 = vadd.f32 %v2184_v33, %v2070_v40 }
 0x256   : > { %v2038_v25 = vpop.f32.mrf.mxu3  ;;  %v5682_v53 = vpop.f32.mrf.mxu2 }
 0x257   : > { %v5678_v41 = vpop.f32.mrf.mxu1  ;;  %2239 = vst.msk [vmem:[%s5579_s12 + $0x28] sm:$0xff] %vm2233_vm3, %v2222_v22  ;;  %4256 = vmatmul.msk.f32.gmra.mxu0 %vm252_vm2, %v5214_v12  ;;  %v2072_v63 = vadd.f32 %v2038_v25, %v1920_v21  ;;  %v2569_v21 = vmax.f32 %v5406_v14, %v5500_v24 }
 0x25a   : > { %4280 = vmatmul.msk.f32.gmra.mxu1 %vm252_vm2, %v5452_v10 }
 0x25b   : > { %4239 = vmatmul.msk.f32.gmra.mxu3 %vm252_vm2, %v2582_v62  ;;  %4297 = vmatmul.msk.f32.gmra.mxu2 %vm252_vm2, %v5191_v20  ;;  %v2583_v20 = vmax.f32 %v2567_v9, %v5406_v14 }
 0x25c   : > { %v2187_v4 = vpop.f32.mrf.mxu0 }
 0x25d   : > { %v2223_v40 = vadd.f32 %v2187_v4, %v2071_v8 }
 0x25e   : > { %v2041_v33 = vpop.f32.mrf.mxu3  ;;  %v5700_v43 = vpop.f32.mrf.mxu2 }
 0x25f   : > { %v5696_v22 = vpop.f32.mrf.mxu1  ;;  %2240 = vst.msk [vmem:[%s5579_s12 + $0x30] sm:$0xff] %vm2233_vm3, %v2223_v40  ;;  %4257 = vmatmul.msk.f32.gmra.mxu0 %vm252_vm2, %v5231_v36  ;;  %v2073_v25 = vadd.f32 %v2041_v33, %v1921_v50  ;;  %v4349_v40 = vld [vmem:[%s6217_s4 + $0xb8] sm:$0xf]  ;;  %v4348_v33 = vld [vmem:[%s6217_s4 + $0xb0] sm:$0xff] }
 0x260   : > { %4350 = vmatpush.msk.msrb.mxu1 %vm339_vm0, %v4349_v40 }
 0x262   : > { %4281 = vmatmul.msk.f32.gmra.mxu1 %vm252_vm2, %v5475_v6 }
 0x263   : > { %4240 = vmatmul.msk.f32.gmra.mxu3 %vm252_vm2, %v2583_v20  ;;  %4298 = vmatmul.msk.f32.gmra.mxu2 %vm252_vm2, %v5214_v12  ;;  %v2584_v12 = vmax.f32 %v2568_v30, %v5426_v28  ;;  %v2585_v30 = vmax.f32 %v2569_v21, %v5452_v10 }
 0x264   : > { %v2190_v45 = vpop.f32.mrf.mxu0  ;;  %3496 = vmatpush.msrb.mxu1 %v4348_v33 }
 0x265   : > { %v2224_v62 = vadd.f32 %v2190_v45, %v2072_v63  ;;  %v4347_v63 = vld [vmem:[%s6217_s4 + $0xa8] sm:$0xff]  ;;  %v1922_v45 = vadd.f32 %v5418_v61, %v5416_v16  ;;  %v1923_v61 = vadd.f32 %v5447_v54, %v5445_v27  ;;  %v4329_v27 = vld [vmem:[%s6217_s4 + $0x58] sm:$0xf]  ;;  %v4389_v54 = vld [vmem:[%s6217_s4 + $0xd0] sm:$0xf] }
 0x266   : > { %v2044_v8 = vpop.f32.mrf.mxu3  ;;  %v5718_v0 = vpop.f32.mrf.mxu2  ;;  %3497 = vmatpush.msrb.mxu1 %v4347_v63  ;;  %4330 = vmatpush.msk.msrb.mxu0 %vm339_vm0, %v4329_v27 }
 0x267   : > { %v5714_v4 = vpop.f32.mrf.mxu1  ;;  %2241 = vst.msk [vmem:[%s5579_s12 + $0x38] sm:$0xff] %vm2233_vm3, %v2224_v62  ;;  %4258 = vmatmul.msk.f32.gmra.mxu0 %vm252_vm2, %v5246_v52  ;;  %v2074_v62 = vadd.f32 %v2044_v8, %v1922_v45  ;;  %v4369_v8 = vld [vmem:[%s6217_s4 + $0x70] sm:$0xf]  ;;  %4390 = vmatpush.msk.msrb.mxu3 %vm339_vm0, %v4389_v54  ;;  %v1925_v54 = vadd.f32 %v5492_v58, %v5490_v18 }
 0x268   : > { %4370 = vmatpush.msk.msrb.mxu2 %vm339_vm0, %v4369_v8  ;;  %v4328_v18 = vld [vmem:[%s6217_s4 + $0x50] sm:$0xff] }
 0x269   : > { %3345 = vmatpush.msrb.mxu0 %v4328_v18 }
 0x26a   : > { %4282 = vmatmul.msk.f32.gmra.mxu1 %vm252_vm2, %v5500_v24 }
 0x26b   : > { %4241 = vmatmul.msk.f32.gmra.mxu3 %vm252_vm2, %v2584_v12  ;;  %4299 = vmatmul.msk.f32.gmra.mxu2 %vm252_vm2, %v5231_v36  ;;  %v2570_v12 = vmax.f32 %v5426_v28, %v5522_v55 }
 0x26c   : > { %v2193_v9 = vpop.f32.mrf.mxu0 }
 0x26d   : > { %v2225_v5 = vadd.f32 %v2193_v9, %v2073_v25 }
 0x26e   : > { %v2047_v59 = vpop.f32.mrf.mxu3  ;;  %v5743_v36 = vpop.f32.mrf.mxu2 }
 0x26f   : > { %v5736_v20 = vpop.f32.mrf.mxu1  ;;  %2242 = vst.msk [vmem:[%s5579_s12 + $0x40] sm:$0xff] %vm2233_vm3, %v2225_v5  ;;  %4259 = vmatmul.msk.f32.gmra.mxu0 %vm252_vm2, %v5347_v7  ;;  %v2075_v21 = vadd.f32 %v2047_v59, %v1923_v61  ;;  %v2571_v59 = vmax.f32 %v5452_v10, %v5543_v42 }
 0x272   : > { %4283 = vmatmul.msk.f32.gmra.mxu1 %vm252_vm2, %v5522_v55 }
 0x273   : > { %4242 = vmatmul.msk.f32.gmra.mxu3 %vm252_vm2, %v2585_v30  ;;  %4300 = vmatmul.msk.f32.gmra.mxu2 %vm252_vm2, %v5246_v52  ;;  %v2586_v52 = vmax.f32 %v2570_v12, %v5475_v6  ;;  %v2587_v12 = vmax.f32 %v2571_v59, %v5500_v24  ;;  %v4367_v59 = vld [vmem:[%s6217_s4 + $0x60] sm:$0xff] }
 0x274   : > { %v2196_v50 = vpop.f32.mrf.mxu0 }
 0x275   : > { %v2226_v25 = vadd.f32 %v2196_v50, %v2074_v62  ;;  %v5798_v62 = vld [vmem:[#allocation2 + $0x140] sm:$0xff]  ;;  %v1924_v50 = vadd.f32 %v5464_v29, %v5462_v60  ;;  %v5818_v29 = vld [vmem:[#allocation2 + $0x148] sm:$0xff] }
 0x276   : > { %v2050_v9 = vpop.f32.mrf.mxu3  ;;  %v5764_v16 = vpop.f32.mrf.mxu2  ;;  %v2573_v58 = vmax.f32 %v5500_v24, %v5818_v29 }
 0x277   : > { %v5760_v40 = vpop.f32.mrf.mxu1  ;;  %2243 = vst.msk [vmem:[%s5579_s12 + $0x48] sm:$0xff] %vm2233_vm3, %v2226_v25  ;;  %4260 = vmatmul.msk.f32.gmra.mxu0 %vm252_vm2, %v5363_v2  ;;  %v2076_v25 = vadd.f32 %v2050_v9, %v1924_v50  ;;  %v4368_v9 = vld [vmem:[%s6217_s4 + $0x68] sm:$0xff] }
 0x278   : > { %3647 = vmatpush.msrb.mxu2 %v4368_v9  ;;  %v2589_v9 = vmax.f32 %v2573_v58, %v5543_v42  ;;  %v5873_v58 = vld [vmem:[#allocation2 + $0xe0] sm:$0xff] }
 0x27a   : > { %4284 = vmatmul.msk.f32.gmra.mxu1 %vm252_vm2, %v5543_v42  ;;  %3648 = vmatpush.msrb.mxu2 %v4367_v59  ;;  %v5859_v59 = vld [vmem:[%s6218_s5] ss:$0 sm:$0xff] }
 0x27b   : > { %4243 = vmatmul.msk.f32.gmra.mxu3 %vm252_vm2, %v2586_v52  ;;  %4301 = vmatmul.msk.f32.gmra.mxu2 %vm252_vm2, %v5347_v7  ;;  %v2572_v52 = vmax.f32 %v5475_v6, %v5798_v62 }
 0x27c   : > { %v2199_v5 = vpop.f32.mrf.mxu0 }
 0x27d   : > { %v2227_v33 = vadd.f32 %v2199_v5, %v2075_v21  ;;  %v2588_v5 = vmax.f32 %v2572_v52, %v5522_v55 }
 0x27e   : > { %v2053_v63 = vpop.f32.mrf.mxu3  ;;  %v5794_v30 = vpop.f32.mrf.mxu2 }
 0x27f   : > { %v5790_v45 = vpop.f32.mrf.mxu1  ;;  %2244 = vst.msk [vmem:[%s5579_s12 + $0x50] sm:$0xff] %vm2233_vm3, %v2227_v33  ;;  %4261 = vmatmul.msk.f32.gmra.mxu0 %vm252_vm2, %v5379_v51  ;;  %v2077_v33 = vadd.f32 %v2053_v63, %v1925_v54  ;;  %v4327_v63 = vld [vmem:[%s6217_s4 + $0x48] sm:$0xff] }
 0x280   : > { %3346 = vmatpush.msrb.mxu0 %v4327_v63 }
 0x282   : > { %4285 = vmatmul.msk.f32.gmra.mxu1 %vm252_vm2, %v5798_v62 }
 0x283   : > { %4244 = vmatmul.msk.f32.gmra.mxu3 %vm252_vm2, %v2587_v12  ;;  %4302 = vmatmul.msk.f32.gmra.mxu2 %vm252_vm2, %v5363_v2 }
 0x284   : > { %v2202_v61 = vpop.f32.mrf.mxu0 }
 0x285   : > { %v2228_v8 = vadd.f32 %v2202_v61, %v2076_v25 }
 0x286   : > { %v2056_v21 = vpop.f32.mrf.mxu3  ;;  %v5814_v60 = vpop.f32.mrf.mxu2 }
 0x287   : > { %v5810_v27 = vpop.f32.mrf.mxu1  ;;  %2245 = vst.msk [vmem:[%s5579_s12 + $0x58] sm:$0xff] %vm2233_vm3, %v2228_v8  ;;  %4262 = vmatmul.msk.f32.gmra.mxu0 %vm252_vm2, %v5406_v14  ;;  %v1926_v8 = vadd.f32 %v5513_v17, %v5511_v47  ;;  %v2340_v17 = vadd.f32 %v5859_v59, %v5483_v46 }
 0x289   : > { %v2078_v54 = vadd.f32 %v2056_v21, %v1926_v8  ;;  %v1927_v21 = vadd.f32 %v5534_v39, %v5532_v23  ;;  %v2522_v8 = vadd.f32 %v5587_v15, %v2340_v17  ;;  %v5892_v15 = vld [vmem:[#allocation2 + $0xe8] sm:$0xff] }
 0x28a   : > { %4286 = vmatmul.msk.f32.gmra.mxu1 %vm252_vm2, %v5818_v29 }
 0x28b   : > { %4245 = vmatmul.msk.f32.gmra.mxu3 %vm252_vm2, %v2588_v5  ;;  %4303 = vmatmul.msk.f32.gmra.mxu2 %vm252_vm2, %v5379_v51 }
 0x28c   : > { %v2205_v50 = vpop.f32.mrf.mxu0 }
 0x28d   : > { %v2229_v12 = vadd.f32 %v2205_v50, %v2077_v33 }
 0x28e   : > { %v2059_v25 = vpop.f32.mrf.mxu3  ;;  %v5844_v61 = vpop.f32.mrf.mxu2 }
 0x28f   : > { %2246 = vst.msk [vmem:[%s5579_s12 + $0x60] sm:$0xff] %vm2233_vm3, %v2229_v12  ;;  %4263 = vmatmul.msk.f32.gmra.mxu0 %vm252_vm2, %v5426_v28  ;;  %v2895_v52 = vpop.f32.mrf.mxu1  ;;  %v2079_v12 = vadd.f32 %v2059_v25, %v1927_v21  ;;  %v2343_v25 = vadd.f32 %v5859_v59, %v5507_v1 }
 0x291   : > { %v2523_v21 = vadd.f32 %v5607_v26, %v2343_v25  ;;  %v4388_v26 = vld [vmem:[%s6217_s4 + $0xc8] sm:$0xff] }
 0x292   : > { %4351 = vmatmul.msk.f32.vlgmr.msrb.gmra.mxu1 %vm252_vm2, %v5347_v7  ;;  %3798 = vmatpush.msrb.mxu3 %v4388_v26  ;;  %v3262_v26 = vld [vmem:[#allocation2 + $0x98] sm:$0xff] }
 0x293   : > { %4246 = vmatmul.msk.f32.gmra.mxu3 %vm252_vm2, %v2589_v9  ;;  %4304 = vmatmul.msk.f32.gmra.mxu2 %vm252_vm2, %v5406_v14 }
 0x294   : > { %v2208_v5 = vpop.f32.mrf.mxu0 }
 0x295   : > { %v2230_v33 = vadd.f32 %v2208_v5, %v2078_v54  ;;  %v1928_v54 = vadd.f32 %v5555_v49, %v5553_v35 }
 0x296   : > { %v2062_v50 = vpop.f32.mrf.mxu3  ;;  %v5863_v47 = vpop.f32.mrf.mxu2 }
 0x297   : > { %2247 = vst.msk [vmem:[%s5579_s12 + $0x68] sm:$0xff] %vm2233_vm3, %v2230_v33  ;;  %4264 = vmatmul.msk.f32.gmra.mxu0 %vm252_vm2, %v5452_v10  ;;  %v2898_v18 = vpop.f32.mrf.mxu1  ;;  %v2080_v5 = vadd.f32 %v2062_v50, %v1928_v54  ;;  %v2346_v50 = vadd.f32 %v5859_v59, %v5529_v48  ;;  %v3261_v54 = vld [vmem:[#allocation2 + $0x90] sm:$0xff] }
 0x29a   : > { %4352 = vmatmul.msk.f32.gmra.mxu1 %vm252_vm2, %v5363_v2 }
 0x29b   : > { %4305 = vmatmul.msk.f32.gmra.mxu2 %vm252_vm2, %v5426_v28  ;;  %4311 = vmatmul.msk.f32.vlgmr.msra.gmra.mxu3 %vm252_vm2, %v5873_v58 }
 0x29c   : > { %v2211_v63 = vpop.f32.mrf.mxu0 }
 0x29d   : > { %v2231_v46 = vadd.f32 %v2211_v63, %v2079_v12  ;;  %v3563_v63 = vld [vmem:[#allocation2 + $0x80] sm:$0xff] }
 0x29e   : > { %v2661_v9 = vpop.f32.mrf.mxu3  ;;  %v5882_v23 = vpop.f32.mrf.mxu2 }
 0x29f   : > { %2248 = vst.msk [vmem:[%s5579_s12 + $0x70] sm:$0xff] %vm2233_vm3, %v2231_v46  ;;  %v2709_v39 = vadd.f32 %v2661_v9, %v2522_v8  ;;  %4265 = vmatmul.msk.f32.gmra.mxu0 %vm252_vm2, %v5475_v6  ;;  %v2901_v33 = vpop.f32.mrf.mxu1  ;;  %v2524_v46 = vadd.f32 %v5625_v57, %v2346_v50 }
 0x2a2   : > { %4353 = vmatmul.msk.f32.gmra.mxu1 %vm252_vm2, %v5379_v51 }
 0x2a3   : > { %4306 = vmatmul.msk.f32.gmra.mxu2 %vm252_vm2, %v5452_v10  ;;  %4312 = vmatmul.msk.f32.gmra.mxu3 %vm252_vm2, %v5892_v15 }
 0x2a4   : > { %v2214_v17 = vpop.f32.mrf.mxu0 }
 0x2a5   : > { %v2232_v1 = vadd.f32 %v2214_v17, %v2080_v5 }
 0x2a6   : > { %v2664_v12 = vpop.f32.mrf.mxu3  ;;  %v5901_v35 = vpop.f32.mrf.mxu2 }
 0x2a7   : > { %2249 = vst.msk [vmem:[%s5579_s12 + $0x78] sm:$0xff] %vm2233_vm3, %v2232_v1  ;;  %v2710_v49 = vadd.f32 %v2664_v12, %v2523_v21  ;;  %4266 = vmatmul.msk.f32.gmra.mxu0 %vm252_vm2, %v5500_v24  ;;  %v2904_v25 = vpop.f32.mrf.mxu1  ;;  %v2349_v1 = vadd.f32 %v5859_v59, %v5550_v37 }
 0x2aa   : > { %4354 = vmatmul.msk.f32.gmra.mxu1 %vm252_vm2, %v5406_v14 }
 0x2ab   : > { %4313 = vmatmul.msk.f32.gmra.mxu3 %vm252_vm2, %v5347_v7  ;;  %4371 = vmatmul.msk.f32.vlgmr.msrb.gmra.mxu2 %vm252_vm2, %v3563_v63  ;;  %v3564_v7 = vld [vmem:[#allocation2 + $0x88] sm:$0xff] }
 0x2ac   : > { %v2796_v8 = vpop.f32.mrf.mxu0 }
 0x2ad   : > { %v2844_v9 = vadd.f32 %v2796_v8, %v2709_v39 }
 0x2ae   : > { %v2667_v48 = vpop.f32.mrf.mxu3  ;;  %v3046_v21 = vpop.f32.mrf.mxu2 }
 0x2af   : > { %v2711_v5 = vadd.f32 %v2667_v48, %v2524_v46  ;;  %v2943_v17 = vadd.f32 %v2895_v52, %v2844_v9  ;;  %4331 = vmatmul.msk.f32.vlgmr.msrb.gmra.mxu0 %vm252_vm2, %v3261_v54  ;;  %v2525_v52 = vadd.f32 %v5643_v11, %v2349_v1  ;;  %v2907_v46 = vpop.f32.mrf.mxu1  ;;  %v6227_v9 = vld [vmem:[#allocation4_spill] sm:$0xff] }
 0x2b0   : > { %v2352_v48 = vadd.f32 %v5859_v59, %v6227_v9  ;;  %v2358_v9 = vadd.f32 %v5859_v59, %v5621_v44 }
 0x2b1   : > { %v5919_v12 = vadd.f32 %v3046_v21, %v2943_v17 }
 0x2b2   : > { %4355 = vmatmul.msk.f32.gmra.mxu1 %vm252_vm2, %v5426_v28  ;;  %v2526_v11 = vadd.f32 %v5661_v56, %v2352_v48 }
 0x2b3   : > { %4314 = vmatmul.msk.f32.gmra.mxu3 %vm252_vm2, %v5363_v2  ;;  %4372 = vmatmul.msk.f32.gmra.mxu2 %vm252_vm2, %v3564_v7 }
 0x2b4   : > { %v2799_v57 = vpop.f32.mrf.mxu0 }
 0x2b5   : > { %v2845_v39 = vadd.f32 %v2799_v57, %v2710_v49  ;;  %v6228_v57 = vld [vmem:[#allocation3_spill] sm:$0xff] }
 0x2b6   : > { %v2670_v50 = vpop.f32.mrf.mxu3  ;;  %v3049_v37 = vpop.f32.mrf.mxu2 }
 0x2b7   : > { %v2712_v63 = vadd.f32 %v2670_v50, %v2525_v52  ;;  %v2944_v8 = vadd.f32 %v2898_v18, %v2845_v39  ;;  %4332 = vmatmul.msk.f32.gmra.mxu0 %vm252_vm2, %v3262_v26  ;;  %v2355_v52 = vadd.f32 %v5859_v59, %v5603_v3  ;;  %v6229_v3 = vld [vmem:[#allocation5_spill] sm:$0xff] }
 0x2b9   : > { %v5930_v17 = vadd.f32 %v3049_v37, %v2944_v8 }
 0x2ba   : > { %4356 = vmatmul.msk.f32.gmra.mxu1 %vm252_vm2, %v5452_v10 }
 0x2bb   : > { %4315 = vmatmul.msk.f32.gmra.mxu3 %vm252_vm2, %v5379_v51  ;;  %4373 = vmatmul.msk.f32.gmra.mxu2 %vm252_vm2, %v3261_v54  ;;  %v2910_v51 = vpop.f32.mrf.mxu1 }
 0x2bc   : > { %v2802_v2 = vpop.f32.mrf.mxu0 }
 0x2bd   : > { %v2846_v18 = vadd.f32 %v2802_v2, %v2711_v5 }
 0x2be   : > { %v2673_v49 = vpop.f32.mrf.mxu3  ;;  %v3052_v7 = vpop.f32.mrf.mxu2 }
 0x2bf   : > { %v2713_v21 = vadd.f32 %v2673_v49, %v2526_v11  ;;  %v2945_v1 = vadd.f32 %v2901_v33, %v2846_v18  ;;  %4333 = vmatmul.msk.f32.gmra.mxu0 %vm252_vm2, %v6228_v57  ;;  %v2527_v33 = vadd.f32 %v5682_v53, %v2355_v52  ;;  %v2361_v18 = vadd.f32 %v5859_v59, %v5639_v31 }
 0x2c1   : > { %v5942_v39 = vadd.f32 %v3052_v7, %v2945_v1 }
 0x2c2   : > { %4357 = vmatmul.msk.f32.gmra.mxu1 %vm252_vm2, %v5475_v6 }
 0x2c3   : > { %4316 = vmatmul.msk.f32.gmra.mxu3 %vm252_vm2, %v5406_v14  ;;  %4374 = vmatmul.msk.f32.gmra.mxu2 %vm252_vm2, %v3262_v26  ;;  %v2913_v14 = vpop.f32.mrf.mxu1 }
 0x2c4   : > { %v2805_v56 = vpop.f32.mrf.mxu0 }
 0x2c5   : > { %v2847_v54 = vadd.f32 %v2805_v56, %v2712_v63  ;;  %v2364_v56 = vadd.f32 %v5859_v59, %v5657_v13 }
 0x2c6   : > { %v2676_v5 = vpop.f32.mrf.mxu3  ;;  %v3055_v37 = vpop.f32.mrf.mxu2 }
 0x2c7   : > { %v2714_v50 = vadd.f32 %v2676_v5, %v2527_v33  ;;  %v2946_v8 = vadd.f32 %v2904_v25, %v2847_v54  ;;  %4334 = vmatmul.msk.f32.gmra.mxu0 %vm252_vm2, %v6229_v3  ;;  %v2528_v25 = vadd.f32 %v5700_v43, %v2358_v9 }
 0x2c9   : > { %v5954_v48 = vadd.f32 %v3055_v37, %v2946_v8  ;;  %v2367_v37 = vadd.f32 %v5859_v59, %v5678_v41  ;;  %v2370_v41 = vadd.f32 %v5859_v59, %v5696_v22 }
 0x2ca   : > { %4358 = vmatmul.msk.f32.gmra.mxu1 %vm252_vm2, %v5500_v24 }
 0x2cb   : > { %4317 = vmatmul.msk.f32.gmra.mxu3 %vm252_vm2, %v5426_v28  ;;  %4375 = vmatmul.msk.f32.gmra.mxu2 %vm252_vm2, %v6228_v57  ;;  %v4387_v28 = vld [vmem:[%s6217_s4 + $0xc0] sm:$0xff] }
 0x2cc   : > { %v2808_v53 = vpop.f32.mrf.mxu0  ;;  %3799 = vmatpush.msrb.mxu3 %v4387_v28  ;;  %v6019_v28 = vld [vmem:[#allocation2 + $0x150] sm:$0xff] }
 0x2cd   : > { %v2848_v26 = vadd.f32 %v2808_v53, %v2713_v21  ;;  %v2916_v21 = vpop.f32.mrf.mxu1 }
 0x2ce   : > { %v2679_v63 = vpop.f32.mrf.mxu3  ;;  %v3058_v44 = vpop.f32.mrf.mxu2 }
 0x2cf   : > { %v2715_v2 = vadd.f32 %v2679_v63, %v2528_v25  ;;  %v2947_v11 = vadd.f32 %v2907_v46, %v2848_v26  ;;  %4335 = vmatmul.msk.f32.gmra.mxu0 %vm252_vm2, %v5498_v34  ;;  %v2529_v46 = vadd.f32 %v5718_v0, %v2361_v18  ;;  %v2530_v0 = vadd.f32 %v5743_v36, %v2364_v56 }
 0x2d1   : > { %v5967_v49 = vadd.f32 %v3058_v44, %v2947_v11  ;;  %v3269_v11 = vld [vmem:[#allocation2 + $0xd0] sm:$0xff] }
 0x2d2   : > { %4359 = vmatmul.msk.f32.gmra.mxu1 %vm252_vm2, %v5522_v55 }
 0x2d3   : > { %4318 = vmatmul.msk.f32.gmra.mxu3 %vm252_vm2, %v5452_v10  ;;  %4376 = vmatmul.msk.f32.gmra.mxu2 %vm252_vm2, %v6229_v3 }
 0x2d4   : > { %v2811_v43 = vpop.f32.mrf.mxu0 }
 0x2d5   : > { %v2849_v31 = vadd.f32 %v2811_v43, %v2714_v50  ;;  %v2919_v13 = vpop.f32.mrf.mxu1  ;;  %v2373_v43 = vadd.f32 %v5859_v59, %v5714_v4 }
 0x2d6   : > { %v2682_v1 = vpop.f32.mrf.mxu3  ;;  %v3061_v52 = vpop.f32.mrf.mxu2 }
 0x2d7   : > { %v2716_v7 = vadd.f32 %v2682_v1, %v2529_v46  ;;  %v2948_v57 = vadd.f32 %v2910_v51, %v2849_v31  ;;  %4336 = vmatmul.msk.f32.gmra.mxu0 %vm252_vm2, %v5520_v19  ;;  %v2533_v46 = vadd.f32 %v5814_v60, %v2373_v43  ;;  %v3270_v1 = vld [vmem:[#allocation2 + $0xd8] sm:$0xff] }
 0x2d9   : > { %v5983_v33 = vadd.f32 %v3061_v52, %v2948_v57  ;;  %v6033_v52 = vld [vmem:[#allocation2 + $0x158] sm:$0xff] }
 0x2da   : > { %4360 = vmatmul.msk.f32.gmra.mxu1 %vm252_vm2, %v5543_v42 }
 0x2db   : > { %4319 = vmatmul.msk.f32.gmra.mxu3 %vm252_vm2, %v5475_v6  ;;  %4377 = vmatmul.msk.f32.gmra.mxu2 %vm252_vm2, %v5498_v34  ;;  %v2531_v34 = vadd.f32 %v5764_v16, %v2367_v37  ;;  %v2532_v16 = vadd.f32 %v5794_v30, %v2370_v41  ;;  %v6065_v41 = vld [vmem:[#allocation2 + $0x168] sm:$0xff] }
 0x2dc   : > { %v2814_v10 = vpop.f32.mrf.mxu0 }
 0x2dd   : > { %v2850_v51 = vadd.f32 %v2814_v10, %v2715_v2 }
 0x2de   : > { %v2685_v54 = vpop.f32.mrf.mxu3  ;;  %v3064_v8 = vpop.f32.mrf.mxu2 }
 0x2df   : > { %v2717_v5 = vadd.f32 %v2685_v54, %v2530_v0  ;;  %v2949_v50 = vadd.f32 %v2913_v14, %v2850_v51  ;;  %4337 = vmatmul.msk.f32.gmra.mxu0 %vm252_vm2, %v5541_v38 }
 0x2e1   : > { %v5996_v3 = vadd.f32 %v3064_v8, %v2949_v50 }
 0x2e2   : > { %4361 = vmatmul.msk.f32.gmra.mxu1 %vm252_vm2, %v5798_v62 }
 0x2e3   : > { %4320 = vmatmul.msk.f32.gmra.mxu3 %vm252_vm2, %v5500_v24  ;;  %4378 = vmatmul.msk.f32.gmra.mxu2 %vm252_vm2, %v5520_v19  ;;  %v2922_v24 = vpop.f32.mrf.mxu1 }
 0x2e4   : > { %v2817_v6 = vpop.f32.mrf.mxu0 }
 0x2e5   : > { %v2851_v36 = vadd.f32 %v2817_v6, %v2716_v7 }
 0x2e6   : > { %v2688_v9 = vpop.f32.mrf.mxu3  ;;  %v3067_v25 = vpop.f32.mrf.mxu2 }
 0x2e7   : > { %v2718_v14 = vadd.f32 %v2688_v9, %v2531_v34  ;;  %v2950_v53 = vadd.f32 %v2916_v21, %v2851_v36  ;;  %4338 = vmatmul.msk.f32.gmra.mxu0 %vm252_vm2, %v5567_v32 }
 0x2e9   : > { %v6009_v26 = vadd.f32 %v3067_v25, %v2950_v53  ;;  %v2382_v53 = vadd.f32 %v5859_v59, %v5790_v45 }
 0x2ea   : > { %4362 = vmatmul.msk.f32.gmra.mxu1 %vm252_vm2, %v5818_v29 }
 0x2eb   : > { %4321 = vmatmul.msk.f32.gmra.mxu3 %vm252_vm2, %v5522_v55  ;;  %4379 = vmatmul.msk.f32.gmra.mxu2 %vm252_vm2, %v5541_v38  ;;  %v2925_v38 = vpop.f32.mrf.mxu1 }
 0x2ec   : > { %v2820_v19 = vpop.f32.mrf.mxu0 }
 0x2ed   : > { %v2852_v63 = vadd.f32 %v2820_v19, %v2717_v5 }
 0x2ee   : > { %v2691_v2 = vpop.f32.mrf.mxu3  ;;  %v3070_v18 = vpop.f32.mrf.mxu2 }
 0x2ef   : > { %v2719_v44 = vadd.f32 %v2691_v2, %v2532_v16  ;;  %v2951_v22 = vadd.f32 %v2919_v13, %v2852_v63  ;;  %4339 = vmatmul.msk.f32.gmra.mxu0 %vm252_vm2, %v3269_v11  ;;  %v6051_v13 = vld [vmem:[#allocation2 + $0x160] sm:$0xff]  ;;  %v3273_v63 = vld [vmem:[#allocation2 + $0xf0] sm:$0xff] }
 0x2f1   : > { %v6023_v55 = vadd.f32 %v3070_v18, %v2951_v22 }
 0x2f2   : > { %4363 = vmatmul.msk.f32.gmra.mxu1 %vm252_vm2, %v6019_v28 }
 0x2f3   : > { %4322 = vmatmul.msk.f32.gmra.mxu3 %vm252_vm2, %v5543_v42  ;;  %4380 = vmatmul.msk.f32.gmra.mxu2 %vm252_vm2, %v5567_v32  ;;  %v2376_v42 = vadd.f32 %v5859_v59, %v5736_v20  ;;  %v2928_v0 = vpop.f32.mrf.mxu1  ;;  %v2379_v20 = vadd.f32 %v5859_v59, %v5760_v40 }
 0x2f4   : > { %v2823_v30 = vpop.f32.mrf.mxu0 }
 0x2f5   : > { %v2853_v31 = vadd.f32 %v2823_v30, %v2718_v14  ;;  %v2534_v60 = vadd.f32 %v5844_v61, %v2376_v42  ;;  %v2535_v37 = vadd.f32 %v5863_v47, %v2379_v20  ;;  %v3274_v30 = vld [vmem:[#allocation2 + $0xf8] sm:$0xff] }
 0x2f6   : > { %v2694_v21 = vpop.f32.mrf.mxu3  ;;  %v3073_v57 = vpop.f32.mrf.mxu2 }
 0x2f7   : > { %v2720_v7 = vadd.f32 %v2694_v21, %v2533_v46  ;;  %v2952_v4 = vadd.f32 %v2922_v24, %v2853_v31  ;;  %4340 = vmatmul.msk.f32.gmra.mxu0 %vm252_vm2, %v3270_v1  ;;  %v2536_v24 = vadd.f32 %v5882_v23, %v2382_v53  ;;  %v3719_v53 = vld [vmem:[#allocation2 + $0x128] sm:$0xff] }
 0x2f9   : > { %v6037_v56 = vadd.f32 %v3073_v57, %v2952_v4 }
 0x2fa   : > { %4364 = vmatmul.msk.f32.gmra.mxu1 %vm252_vm2, %v6033_v52 }
 0x2fb   : > { %4323 = vmatmul.msk.f32.gmra.mxu3 %vm252_vm2, %v5798_v62  ;;  %4381 = vmatmul.msk.f32.gmra.mxu2 %vm252_vm2, %v3269_v11  ;;  %v2931_v14 = vpop.f32.mrf.mxu1 }
 0x2fc   : > { %v2826_v32 = vpop.f32.mrf.mxu0 }
 0x2fd   : > { %v2854_v10 = vadd.f32 %v2826_v32, %v2719_v44  ;;  %v2385_v44 = vadd.f32 %v5859_v59, %v5810_v27  ;;  %v3714_v59 = vld [vmem:[#allocation2 + $0x100] sm:$0xff] }
 0x2fe   : > { %v2697_v51 = vpop.f32.mrf.mxu3  ;;  %v3076_v50 = vpop.f32.mrf.mxu2 }
 0x2ff   : > { %v2721_v54 = vadd.f32 %v2697_v51, %v2534_v60  ;;  %v2953_v5 = vadd.f32 %v2925_v38, %v2854_v10  ;;  %4341 = vmatmul.msk.f32.gmra.mxu0 %vm252_vm2, %v5873_v58  ;;  %v2537_v23 = vadd.f32 %v5901_v35, %v2385_v44  ;;  %v3715_v60 = vld [vmem:[#allocation2 + $0x108] sm:$0xff] }
 0x301   : > { %v6049_v8 = vadd.f32 %v3076_v50, %v2953_v5 }
 0x302   : > { %4365 = vmatmul.msk.f32.gmra.mxu1 %vm252_vm2, %v6051_v13 }
 0x303   : > { %4324 = vmatmul.msk.f32.gmra.mxu3 %vm252_vm2, %v5818_v29  ;;  %4382 = vmatmul.msk.f32.gmra.mxu2 %vm252_vm2, %v3270_v1  ;;  %v2934_v18 = vpop.f32.mrf.mxu1 }
 0x304   : > { %v2829_v61 = vpop.f32.mrf.mxu0 }
 0x305   : > { %v2855_v6 = vadd.f32 %v2829_v61, %v2720_v7  ;;  %v3716_v61 = vld [vmem:[#allocation2 + $0x110] sm:$0xff] }
 0x306   : > { %v2700_v34 = vpop.f32.mrf.mxu3  ;;  %v3079_v40 = vpop.f32.mrf.mxu2 }
 0x307   : > { %v2722_v36 = vadd.f32 %v2700_v34, %v2535_v37  ;;  %v2954_v9 = vadd.f32 %v2928_v0, %v2855_v6  ;;  %4342 = vmatmul.msk.f32.gmra.mxu0 %vm252_vm2, %v5892_v15  ;;  %v3717_v34 = vld [vmem:[#allocation2 + $0x118] sm:$0xff] }
 0x309   : > { %v6063_v25 = vadd.f32 %v3079_v40, %v2954_v9 }
 0x30a   : > { %4366 = vmatmul.msk.f32.gmra.mxu1 %vm252_vm2, %v6065_v41 }
 0x30b   : > { %4325 = vmatmul.msk.f32.gmra.mxu3 %vm252_vm2, %v6019_v28  ;;  %4383 = vmatmul.msk.f32.gmra.mxu2 %vm252_vm2, %v5873_v58  ;;  %v2937_v1 = vpop.f32.mrf.mxu1 }
 0x30c   : > { %v2832_v47 = vpop.f32.mrf.mxu0 }
 0x30d   : > { %v2856_v19 = vadd.f32 %v2832_v47, %v2721_v54 }
 0x30e   : > { %v2703_v16 = vpop.f32.mrf.mxu3  ;;  %v3082_v11 = vpop.f32.mrf.mxu2 }
 0x30f   : > { %v2723_v45 = vadd.f32 %v2703_v16, %v2536_v24  ;;  %v2955_v2 = vadd.f32 %v2931_v14, %v2856_v19  ;;  %4343 = vmatmul.msk.f32.gmra.mxu0 %vm252_vm2, %v3273_v63  ;;  %v3720_v24 = vld [vmem:[#allocation2 + $0x130] sm:$0xff]  ;;  %v3721_v16 = vld [vmem:[#allocation2 + $0x138] sm:$0xff] }
 0x311   : > { %v6077_v22 = vadd.f32 %v3082_v11, %v2955_v2 }
 0x313   : > { %4326 = vmatmul.msk.f32.gmra.mxu3 %vm252_vm2, %v6033_v52  ;;  %4384 = vmatmul.msk.f32.gmra.mxu2 %vm252_vm2, %v5892_v15  ;;  %v2940_v51 = vpop.f32.mrf.mxu1 }
 0x314   : > { %v2835_v58 = vpop.f32.mrf.mxu0 }
 0x315   : > { %v2857_v43 = vadd.f32 %v2835_v58, %v2722_v36 }
 0x316   : > { %v2706_v38 = vpop.f32.mrf.mxu3  ;;  %v3085_v21 = vpop.f32.mrf.mxu2 }
 0x317   : > { %v2724_v46 = vadd.f32 %v2706_v38, %v2537_v23  ;;  %v2956_v31 = vadd.f32 %v2934_v18, %v2857_v43  ;;  %4344 = vmatmul.msk.f32.gmra.mxu0 %vm252_vm2, %v3274_v30  ;;  %v3728_v38 = vld [vmem:[#allocation2 + $0x170] sm:$0xff] }
 0x319   : > { %v6085_v27 = vadd.f32 %v3085_v21, %v2956_v31 }
 0x31b   : > { %4385 = vmatmul.msk.f32.gmra.mxu2 %vm252_vm2, %v3273_v63  ;;  %4391 = vmatmul.msk.f32.vlgmr.msrb.gmra.mxu3 %vm252_vm2, %v3714_v59 }
 0x31c   : > { %v2838_v15 = vpop.f32.mrf.mxu0 }
 0x31d   : > { %v2858_v7 = vadd.f32 %v2838_v15, %v2723_v45 }
 0x31e   : > { %v3197_v4 = vpop.f32.mrf.mxu3  ;;  %v3088_v57 = vpop.f32.mrf.mxu2 }
 0x31f   : > { %v2957_v35 = vadd.f32 %v2937_v1, %v2858_v7  ;;  %v6090_v42 = vadd.f32 %v3197_v4, %v5919_v12  ;;  %4345 = vmatmul.msk.f32.gmra.mxu0 %vm252_vm2, %v3714_v59 }
 0x321   : > { %v6093_v32 = vadd.f32 %v3088_v57, %v2957_v35 }
 0x323   : > { %4386 = vmatmul.msk.f32.gmra.mxu2 %vm252_vm2, %v3274_v30  ;;  %4392 = vmatmul.msk.f32.gmra.mxu3 %vm252_vm2, %v3715_v60 }
 0x324   : > { %v2841_v10 = vpop.f32.mrf.mxu0 }
 0x325   : > { %v2859_v0 = vadd.f32 %v2841_v10, %v2724_v46 }
 0x326   : > { %v3200_v54 = vpop.f32.mrf.mxu3  ;;  %v3091_v12 = vpop.f32.mrf.mxu2 }
 0x327   : > { %v2958_v5 = vadd.f32 %v2940_v51, %v2859_v0  ;;  %v6098_v50 = vadd.f32 %v3200_v54, %v5930_v17  ;;  %4346 = vmatmul.msk.f32.gmra.mxu0 %vm252_vm2, %v3715_v60  ;;  %v3718_v17 = vld [vmem:[#allocation2 + $0x120] sm:$0xff] }
 0x329   : > { %v3109_v20 = vadd.f32 %v3091_v12, %v2958_v5 }
 0x32b   : > { %4393 = vmatmul.msk.f32.gmra.mxu3 %vm252_vm2, %v3716_v61 }
 0x32e   : > { %v3203_v37 = vpop.f32.mrf.mxu3 }
 0x32f   : > { %v6103_v6 = vadd.f32 %v3203_v37, %v5942_v39 }
 0x333   : > { %4394 = vmatmul.msk.f32.gmra.mxu3 %vm252_vm2, %v3717_v34 }
 0x336   : > { %v3206_v36 = vpop.f32.mrf.mxu3 }
 0x337   : > { %v6107_v9 = vadd.f32 %v3206_v36, %v5954_v48 }
 0x33b   : > { %4395 = vmatmul.msk.f32.gmra.mxu3 %vm252_vm2, %v3718_v17 }
 0x33e   : > { %v3209_v40 = vpop.f32.mrf.mxu3 }
 0x33f   : > { %v6111_v14 = vadd.f32 %v3209_v40, %v5967_v49 }
 0x343   : > { %4396 = vmatmul.msk.f32.gmra.mxu3 %vm252_vm2, %v3719_v53 }
 0x346   : > { %v3212_v47 = vpop.f32.mrf.mxu3 }
 0x347   : > { %v6115_v39 = vadd.f32 %v3212_v47, %v5983_v33 }
 0x34b   : > { %4397 = vmatmul.msk.f32.gmra.mxu3 %vm252_vm2, %v3720_v24 }
 0x34e   : > { %v3215_v19 = vpop.f32.mrf.mxu3 }
 0x34f   : > { %v6119_v48 = vadd.f32 %v3215_v19, %v5996_v3 }
 0x353   : > { %4398 = vmatmul.msk.f32.gmra.mxu3 %vm252_vm2, %v3721_v16 }
 0x356   : > { %v3218_v63 = vpop.f32.mrf.mxu3 }
 0x357   : > { %v6123_v49 = vadd.f32 %v3218_v63, %v6009_v26 }
 0x35b   : > { %4399 = vmatmul.msk.f32.gmra.mxu3 %vm252_vm2, %v5798_v62  ;;  %v3348_v62 = vpop.f32.mrf.mxu0 }
 0x35e   : > { %v3221_v45 = vpop.f32.mrf.mxu3 }
 0x35f   : > { %v6128_v33 = vadd.f32 %v3221_v45, %v6023_v55 }
 0x363   : > { %4400 = vmatmul.msk.f32.gmra.mxu3 %vm252_vm2, %v5818_v29  ;;  %v3499_v29 = vpop.f32.mrf.mxu1  ;;  %v3351_v18 = vpop.f32.mrf.mxu0 }
 0x364   : > { %v3397_v57 = vadd.f32 %v3351_v18, %v6098_v50 }
 0x366   : > { %v3224_v2 = vpop.f32.mrf.mxu3 }
 0x367   : > { %v6133_v3 = vadd.f32 %v3224_v2, %v6037_v56  ;;  %v3650_v56 = vpop.f32.mrf.mxu2 }
 0x36b   : > { %4401 = vmatmul.msk.f32.gmra.mxu3 %vm252_vm2, %v6019_v28 }
 0x36e   : > { %v3227_v11 = vpop.f32.mrf.mxu3 }
 0x36f   : > { %v6138_v26 = vadd.f32 %v3227_v11, %v6049_v8  ;;  %v3502_v8 = vpop.f32.mrf.mxu1  ;;  %v3653_v23 = vpop.f32.mrf.mxu2 }
 0x370   : > { %v3548_v10 = vadd.f32 %v3502_v8, %v3397_v57 }
 0x372   : > { %v3699_v51 = vadd.f32 %v3653_v23, %v3548_v10 }
 0x373   : > { %4402 = vmatmul.msk.f32.gmra.mxu3 %vm252_vm2, %v6033_v52 }
 0x376   : > { %v3230_v55 = vpop.f32.mrf.mxu3 }
 0x377   : > { %v6143_v44 = vadd.f32 %v3230_v55, %v6063_v25  ;;  %v3354_v25 = vpop.f32.mrf.mxu0  ;;  %v3656_v31 = vpop.f32.mrf.mxu2 }
 0x37b   : > { %4403 = vmatmul.msk.f32.gmra.mxu3 %vm252_vm2, %v6051_v13  ;;  %v3505_v13 = vpop.f32.mrf.mxu1 }
 0x37e   : > { %v3233_v58 = vpop.f32.mrf.mxu3 }
 0x37f   : > { %v6148_v28 = vadd.f32 %v3233_v58, %v6077_v22  ;;  %v3729_v22 = vld [vmem:[#allocation2 + $0x178] sm:$0xff]  ;;  %v3357_v21 = vpop.f32.mrf.mxu0  ;;  %v3659_v7 = vpop.f32.mrf.mxu2 }
 0x380   : > { %v3399_v34 = vadd.f32 %v3357_v21, %v6107_v9 }
 0x383   : > { %4404 = vmatmul.msk.f32.gmra.mxu3 %vm252_vm2, %v6065_v41  ;;  %v3396_v41 = vadd.f32 %v3348_v62, %v6090_v42  ;;  %v3508_v1 = vpop.f32.mrf.mxu1  ;;  %v3398_v42 = vadd.f32 %v3354_v25, %v6103_v6 }
 0x384   : > { %v3550_v47 = vadd.f32 %v3508_v1, %v3399_v34 }
 0x385   : > { %v3547_v15 = vadd.f32 %v3499_v29, %v3396_v41  ;;  %v3549_v61 = vadd.f32 %v3505_v13, %v3398_v42 }
 0x386   : > { %v3236_v52 = vpop.f32.mrf.mxu3  ;;  %v3701_v6 = vadd.f32 %v3659_v7, %v3550_v47 }
 0x387   : > { %v6153_v43 = vadd.f32 %v3236_v52, %v6085_v27  ;;  %v3360_v4 = vpop.f32.mrf.mxu0  ;;  %v3698_v35 = vadd.f32 %v3650_v56, %v3547_v15  ;;  %v3662_v54 = vpop.f32.mrf.mxu2  ;;  %v3700_v50 = vadd.f32 %v3656_v31, %v3549_v61 }
 0x388   : > { %v3400_v24 = vadd.f32 %v3360_v4, %v6111_v14 }
 0x38b   : > { %4405 = vmatmul.msk.f32.gmra.mxu3 %vm252_vm2, %v3728_v38  ;;  %v3511_v0 = vpop.f32.mrf.mxu1 }
 0x38c   : > { %v3551_v45 = vadd.f32 %v3511_v0, %v3400_v24 }
 0x38e   : > { %v3239_v30 = vpop.f32.mrf.mxu3  ;;  %v3702_v11 = vadd.f32 %v3662_v54, %v3551_v45 }
 0x38f   : > { %v6157_v46 = vadd.f32 %v3239_v30, %v6093_v32  ;;  %v3363_v5 = vpop.f32.mrf.mxu0  ;;  %v3665_v17 = vpop.f32.mrf.mxu2 }
 0x390   : > { %v3401_v62 = vadd.f32 %v3363_v5, %v6115_v39 }
 0x393   : > { %4406 = vmatmul.msk.f32.gmra.mxu3 %vm252_vm2, %v3729_v22  ;;  %v3514_v37 = vpop.f32.mrf.mxu1 }
 0x394   : > { %v3552_v18 = vadd.f32 %v3514_v37, %v3401_v62 }
 0x396   : > { %v3242_v59 = vpop.f32.mrf.mxu3  ;;  %v3703_v8 = vadd.f32 %v3665_v17, %v3552_v18 }
 0x397   : > { %v6161_v27 = vadd.f32 %v3242_v59, %v3109_v20  ;;  %v3366_v53 = vpop.f32.mrf.mxu0  ;;  %v3668_v2 = vpop.f32.mrf.mxu2 }
 0x398   : > { %v3402_v52 = vadd.f32 %v3366_v53, %v6119_v48 }
 0x39b   : > { %v3517_v19 = vpop.f32.mrf.mxu1 }
 0x39c   : > { %v3553_v38 = vadd.f32 %v3517_v19, %v3402_v52 }
 0x39e   : > { %v3801_v32 = vpop.f32.mrf.mxu3  ;;  %v3704_v30 = vadd.f32 %v3668_v2, %v3553_v38 }
 0x39f   : > { %v3849_v60 = vadd.f32 %v3801_v32, %v3698_v35  ;;  %v3369_v9 = vpop.f32.mrf.mxu0  ;;  %v3671_v58 = vpop.f32.mrf.mxu2 }
 0x3a0   : > { %v3403_v39 = vadd.f32 %v3369_v9, %v6123_v49 }
 0x3a1   : > { %3865 = vst.msk [vmem:[%s5579_s12 + $0x80] sm:$0xff] %vm2233_vm3, %v3849_v60 }
 0x3a3   : > { %v3520_v56 = vpop.f32.mrf.mxu1 }
 0x3a4   : > { %v3554_v59 = vadd.f32 %v3520_v56, %v3403_v39 }
 0x3a6   : > { %v3804_v12 = vpop.f32.mrf.mxu3  ;;  %v3705_v48 = vadd.f32 %v3671_v58, %v3554_v59 }
 0x3a7   : > { %v3850_v20 = vadd.f32 %v3804_v12, %v3699_v51  ;;  %v3372_v14 = vpop.f32.mrf.mxu0  ;;  %v3674_v22 = vpop.f32.mrf.mxu2 }
 0x3a8   : > { %v3404_v15 = vadd.f32 %v3372_v14, %v6128_v33 }
 0x3a9   : > { %3866 = vst.msk [vmem:[%s5579_s12 + $0x88] sm:$0xff] %vm2233_vm3, %v3850_v20 }
 0x3ab   : > { %v3523_v13 = vpop.f32.mrf.mxu1 }
 0x3ac   : > { %v3555_v32 = vadd.f32 %v3523_v13, %v3404_v15 }
 0x3ae   : > { %v3807_v36 = vpop.f32.mrf.mxu3  ;;  %v3706_v60 = vadd.f32 %v3674_v22, %v3555_v32 }
 0x3af   : > { %v3851_v40 = vadd.f32 %v3807_v36, %v3700_v50  ;;  %v3375_v31 = vpop.f32.mrf.mxu0  ;;  %v3677_v4 = vpop.f32.mrf.mxu2 }
 0x3b0   : > { %v3405_v10 = vadd.f32 %v3375_v31, %v6133_v3 }
 0x3b1   : > { %3867 = vst.msk [vmem:[%s5579_s12 + $0x90] sm:$0xff] %vm2233_vm3, %v3851_v40 }
 0x3b3   : > { %v3526_v1 = vpop.f32.mrf.mxu1 }
 0x3b4   : > { %v3556_v42 = vadd.f32 %v3526_v1, %v3405_v10 }
 0x3b6   : > { %v3810_v16 = vpop.f32.mrf.mxu3  ;;  %v3707_v33 = vadd.f32 %v3677_v4, %v3556_v42 }
 0x3b7   : > { %v3852_v63 = vadd.f32 %v3810_v16, %v3701_v6  ;;  %v3378_v57 = vpop.f32.mrf.mxu0  ;;  %v3680_v54 = vpop.f32.mrf.mxu2 }
 0x3b8   : > { %v3406_v12 = vadd.f32 %v3378_v57, %v6138_v26 }
 0x3b9   : > { %3868 = vst.msk [vmem:[%s5579_s12 + $0x98] sm:$0xff] %vm2233_vm3, %v3852_v63 }
 0x3bb   : > { %v3529_v49 = vpop.f32.mrf.mxu1 }
 0x3bc   : > { %v3557_v50 = vadd.f32 %v3529_v49, %v3406_v12 }
 0x3be   : > { %v3813_v55 = vpop.f32.mrf.mxu3  ;;  %v3708_v36 = vadd.f32 %v3680_v54, %v3557_v50 }
 0x3bf   : > { %v3853_v29 = vadd.f32 %v3813_v55, %v3702_v11  ;;  %v3381_v5 = vpop.f32.mrf.mxu0  ;;  %v3683_v34 = vpop.f32.mrf.mxu2 }
 0x3c0   : > { %v3407_v17 = vadd.f32 %v3381_v5, %v6143_v44 }
 0x3c1   : > { %3869 = vst.msk [vmem:[%s5579_s12 + $0xa0] sm:$0xff] %vm2233_vm3, %v3853_v29 }
 0x3c3   : > { %v3532_v20 = vpop.f32.mrf.mxu1 }
 0x3c4   : > { %v3558_v6 = vadd.f32 %v3532_v20, %v3407_v17 }
 0x3c6   : > { %v3816_v23 = vpop.f32.mrf.mxu3  ;;  %v3709_v24 = vadd.f32 %v3683_v34, %v3558_v6 }
 0x3c7   : > { %v3854_v25 = vadd.f32 %v3816_v23, %v3703_v8  ;;  %v3384_v3 = vpop.f32.mrf.mxu0  ;;  %v3686_v19 = vpop.f32.mrf.mxu2 }
 0x3c8   : > { %v3408_v26 = vadd.f32 %v3384_v3, %v6148_v28 }
 0x3c9   : > { %3870 = vst.msk [vmem:[%s5579_s12 + $0xa8] sm:$0xff] %vm2233_vm3, %v3854_v25 }
 0x3cb   : > { %v3535_v47 = vpop.f32.mrf.mxu1 }
 0x3cc   : > { %v3559_v2 = vadd.f32 %v3535_v47, %v3408_v26 }
 0x3ce   : > { %v3819_v21 = vpop.f32.mrf.mxu3  ;;  %v3710_v44 = vadd.f32 %v3686_v19, %v3559_v2 }
 0x3cf   : > { %v3855_v41 = vadd.f32 %v3819_v21, %v3704_v30  ;;  %v3387_v16 = vpop.f32.mrf.mxu0  ;;  %v3689_v29 = vpop.f32.mrf.mxu2 }
 0x3d0   : > { %v3409_v11 = vadd.f32 %v3387_v16, %v6153_v43 }
 0x3d1   : > { %3871 = vst.msk [vmem:[%s5579_s12 + $0xb0] sm:$0xff] %vm2233_vm3, %v3855_v41 }
 0x3d3   : > { %v3538_v9 = vpop.f32.mrf.mxu1 }
 0x3d4   : > { %v3560_v18 = vadd.f32 %v3538_v9, %v3409_v11 }
 0x3d6   : > { %v3822_v7 = vpop.f32.mrf.mxu3  ;;  %v3711_v58 = vadd.f32 %v3689_v29, %v3560_v18 }
 0x3d7   : > { %v3856_v35 = vadd.f32 %v3822_v7, %v3705_v48  ;;  %v3390_v56 = vpop.f32.mrf.mxu0  ;;  %v3692_v25 = vpop.f32.mrf.mxu2 }
 0x3d8   : > { %v3410_v14 = vadd.f32 %v3390_v56, %v6157_v46 }
 0x3d9   : > { %3872 = vst.msk [vmem:[%s5579_s12 + $0xb8] sm:$0xff] %vm2233_vm3, %v3856_v35 }
 0x3db   : > { %v3541_v28 = vpop.f32.mrf.mxu1 }
 0x3dc   : > { %v3561_v23 = vadd.f32 %v3541_v28, %v3410_v14 }
 0x3de   : > { %v3825_v0 = vpop.f32.mrf.mxu3  ;;  %v3712_v38 = vadd.f32 %v3692_v25, %v3561_v23 }
 0x3df   : > { %v3857_v51 = vadd.f32 %v3825_v0, %v3706_v60  ;;  %v3393_v43 = vpop.f32.mrf.mxu0  ;;  %v3695_v21 = vpop.f32.mrf.mxu2 }
 0x3e0   : > { %v3411_v13 = vadd.f32 %v3393_v43, %v6161_v27 }
 0x3e1   : > { %3873 = vst.msk [vmem:[%s5579_s12 + $0xc0] sm:$0xff] %vm2233_vm3, %v3857_v51 }
 0x3e3   : > { %v3544_v30 = vpop.f32.mrf.mxu1 }
 0x3e4   : > { %v3562_v31 = vadd.f32 %v3544_v30, %v3411_v13 }
 0x3e6   : > { %v3828_v61 = vpop.f32.mrf.mxu3  ;;  %v3713_v41 = vadd.f32 %v3695_v21, %v3562_v31 }
 0x3e7   : > { %v3858_v37 = vadd.f32 %v3828_v61, %v3707_v33 }
 0x3e9   : > { %3874 = vst.msk [vmem:[%s5579_s12 + $0xc8] sm:$0xff] %vm2233_vm3, %v3858_v37 }
 0x3ee   : > { %v3831_v40 = vpop.f32.mrf.mxu3 }
 0x3ef   : > { %v3859_v53 = vadd.f32 %v3831_v40, %v3708_v36 }
 0x3f1   : > { %3875 = vst.msk [vmem:[%s5579_s12 + $0xd0] sm:$0xff] %vm2233_vm3, %v3859_v53 }
 0x3f6   : > { %v3834_v63 = vpop.f32.mrf.mxu3 }
 0x3f7   : > { %v3860_v45 = vadd.f32 %v3834_v63, %v3709_v24 }
 0x3f9   : > { %3876 = vst.msk [vmem:[%s5579_s12 + $0xd8] sm:$0xff] %vm2233_vm3, %v3860_v45 }
 0x3fe   : > { %v3837_v62 = vpop.f32.mrf.mxu3 }
 0x3ff   : > { %v3861_v55 = vadd.f32 %v3837_v62, %v3710_v44 }
 0x401   : > { %3877 = vst.msk [vmem:[%s5579_s12 + $0xe0] sm:$0xff] %vm2233_vm3, %v3861_v55 }
 0x406   : > { %v3840_v8 = vpop.f32.mrf.mxu3 }
 0x407   : > { %v3862_v52 = vadd.f32 %v3840_v8, %v3711_v58 }
 0x409   : > { %3878 = vst.msk [vmem:[%s5579_s12 + $0xe8] sm:$0xff] %vm2233_vm3, %v3862_v52 }
 0x40e   : > { %v3843_v39 = vpop.f32.mrf.mxu3 }
 0x40f   : > { %v3863_v22 = vadd.f32 %v3843_v39, %v3712_v38 }
 0x411   : > { %3879 = vst.msk [vmem:[%s5579_s12 + $0xf0] sm:$0xff] %vm2233_vm3, %v3863_v22 }
 0x416   : > { %v3846_v46 = vpop.f32.mrf.mxu3 }
 0x417   : > { %v3864_v59 = vadd.f32 %v3846_v46, %v3713_v41 }
 0x419   : > { %3880 = vst.msk [vmem:[%s5579_s12 + $0xf8] sm:$0xff] %vm2233_vm3, %v3864_v59 }
 0x41a PF: > { %s16_s21 = sadd.s32 1, %s4430_s21  }
 0x41b   : > { %p13_p4 = scmp.ge.s32.totalorder %s16_s21, 4  }
 0x41d   :  { %15 = sbr.rel (!%p13_p4) target bundleno = 1 (0x1), region = 83 }

</bundles_post_ra>
